<compile_context>
chip_gen: v6e
topology: v6e:2x2x1
jax: 0.10.0
libtpu: 0.0.40
codegen_flags: <defaults>
</compile_context>

<pallas_src>
import jax
import jax.numpy as jnp
import numpy as np
from jax import lax
from jax.experimental import pallas as pl
from jax.experimental.pallas import tpu as pltpu


# ----------------------------- Pallas kernel -----------------------------

def _lap_down_kernel(xph_ref, wsq_ref, bsq_ref, w1ab_ref, w1cd_ref,
                     bab_ref, bcd_ref, w2_ref, b2_ref, wf_ref, bf_ref,
                     alpha_ref, o_ref, pad_ref):
    nb, _, Hp, Wp, Ci = xph_ref.shape
    P = Hp * Wp
    M = nb * P
    lap = pad_ref.shape[-1]            # LAP_ch = output_ch // 4
    cdt = w1ab_ref.dtype               # MXU operand dtype (f32 or bf16)

    # ---- MaxPool2d(2,2): elementwise max over the 4 pre-split phases ----
    pooled = jnp.maximum(jnp.maximum(xph_ref[:, 0], xph_ref[:, 1]),
                         jnp.maximum(xph_ref[:, 2], xph_ref[:, 3]))
    main2d = pooled.reshape(M, Ci)                                   # (M, Ci)

    # ---- LAP_squeeze_1x1 + BN (scale folded into weight, shift as bias) ----
    s2d = jnp.dot(main2d.astype(cdt), wsq_ref[...],
                  preferred_element_type=jnp.float32) + bsq_ref[...]  # (M, lap)

    # ---- zero only the halo border strips (every step -> megacore-safe) ----
    zr = jnp.zeros((nb, 1, Wp + 16, lap), jnp.float32)
    pad_ref[:, 0:1, :, :] = zr
    pad_ref[:, Hp + 1:Hp + 2, :, :] = zr
    zc = jnp.zeros((nb, Hp, 8, lap), jnp.float32)
    pad_ref[:, 1:Hp + 1, 0:8, :] = zc
    pad_ref[:, 1:Hp + 1, Wp + 8:Wp + 16, :] = zc

    def shifted_taps(feat2d, taps):
        # Write the interior at sublane-aligned column offset 8, reload, and
        # return the shifted windows, each reshaped to (M, lap).
        pad_ref[:, 1:Hp + 1, 8:8 + Wp, :] = feat2d.reshape(nb, Hp, Wp, lap)
        fp = pad_ref[...]
        return [fp[:, ky:ky + Hp, 7 + kx:7 + kx + Wp, :].reshape(M, lap)
                for (ky, kx) in taps]

    # ---- stage 1: the four first convs as ONE K-fused im2col, two dots ----
    taps9 = [(ky, kx) for ky in range(3) for kx in range(3)]
    col9 = jnp.concatenate(shifted_taps(s2d, taps9), axis=-1).astype(cdt)
    ab = jnp.dot(col9, w1ab_ref[...],
                 preferred_element_type=jnp.float32) + bab_ref[...]   # [a | b]
    cd1 = jnp.dot(col9, w1cd_ref[...],
                  preferred_element_type=jnp.float32) + bcd_ref[...]  # [c1| d1]

    # ---- stage 2: depthwise (1,3)/(3,1) second convs on the VPU ----
    taps5 = [(0, 1), (1, 0), (1, 1), (1, 2), (2, 1)]
    cd2 = jnp.zeros((M, lap), jnp.float32) + b2_ref[...]
    for t, tap in enumerate(shifted_taps(cd1, taps5)):
        cd2 = cd2 + tap * w2_ref[t]                  # (1, lap) lane broadcast

    # ---- PReLU + channel shuffle + grouped 1x1 fusion (one dense dot) ----
    alpha = alpha_ref[0]
    z = jnp.concatenate([ab, cd2, main2d], axis=-1)  # (M, Co) in cat order
    z = jnp.where(z >= 0.0, z, alpha * z)
    out = jnp.dot(z.astype(cdt), wf_ref[...],
                  preferred_element_type=jnp.float32) + bf_ref[...]
    o_ref[...] = out.reshape(o_ref.shape).astype(o_ref.dtype)


# ----------------------------- host-side weight prep -----------------------------

def _fold_bn(bn, eps=1e-5):
    gamma, beta, mean, var = bn
    scale = gamma / jnp.sqrt(var + eps)
    shift = beta - mean * scale
    return scale, shift


def _grouped_first_dense(wg_tap, scale, ipg):
    # wg_tap: (half, ipg) grouped weight slice at one spatial tap ->
    # block-diagonal dense (half*ipg, half), BN scale folded in.
    half = wg_tap.shape[0]
    lap = half * ipg
    rows = jnp.arange(lap)
    g = rows // ipg
    ci = rows % ipg
    dense = jnp.zeros((lap, half), jnp.float32)
    return dense.at[rows, g].set(wg_tap[g, ci] * scale[g])


def _build_kernel_weights(params, *, compute_dtype=jnp.float32, eps=1e-5):
    Co = params['w_fuse'].shape[0]
    lap = Co // 4
    half = lap // 2
    ipg = lap // half                  # in-channels per group (= 2)

    s_sq, sh_sq = _fold_bn(params['bn_sq'], eps)
    s_2, sh_2 = _fold_bn(params['bn_b2'], eps)
    s_4, sh_4 = _fold_bn(params['bn_b4'], eps)
    s_1a, sh_1a = _fold_bn(params['bn_b1a'], eps)
    s_1b, sh_1b = _fold_bn(params['bn_b1b'], eps)
    s_3a, sh_3a = _fold_bn(params['bn_b3a'], eps)
    s_3b, sh_3b = _fold_bn(params['bn_b3b'], eps)

    # squeeze 1x1 (Ci -> lap), BN scale folded
    w_sq = params['w_sq'][:, :, 0, 0].T * s_sq[None, :]
    b_sq = sh_sq.reshape(1, lap)

    # stage-1 per-tap weights, columns [a | b | c1 | d1]; the K-fused im2col
    # row order is tap-major (row = t*lap + c  <->  tap t, squeeze channel c).
    w1 = jnp.zeros((9, lap, 2 * lap), jnp.float32)
    for ky in range(3):
        for kx in range(3):
            t = ky * 3 + kx
            blk = jnp.zeros((lap, 2 * lap), jnp.float32)
            # branch_2: 3x3 grouped conv (all 9 taps)
            blk = blk.at[:, 0:half].set(
                _grouped_first_dense(params['w_b2'][:, :, ky, kx], s_2, ipg))
            if ky == 1 and kx == 1:    # branch_4: 1x1 (center tap only)
                blk = blk.at[:, half:2 * half].set(
                    _grouped_first_dense(params['w_b4'][:, :, 0, 0], s_4, ipg))
            if kx == 1:                # branch_1 first conv: (3,1), pad (1,0)
                blk = blk.at[:, 2 * half:3 * half].set(
                    _grouped_first_dense(params['w_b1a'][:, :, ky, 0], s_1a, ipg))
            if ky == 1:                # branch_3 first conv: (1,3), pad (0,1)
                blk = blk.at[:, 3 * half:4 * half].set(
                    _grouped_first_dense(params['w_b3a'][:, :, 0, kx], s_3a, ipg))
            w1 = w1.at[t].set(blk)
    w1r = w1.reshape(9 * lap, 2 * lap)
    w1_ab, w1_cd = w1r[:, :lap], w1r[:, lap:]
    b_ab = jnp.concatenate([sh_2, sh_4]).reshape(1, lap)
    b_cd = jnp.concatenate([sh_1a, sh_3a]).reshape(1, lap)

    # stage-2 depthwise per-channel weights on [c1 | d1] (applied as VPU FMAs)
    taps5 = [(0, 1), (1, 0), (1, 1), (1, 2), (2, 1)]
    w2v = jnp.zeros((5, lap), jnp.float32)
    for t, (ky, kx) in enumerate(taps5):
        if ky == 1:   # branch_1 second conv: depthwise (1,3) on c1 channels
            w2v = w2v.at[t, :half].set(params['w_b1b'][:, 0, 0, kx] * s_1b)
        if kx == 1:   # branch_3 second conv: depthwise (3,1) on d1 channels
            w2v = w2v.at[t, half:].set(params['w_b3b'][:, 0, ky, 0] * s_3b)
    b_2 = jnp.concatenate([sh_1b, sh_3b]).reshape(1, lap)

    # LAP_group_fusion: channel shuffle + grouped 1x1 conv (with bias) as one
    # dense (Co, Co) matmul in *cat* channel order [a,b | c,d | main].
    wf = jnp.zeros((Co, Co), jnp.float32)
    k = jnp.arange(Co)
    for j in range(4):
        wf = wf.at[j * lap + k // 4, k].set(params['w_fuse'][:, j, 0, 0])

    cdt = compute_dtype
    return dict(w_sq=w_sq.astype(cdt), b_sq=b_sq,
                w1_ab=w1_ab.astype(cdt), w1_cd=w1_cd.astype(cdt),
                b_ab=b_ab, b_cd=b_cd,
                w2v=w2v.reshape(5, 1, lap), b_2=b_2,
                w_f=wf.astype(cdt), b_f=params['b_fuse'].reshape(1, Co))


# ----------------------------- Nb (images per grid step) -----------------------------

def _round_up(v, m):
    return (v + m - 1) // m * m


def _pick_nb(N, Hp, Wp, Ci, Co, lap, budget_bytes=24 * 1024 * 1024):
    """Largest divisor of N that fits the VMEM budget while keeping >= 2 grid
    steps (so both v7x TensorCores get work)."""
    P = Hp * Wp
    per_img = (
        4 * Hp * _round_up(Wp, 8) * _round_up(Ci, 128) * 4 * 2        # input phases (double-buffered)
        + _round_up(P, 8) * _round_up(Co, 128) * 4 * 2                # output tile (double-buffered)
        + (Hp + 2) * _round_up(Wp + 16, 8) * _round_up(lap, 128) * 4  # pad scratch
    )
    nb = 1
    for cand in range(1, N + 1):
        if N % cand:
            continue
        if N >= 2 and N // cand < 2:
            continue
        if cand * per_img > budget_bytes:
            continue
        nb = cand
    return nb


# ----------------------------- public forward -----------------------------

def downsampling_lap_forward_nhwc(x_nhwc, params, *, compute_dtype=jnp.float32,
                                  nb=None):
    """DownSamplingLAP.forward on NHWC input; returns NHWC (N, H/2, W/2, Co)."""
    N, Hin, Win, Ci = x_nhwc.shape
    Co = params['w_fuse'].shape[0]
    lap = Co // 4
    assert Co % 8 == 0 and Ci == 2 * lap, \
        "DownSamplingLAP requires output_ch % 8 == 0 and input_ch == output_ch // 2"
    assert Hin % 2 == 0 and Win % 2 == 0
    Hp, Wp = Hin // 2, Win // 2
    P = Hp * Wp

    if nb is None:
        nb = _pick_nb(N, Hp, Wp, Ci, Co, lap)
    assert N % nb == 0
    G = N // nb

    kw = _build_kernel_weights(params, compute_dtype=compute_dtype)

    # pre-split the 4 max-pool phases (single XLA layout pass, fuses with any
    # surrounding transpose): (N, 4, Hp, Wp, Ci), phase = 2*dy + dx
    xph = x_nhwc.reshape(N, Hp, 2, Wp, 2, Ci)
    xph = jnp.transpose(xph, (0, 2, 4, 1, 3, 5)).reshape(N, 4, Hp, Wp, Ci)

    out = pl.pallas_call(
        _lap_down_kernel,
        out_shape=jax.ShapeDtypeStruct((N, P, Co), jnp.float32),
        grid=(G,),
        in_specs=[
            pl.BlockSpec((nb, 4, Hp, Wp, Ci), lambda g: (g, 0, 0, 0, 0)),
            pl.BlockSpec((Ci, lap), lambda g: (0, 0)),
            pl.BlockSpec((1, lap), lambda g: (0, 0)),
            pl.BlockSpec((9 * lap, lap), lambda g: (0, 0)),
            pl.BlockSpec((9 * lap, lap), lambda g: (0, 0)),
            pl.BlockSpec((1, lap), lambda g: (0, 0)),
            pl.BlockSpec((1, lap), lambda g: (0, 0)),
            pl.BlockSpec((5, 1, lap), lambda g: (0, 0, 0)),
            pl.BlockSpec((1, lap), lambda g: (0, 0)),
            pl.BlockSpec((Co, Co), lambda g: (0, 0)),
            pl.BlockSpec((1, Co), lambda g: (0, 0)),
            pl.BlockSpec(memory_space=pltpu.MemorySpace.SMEM),
        ],
        out_specs=pl.BlockSpec((nb, P, Co), lambda g: (g, 0, 0)),
        scratch_shapes=[pltpu.VMEM((nb, Hp + 2, Wp + 16, lap), jnp.float32)],
        compiler_params=pltpu.CompilerParams(
            dimension_semantics=("parallel",),
            vmem_limit_bytes=48 * 1024 * 1024),
    )(xph, kw['w_sq'], kw['b_sq'], kw['w1_ab'], kw['w1_cd'], kw['b_ab'],
      kw['b_cd'], kw['w2v'], kw['b_2'], kw['w_f'], kw['b_f'], params['alpha'])

    return out.reshape(N, Hp, Wp, Co)


def downsampling_lap_forward(x_nchw, params, *, compute_dtype=jnp.float32,
                             nb=None):
    """NCHW wrapper matching the PyTorch module's layout (eval mode)."""
    # TODO(synk): the NCHW<->NHWC transposes below are full HBM passes over a
    # memory-bound layer; NHWC-native pipelines should call
    # downsampling_lap_forward_nhwc directly to skip them.
    x = jnp.transpose(x_nchw, (0, 2, 3, 1))
    y = downsampling_lap_forward_nhwc(x, params, compute_dtype=compute_dtype,
                                      nb=nb)
    return jnp.transpose(y, (0, 3, 1, 2))


# ----------------------------- parameter init -----------------------------

def init_params(key, input_ch, output_ch):
    lap = output_ch // 4
    half = lap // 2
    ipg = lap // half
    ks = jax.random.split(key, 16)

    def conv(k, shape):
        return 0.2 * jax.random.normal(k, shape, jnp.float32)

    def bn(k, c):
        kg, kb, km, kv = jax.random.split(k, 4)
        gamma = 1.0 + 0.1 * jax.random.normal(kg, (c,), jnp.float32)
        beta = 0.1 * jax.random.normal(kb, (c,), jnp.float32)
        mean = 0.1 * jax.random.normal(km, (c,), jnp.float32)
        var = 1.0 + 0.1 * jax.random.uniform(kv, (c,), jnp.float32)
        return gamma, beta, mean, var

    return dict(
        w_sq=conv(ks[0], (lap, input_ch, 1, 1)), bn_sq=bn(ks[1], lap),
        w_b1a=conv(ks[2], (half, ipg, 3, 1)), bn_b1a=bn(ks[3], half),
        w_b1b=conv(ks[4], (half, 1, 1, 3)), bn_b1b=bn(ks[5], half),
        w_b2=conv(ks[6], (half, ipg, 3, 3)), bn_b2=bn(ks[7], half),
        w_b3a=conv(ks[8], (half, ipg, 1, 3)), bn_b3a=bn(ks[9], half),
        w_b3b=conv(ks[10], (half, 1, 3, 1)), bn_b3b=bn(ks[11], half),
        w_b4=conv(ks[12], (half, ipg, 1, 1)), bn_b4=bn(ks[13], half),
        w_fuse=conv(ks[14], (output_ch, 4, 1, 1)),
        b_fuse=0.1 * jax.random.normal(ks[15], (output_ch,), jnp.float32),
        alpha=jnp.full((1,), 0.25, jnp.float32),   # nn.PReLU() default
    )


# ----------------------------- plain-JAX reference -----------------------------

def reference_forward(x_nchw, params, eps=1e-5):
    Co = params['w_fuse'].shape[0]
    lap = Co // 4
    half = lap // 2
    x = jnp.transpose(x_nchw, (0, 2, 3, 1))             # NHWC
    N, Hin, Win, Ci = x.shape
    Hp, Wp = Hin // 2, Win // 2

    xm = x.reshape(N, Hp, 2, Wp, 2, Ci).max(axis=(2, 4))    # MaxPool2d(2,2)
    main = xm
    dn = ('NHWC', 'HWIO', 'NHWC')

    def conv_bn(inp, w_oihw, bn, padding, groups):
        w = jnp.transpose(w_oihw, (2, 3, 1, 0))
        y = lax.conv_general_dilated(inp, w, (1, 1), padding,
                                     dimension_numbers=dn,
                                     feature_group_count=groups)
        scale, shift = _fold_bn(bn, eps)
        return y * scale + shift

    s = conv_bn(xm, params['w_sq'], params['bn_sq'], 'VALID', 1)
    a = conv_bn(s, params['w_b2'], params['bn_b2'], ((1, 1), (1, 1)), half)
    b = conv_bn(s, params['w_b4'], params['bn_b4'], 'VALID', half)
    c = conv_bn(s, params['w_b1a'], params['bn_b1a'], ((1, 1), (0, 0)), half)
    c = conv_bn(c, params['w_b1b'], params['bn_b1b'], ((0, 0), (1, 1)), half)
    d = conv_bn(s, params['w_b3a'], params['bn_b3a'], ((0, 0), (1, 1)), half)
    d = conv_bn(d, params['w_b3b'], params['bn_b3b'], ((1, 1), (0, 0)), half)

    cat = jnp.concatenate([a, b, c, d, main], axis=-1)       # (N,Hp,Wp,Co)
    shuf = jnp.transpose(cat.reshape(N, Hp, Wp, 4, lap), (0, 1, 2, 4, 3))
    shuf = shuf.reshape(N, Hp, Wp, Co)
    alpha = params['alpha'][0]
    z = jnp.where(shuf >= 0, shuf, alpha * shuf)
    wf = jnp.transpose(params['w_fuse'], (2, 3, 1, 0))
    out = lax.conv_general_dilated(z, wf, (1, 1), 'VALID',
                                   dimension_numbers=dn,
                                   feature_group_count=lap) + params['b_fuse']
    return jnp.transpose(out, (0, 3, 1, 2))


# ----------------------------- main -----------------------------

if __name__ == "__main__":
    key = jax.random.PRNGKey(0)
    kx_, kp_ = jax.random.split(key)

    # Module constraints: output_ch % 8 == 0, input_ch == output_ch // 2.
    # N=4 exercises the Nb=2 images-per-step batching with a 2-step grid.
    N, Ci, Hin, Win = 4, 8, 16, 16
    Co = 2 * Ci
    x = jax.random.normal(kx_, (N, Ci, Hin, Win), jnp.float32)
    params = init_params(kp_, Ci, Co)

    ref = jax.block_until_ready(reference_forward(x, params))

    # f32 MXU operands (exact path, strict tolerance).
    fwd = jax.jit(downsampling_lap_forward)
    out = jax.block_until_ready(fwd(x, params))
    assert out.shape == (N, Co, Hin // 2, Win // 2), out.shape
    np.testing.assert_allclose(np.asarray(out), np.asarray(ref),
                               rtol=5e-4, atol=5e-4)

    # bf16 MXU operands (v6e/v7x fast path), f32 accumulation -> loose tolerance.
    fwd_bf16 = jax.jit(lambda xx, pp: downsampling_lap_forward(
        xx, pp, compute_dtype=jnp.bfloat16))
    out_b = jax.block_until_ready(fwd_bf16(x, params))
    np.testing.assert_allclose(np.asarray(out_b), np.asarray(ref),
                               rtol=5e-2, atol=5e-2)

    print("KERNEL_OK")
</pallas_src>

<mosaic_0001>
module attributes {stable_mosaic.version = 11 : i64} {
  func.func @_lap_down_kernel(%arg0: i32, %arg1: memref<2x4x8x8x8xf32, #tpu.memory_space<vmem>>, %arg2: memref<8x4xf32, #tpu.memory_space<vmem>>, %arg3: memref<1x4xf32, #tpu.memory_space<vmem>>, %arg4: memref<36x4xf32, #tpu.memory_space<vmem>>, %arg5: memref<36x4xf32, #tpu.memory_space<vmem>>, %arg6: memref<1x4xf32, #tpu.memory_space<vmem>>, %arg7: memref<1x4xf32, #tpu.memory_space<vmem>>, %arg8: memref<5x1x4xf32, #tpu.memory_space<vmem>>, %arg9: memref<1x4xf32, #tpu.memory_space<vmem>>, %arg10: memref<16x16xf32, #tpu.memory_space<vmem>>, %arg11: memref<1x16xf32, #tpu.memory_space<vmem>>, %arg12: memref<1xf32, #tpu.memory_space<smem>>, %arg13: memref<2x64x16xf32, #tpu.memory_space<vmem>>, %arg14: memref<2x10x24x4xf32, #tpu.memory_space<vmem>>) attributes {dimension_semantics = [#tpu.dimension_semantics<parallel>], iteration_bounds = array<i64: 2>, scalar_prefetch = 0 : i64, scratch_operands = 1 : i64, tpu.core_type = #tpu.core_type<tc>, window_params = [{transform_indices = @transform_0, window_bounds = array<i64: 2, 4, 8, 8, 8>}, {pipeline_mode = #tpu.pipeline_mode<synchronous>, transform_indices = @transform_1, window_bounds = array<i64: 8, 4>}, {pipeline_mode = #tpu.pipeline_mode<synchronous>, transform_indices = @transform_2, window_bounds = array<i64: 1, 4>}, {pipeline_mode = #tpu.pipeline_mode<synchronous>, transform_indices = @transform_3, window_bounds = array<i64: 36, 4>}, {pipeline_mode = #tpu.pipeline_mode<synchronous>, transform_indices = @transform_4, window_bounds = array<i64: 36, 4>}, {pipeline_mode = #tpu.pipeline_mode<synchronous>, transform_indices = @transform_5, window_bounds = array<i64: 1, 4>}, {pipeline_mode = #tpu.pipeline_mode<synchronous>, transform_indices = @transform_6, window_bounds = array<i64: 1, 4>}, {pipeline_mode = #tpu.pipeline_mode<synchronous>, transform_indices = @transform_7, window_bounds = array<i64: 5, 1, 4>}, {pipeline_mode = #tpu.pipeline_mode<synchronous>, transform_indices = @transform_8, window_bounds = array<i64: 1, 4>}, {pipeline_mode = #tpu.pipeline_mode<synchronous>, transform_indices = @transform_9, window_bounds = array<i64: 16, 16>}, {pipeline_mode = #tpu.pipeline_mode<synchronous>, transform_indices = @transform_10, window_bounds = array<i64: 1, 16>}, {transform_indices = @transform_11, window_bounds = array<i64: 1>}, {transform_indices = @transform_12, window_bounds = array<i64: 2, 64, 16>}]} {
    %c0 = arith.constant 0 : index
    %c0_0 = arith.constant 0 : index
    %c0_1 = arith.constant 0 : index
    %c0_2 = arith.constant 0 : index
    %c0_3 = arith.constant 0 : index
    %0 = vector.load %arg1[%c0, %c0_0, %c0_1, %c0_2, %c0_3] : memref<2x4x8x8x8xf32, #tpu.memory_space<vmem>>, vector<2x1x8x8x8xf32>
    %1 = vector.shape_cast %0 : vector<2x1x8x8x8xf32> to vector<2x8x8x8xf32>
    %c0_4 = arith.constant 0 : index
    %c1 = arith.constant 1 : index
    %c0_5 = arith.constant 0 : index
    %c0_6 = arith.constant 0 : index
    %c0_7 = arith.constant 0 : index
    %2 = vector.load %arg1[%c0_4, %c1, %c0_5, %c0_6, %c0_7] : memref<2x4x8x8x8xf32, #tpu.memory_space<vmem>>, vector<2x1x8x8x8xf32>
    %3 = vector.shape_cast %2 : vector<2x1x8x8x8xf32> to vector<2x8x8x8xf32>
    %4 = arith.maximumf %1, %3 : vector<2x8x8x8xf32>
    %c0_8 = arith.constant 0 : index
    %c2 = arith.constant 2 : index
    %c0_9 = arith.constant 0 : index
    %c0_10 = arith.constant 0 : index
    %c0_11 = arith.constant 0 : index
    %5 = vector.load %arg1[%c0_8, %c2, %c0_9, %c0_10, %c0_11] : memref<2x4x8x8x8xf32, #tpu.memory_space<vmem>>, vector<2x1x8x8x8xf32>
    %6 = vector.shape_cast %5 : vector<2x1x8x8x8xf32> to vector<2x8x8x8xf32>
    %c0_12 = arith.constant 0 : index
    %c3 = arith.constant 3 : index
    %c0_13 = arith.constant 0 : index
    %c0_14 = arith.constant 0 : index
    %c0_15 = arith.constant 0 : index
    %7 = vector.load %arg1[%c0_12, %c3, %c0_13, %c0_14, %c0_15] : memref<2x4x8x8x8xf32, #tpu.memory_space<vmem>>, vector<2x1x8x8x8xf32>
    %8 = vector.shape_cast %7 : vector<2x1x8x8x8xf32> to vector<2x8x8x8xf32>
    %9 = arith.maximumf %6, %8 : vector<2x8x8x8xf32>
    %10 = arith.maximumf %4, %9 : vector<2x8x8x8xf32>
    %11 = vector.shape_cast %10 : vector<2x8x8x8xf32> to vector<128x8xf32>
    %c0_16 = arith.constant 0 : index
    %c0_17 = arith.constant 0 : index
    %12 = vector.load %arg2[%c0_16, %c0_17] : memref<8x4xf32, #tpu.memory_space<vmem>>, vector<8x4xf32>
    %cst = arith.constant dense<0.000000e+00> : vector<128x4xf32>
    %13 = tpu.matmul %11, %12, %cst {dimension_numbers = #tpu.dot_dimension_numbers<[1], [0], [0], [1], [0, 0, 1, 1], [], []>} : vector<128x8xf32>, vector<8x4xf32>, vector<128x4xf32> -> vector<128x4xf32>
    %c0_18 = arith.constant 0 : index
    %c0_19 = arith.constant 0 : index
    %14 = vector.load %arg3[%c0_18, %c0_19] : memref<1x4xf32, #tpu.memory_space<vmem>>, vector<1x4xf32>
    %15 = vector.broadcast %14 : vector<1x4xf32> to vector<128x4xf32>
    %16 = arith.addf %13, %15 : vector<128x4xf32>
    %cst_20 = arith.constant 0.000000e+00 : f32
    %17 = vector.broadcast %cst_20 : f32 to vector<2x1x24x4xf32>
    %c0_21 = arith.constant 0 : index
    %c0_22 = arith.constant 0 : index
    %c0_23 = arith.constant 0 : index
    %c0_24 = arith.constant 0 : index
    %18 = vector.load %arg14[%c0_21, %c0_22, %c0_23, %c0_24] : memref<2x10x24x4xf32, #tpu.memory_space<vmem>>, vector<2x1x24x4xf32>
    tpu.vector_store %arg14[%c0_21, %c0_22, %c0_23, %c0_24], %17 {strides = array<i32>} : memref<2x10x24x4xf32, #tpu.memory_space<vmem>>, vector<2x1x24x4xf32>,
    %c0_25 = arith.constant 0 : index
    %c9 = arith.constant 9 : index
    %c0_26 = arith.constant 0 : index
    %c0_27 = arith.constant 0 : index
    %19 = vector.load %arg14[%c0_25, %c9, %c0_26, %c0_27] : memref<2x10x24x4xf32, #tpu.memory_space<vmem>>, vector<2x1x24x4xf32>
    tpu.vector_store %arg14[%c0_25, %c9, %c0_26, %c0_27], %17 {strides = array<i32>} : memref<2x10x24x4xf32, #tpu.memory_space<vmem>>, vector<2x1x24x4xf32>,
    %cst_28 = arith.constant 0.000000e+00 : f32
    %20 = vector.broadcast %cst_28 : f32 to vector<2x8x8x4xf32>
    %c0_29 = arith.constant 0 : index
    %c1_30 = arith.constant 1 : index
    %c0_31 = arith.constant 0 : index
    %c0_32 = arith.constant 0 : index
    %21 = vector.load %arg14[%c0_29, %c1_30, %c0_31, %c0_32] : memref<2x10x24x4xf32, #tpu.memory_space<vmem>>, vector<2x8x8x4xf32>
    tpu.vector_store %arg14[%c0_29, %c1_30, %c0_31, %c0_32], %20 {strides = array<i32>} : memref<2x10x24x4xf32, #tpu.memory_space<vmem>>, vector<2x8x8x4xf32>,
    %c0_33 = arith.constant 0 : index
    %c1_34 = arith.constant 1 : index
    %c16 = arith.constant 16 : index
    %c0_35 = arith.constant 0 : index
    %22 = vector.load %arg14[%c0_33, %c1_34, %c16, %c0_35] : memref<2x10x24x4xf32, #tpu.memory_space<vmem>>, vector<2x8x8x4xf32>
    tpu.vector_store %arg14[%c0_33, %c1_34, %c16, %c0_35], %20 {strides = array<i32>} : memref<2x10x24x4xf32, #tpu.memory_space<vmem>>, vector<2x8x8x4xf32>,
    %23 = vector.shape_cast %16 : vector<128x4xf32> to vector<2x8x8x4xf32>
    %c0_36 = arith.constant 0 : index
    %c1_37 = arith.constant 1 : index
    %c8 = arith.constant 8 : index
    %c0_38 = arith.constant 0 : index
    %24 = vector.load %arg14[%c0_36, %c1_37, %c8, %c0_38] : memref<2x10x24x4xf32, #tpu.memory_space<vmem>>, vector<2x8x8x4xf32>
    tpu.vector_store %arg14[%c0_36, %c1_37, %c8, %c0_38], %23 {strides = array<i32>} : memref<2x10x24x4xf32, #tpu.memory_space<vmem>>, vector<2x8x8x4xf32>,
    %c0_39 = arith.constant 0 : index
    %c0_40 = arith.constant 0 : index
    %c0_41 = arith.constant 0 : index
    %c0_42 = arith.constant 0 : index
    %25 = vector.load %arg14[%c0_39, %c0_40, %c0_41, %c0_42] : memref<2x10x24x4xf32, #tpu.memory_space<vmem>>, vector<2x10x24x4xf32>
    %26 = vector.extract_strided_slice %25 {offsets = [0, 0, 7, 0], sizes = [2, 8, 8, 4], strides = [1, 1, 1, 1]} : vector<2x10x24x4xf32> to vector<2x8x8x4xf32>
    %27 = vector.shape_cast %26 : vector<2x8x8x4xf32> to vector<128x4xf32>
    %28 = vector.extract_strided_slice %25 {offsets = [0, 0, 8, 0], sizes = [2, 8, 8, 4], strides = [1, 1, 1, 1]} : vector<2x10x24x4xf32> to vector<2x8x8x4xf32>
    %29 = vector.shape_cast %28 : vector<2x8x8x4xf32> to vector<128x4xf32>
    %30 = vector.extract_strided_slice %25 {offsets = [0, 0, 9, 0], sizes = [2, 8, 8, 4], strides = [1, 1, 1, 1]} : vector<2x10x24x4xf32> to vector<2x8x8x4xf32>
    %31 = vector.shape_cast %30 : vector<2x8x8x4xf32> to vector<128x4xf32>
    %32 = vector.extract_strided_slice %25 {offsets = [0, 1, 7, 0], sizes = [2, 8, 8, 4], strides = [1, 1, 1, 1]} : vector<2x10x24x4xf32> to vector<2x8x8x4xf32>
    %33 = vector.shape_cast %32 : vector<2x8x8x4xf32> to vector<128x4xf32>
    %34 = vector.extract_strided_slice %25 {offsets = [0, 1, 8, 0], sizes = [2, 8, 8, 4], strides = [1, 1, 1, 1]} : vector<2x10x24x4xf32> to vector<2x8x8x4xf32>
    %35 = vector.shape_cast %34 : vector<2x8x8x4xf32> to vector<128x4xf32>
    %36 = vector.extract_strided_slice %25 {offsets = [0, 1, 9, 0], sizes = [2, 8, 8, 4], strides = [1, 1, 1, 1]} : vector<2x10x24x4xf32> to vector<2x8x8x4xf32>
    %37 = vector.shape_cast %36 : vector<2x8x8x4xf32> to vector<128x4xf32>
    %38 = vector.extract_strided_slice %25 {offsets = [0, 2, 7, 0], sizes = [2, 8, 8, 4], strides = [1, 1, 1, 1]} : vector<2x10x24x4xf32> to vector<2x8x8x4xf32>
    %39 = vector.shape_cast %38 : vector<2x8x8x4xf32> to vector<128x4xf32>
    %40 = vector.extract_strided_slice %25 {offsets = [0, 2, 8, 0], sizes = [2, 8, 8, 4], strides = [1, 1, 1, 1]} : vector<2x10x24x4xf32> to vector<2x8x8x4xf32>
    %41 = vector.shape_cast %40 : vector<2x8x8x4xf32> to vector<128x4xf32>
    %42 = vector.extract_strided_slice %25 {offsets = [0, 2, 9, 0], sizes = [2, 8, 8, 4], strides = [1, 1, 1, 1]} : vector<2x10x24x4xf32> to vector<2x8x8x4xf32>
    %43 = vector.shape_cast %42 : vector<2x8x8x4xf32> to vector<128x4xf32>
    %44 = tpu.concatenate %27, %29, %31, %33, %35, %37, %39, %41, %43 in 1 : vector<128x4xf32>, vector<128x4xf32>, vector<128x4xf32>, vector<128x4xf32>, vector<128x4xf32>, vector<128x4xf32>, vector<128x4xf32>, vector<128x4xf32>, vector<128x4xf32> -> vector<128x36xf32>
    %c0_43 = arith.constant 0 : index
    %c0_44 = arith.constant 0 : index
    %45 = vector.load %arg4[%c0_43, %c0_44] : memref<36x4xf32, #tpu.memory_space<vmem>>, vector<36x4xf32>
    %cst_45 = arith.constant dense<0.000000e+00> : vector<128x4xf32>
    %46 = tpu.matmul %44, %45, %cst_45 {dimension_numbers = #tpu.dot_dimension_numbers<[1], [0], [0], [1], [0, 0, 1, 1], [], []>} : vector<128x36xf32>, vector<36x4xf32>, vector<128x4xf32> -> vector<128x4xf32>
    %c0_46 = arith.constant 0 : index
    %c0_47 = arith.constant 0 : index
    %47 = vector.load %arg6[%c0_46, %c0_47] : memref<1x4xf32, #tpu.memory_space<vmem>>, vector<1x4xf32>
    %48 = vector.broadcast %47 : vector<1x4xf32> to vector<128x4xf32>
    %49 = arith.addf %46, %48 : vector<128x4xf32>
    %c0_48 = arith.constant 0 : index
    %c0_49 = arith.constant 0 : index
    %50 = vector.load %arg5[%c0_48, %c0_49] : memref<36x4xf32, #tpu.memory_space<vmem>>, vector<36x4xf32>
    %cst_50 = arith.constant dense<0.000000e+00> : vector<128x4xf32>
    %51 = tpu.matmul %44, %50, %cst_50 {dimension_numbers = #tpu.dot_dimension_numbers<[1], [0], [0], [1], [0, 0, 1, 1], [], []>} : vector<128x36xf32>, vector<36x4xf32>, vector<128x4xf32> -> vector<128x4xf32>
    %c0_51 = arith.constant 0 : index
    %c0_52 = arith.constant 0 : index
    %52 = vector.load %arg7[%c0_51, %c0_52] : memref<1x4xf32, #tpu.memory_space<vmem>>, vector<1x4xf32>
    %53 = vector.broadcast %52 : vector<1x4xf32> to vector<128x4xf32>
    %54 = arith.addf %51, %53 : vector<128x4xf32>
    %cst_53 = arith.constant 0.000000e+00 : f32
    %55 = vector.broadcast %cst_53 : f32 to vector<128x4xf32>
    %c0_54 = arith.constant 0 : index
    %c0_55 = arith.constant 0 : index
    %56 = vector.load %arg9[%c0_54, %c0_55] : memref<1x4xf32, #tpu.memory_space<vmem>>, vector<1x4xf32>
    %57 = vector.broadcast %56 : vector<1x4xf32> to vector<128x4xf32>
    %58 = arith.addf %55, %57 : vector<128x4xf32>
    %59 = vector.shape_cast %54 : vector<128x4xf32> to vector<2x8x8x4xf32>
    %c0_56 = arith.constant 0 : index
    %c1_57 = arith.constant 1 : index
    %c8_58 = arith.constant 8 : index
    %c0_59 = arith.constant 0 : index
    %60 = vector.load %arg14[%c0_56, %c1_57, %c8_58, %c0_59] : memref<2x10x24x4xf32, #tpu.memory_space<vmem>>, vector<2x8x8x4xf32>
    tpu.vector_store %arg14[%c0_56, %c1_57, %c8_58, %c0_59], %59 {strides = array<i32>} : memref<2x10x24x4xf32, #tpu.memory_space<vmem>>, vector<2x8x8x4xf32>,
    %c0_60 = arith.constant 0 : index
    %c0_61 = arith.constant 0 : index
    %c0_62 = arith.constant 0 : index
    %c0_63 = arith.constant 0 : index
    %61 = vector.load %arg14[%c0_60, %c0_61, %c0_62, %c0_63] : memref<2x10x24x4xf32, #tpu.memory_space<vmem>>, vector<2x10x24x4xf32>
    %62 = vector.extract_strided_slice %61 {offsets = [0, 0, 8, 0], sizes = [2, 8, 8, 4], strides = [1, 1, 1, 1]} : vector<2x10x24x4xf32> to vector<2x8x8x4xf32>
    %63 = vector.shape_cast %62 : vector<2x8x8x4xf32> to vector<128x4xf32>
    %64 = vector.extract_strided_slice %61 {offsets = [0, 1, 7, 0], sizes = [2, 8, 8, 4], strides = [1, 1, 1, 1]} : vector<2x10x24x4xf32> to vector<2x8x8x4xf32>
    %65 = vector.shape_cast %64 : vector<2x8x8x4xf32> to vector<128x4xf32>
    %66 = vector.extract_strided_slice %61 {offsets = [0, 1, 8, 0], sizes = [2, 8, 8, 4], strides = [1, 1, 1, 1]} : vector<2x10x24x4xf32> to vector<2x8x8x4xf32>
    %67 = vector.shape_cast %66 : vector<2x8x8x4xf32> to vector<128x4xf32>
    %68 = vector.extract_strided_slice %61 {offsets = [0, 1, 9, 0], sizes = [2, 8, 8, 4], strides = [1, 1, 1, 1]} : vector<2x10x24x4xf32> to vector<2x8x8x4xf32>
    %69 = vector.shape_cast %68 : vector<2x8x8x4xf32> to vector<128x4xf32>
    %70 = vector.extract_strided_slice %61 {offsets = [0, 2, 8, 0], sizes = [2, 8, 8, 4], strides = [1, 1, 1, 1]} : vector<2x10x24x4xf32> to vector<2x8x8x4xf32>
    %71 = vector.shape_cast %70 : vector<2x8x8x4xf32> to vector<128x4xf32>
    %c0_64 = arith.constant 0 : index
    %c0_65 = arith.constant 0 : index
    %c0_66 = arith.constant 0 : index
    %72 = vector.load %arg8[%c0_64, %c0_65, %c0_66] : memref<5x1x4xf32, #tpu.memory_space<vmem>>, vector<1x1x4xf32>
    %73 = vector.shape_cast %72 : vector<1x1x4xf32> to vector<1x4xf32>
    %74 = vector.broadcast %73 : vector<1x4xf32> to vector<128x4xf32>
    %75 = arith.mulf %63, %74 : vector<128x4xf32>
    %76 = arith.addf %58, %75 : vector<128x4xf32>
    %c1_67 = arith.constant 1 : index
    %c0_68 = arith.constant 0 : index
    %c0_69 = arith.constant 0 : index
    %77 = vector.load %arg8[%c1_67, %c0_68, %c0_69] : memref<5x1x4xf32, #tpu.memory_space<vmem>>, vector<1x1x4xf32>
    %78 = vector.shape_cast %77 : vector<1x1x4xf32> to vector<1x4xf32>
    %79 = vector.broadcast %78 : vector<1x4xf32> to vector<128x4xf32>
    %80 = arith.mulf %65, %79 : vector<128x4xf32>
    %81 = arith.addf %76, %80 : vector<128x4xf32>
    %c2_70 = arith.constant 2 : index
    %c0_71 = arith.constant 0 : index
    %c0_72 = arith.constant 0 : index
    %82 = vector.load %arg8[%c2_70, %c0_71, %c0_72] : memref<5x1x4xf32, #tpu.memory_space<vmem>>, vector<1x1x4xf32>
    %83 = vector.shape_cast %82 : vector<1x1x4xf32> to vector<1x4xf32>
    %84 = vector.broadcast %83 : vector<1x4xf32> to vector<128x4xf32>
    %85 = arith.mulf %67, %84 : vector<128x4xf32>
    %86 = arith.addf %81, %85 : vector<128x4xf32>
    %c3_73 = arith.constant 3 : index
    %c0_74 = arith.constant 0 : index
    %c0_75 = arith.constant 0 : index
    %87 = vector.load %arg8[%c3_73, %c0_74, %c0_75] : memref<5x1x4xf32, #tpu.memory_space<vmem>>, vector<1x1x4xf32>
    %88 = vector.shape_cast %87 : vector<1x1x4xf32> to vector<1x4xf32>
    %89 = vector.broadcast %88 : vector<1x4xf32> to vector<128x4xf32>
    %90 = arith.mulf %69, %89 : vector<128x4xf32>
    %91 = arith.addf %86, %90 : vector<128x4xf32>
    %c4 = arith.constant 4 : index
    %c0_76 = arith.constant 0 : index
    %c0_77 = arith.constant 0 : index
    %92 = vector.load %arg8[%c4, %c0_76, %c0_77] : memref<5x1x4xf32, #tpu.memory_space<vmem>>, vector<1x1x4xf32>
    %93 = vector.shape_cast %92 : vector<1x1x4xf32> to vector<1x4xf32>
    %94 = vector.broadcast %93 : vector<1x4xf32> to vector<128x4xf32>
    %95 = arith.mulf %71, %94 : vector<128x4xf32>
    %96 = arith.addf %91, %95 : vector<128x4xf32>
    %c0_78 = arith.constant 0 : index
    %97 = memref.load %arg12[%c0_78] : memref<1xf32, #tpu.memory_space<smem>>
    %98 = tpu.concatenate %49, %96, %11 in 1 : vector<128x4xf32>, vector<128x4xf32>, vector<128x8xf32> -> vector<128x16xf32>
    %cst_79 = arith.constant 0.000000e+00 : f32
    %99 = vector.broadcast %cst_79 : f32 to vector<128x16xf32>
    %100 = arith.cmpf oge, %98, %99 : vector<128x16xf32>
    %101 = vector.broadcast %97 : f32 to vector<128x16xf32>
    %102 = arith.mulf %101, %98 : vector<128x16xf32>
    %103 = arith.select %100, %98, %102 : vector<128x16xi1>, vector<128x16xf32>
    %c0_80 = arith.constant 0 : index
    %c0_81 = arith.constant 0 : index
    %104 = vector.load %arg10[%c0_80, %c0_81] : memref<16x16xf32, #tpu.memory_space<vmem>>, vector<16x16xf32>
    %cst_82 = arith.constant dense<0.000000e+00> : vector<128x16xf32>
    %105 = tpu.matmul %103, %104, %cst_82 {dimension_numbers = #tpu.dot_dimension_numbers<[1], [0], [0], [1], [0, 0, 1, 1], [], []>} : vector<128x16xf32>, vector<16x16xf32>, vector<128x16xf32> -> vector<128x16xf32>
    %c0_83 = arith.constant 0 : index
    %c0_84 = arith.constant 0 : index
    %106 = vector.load %arg11[%c0_83, %c0_84] : memref<1x16xf32, #tpu.memory_space<vmem>>, vector<1x16xf32>
    %107 = vector.broadcast %106 : vector<1x16xf32> to vector<128x16xf32>
    %108 = arith.addf %105, %107 : vector<128x16xf32>
    %109 = vector.shape_cast %108 : vector<128x16xf32> to vector<2x64x16xf32>
    %c0_85 = arith.constant 0 : index
    %c0_86 = arith.constant 0 : index
    %c0_87 = arith.constant 0 : index
    %110 = vector.load %arg13[%c0_85, %c0_86, %c0_87] : memref<2x64x16xf32, #tpu.memory_space<vmem>>, vector<2x64x16xf32>
    tpu.vector_store %arg13[%c0_85, %c0_86, %c0_87], %109 {strides = array<i32>} : memref<2x64x16xf32, #tpu.memory_space<vmem>>, vector<2x64x16xf32>,
    return
  }
  func.func @transform_0(%arg0: i32) -> (i32, i32, i32, i32, i32) {
    %c0_i32 = arith.constant 0 : i32
    %c0_i32_0 = arith.constant 0 : i32
    %c0_i32_1 = arith.constant 0 : i32
    %c0_i32_2 = arith.constant 0 : i32
    %c0_i32_3 = arith.constant 0 : i32
    return %arg0, %c0_i32, %c0_i32_0, %c0_i32_1, %c0_i32_2 : i32, i32, i32, i32, i32
  }
  func.func @transform_1(%arg0: i32) -> (i32, i32) {
    %c0_i32 = arith.constant 0 : i32
    %c0_i32_0 = arith.constant 0 : i32
    %c0_i32_1 = arith.constant 0 : i32
    return %c0_i32, %c0_i32_0 : i32, i32
  }
  func.func @transform_2(%arg0: i32) -> (i32, i32) {
    %c0_i32 = arith.constant 0 : i32
    %c0_i32_0 = arith.constant 0 : i32
    %c0_i32_1 = arith.constant 0 : i32
    return %c0_i32, %c0_i32_0 : i32, i32
  }
  func.func @transform_3(%arg0: i32) -> (i32, i32) {
    %c0_i32 = arith.constant 0 : i32
    %c0_i32_0 = arith.constant 0 : i32
    %c0_i32_1 = arith.constant 0 : i32
    return %c0_i32, %c0_i32_0 : i32, i32
  }
  func.func @transform_4(%arg0: i32) -> (i32, i32) {
    %c0_i32 = arith.constant 0 : i32
    %c0_i32_0 = arith.constant 0 : i32
    %c0_i32_1 = arith.constant 0 : i32
    return %c0_i32, %c0_i32_0 : i32, i32
  }
  func.func @transform_5(%arg0: i32) -> (i32, i32) {
    %c0_i32 = arith.constant 0 : i32
    %c0_i32_0 = arith.constant 0 : i32
    %c0_i32_1 = arith.constant 0 : i32
    return %c0_i32, %c0_i32_0 : i32, i32
  }
  func.func @transform_6(%arg0: i32) -> (i32, i32) {
    %c0_i32 = arith.constant 0 : i32
    %c0_i32_0 = arith.constant 0 : i32
    %c0_i32_1 = arith.constant 0 : i32
    return %c0_i32, %c0_i32_0 : i32, i32
  }
  func.func @transform_7(%arg0: i32) -> (i32, i32, i32) {
    %c0_i32 = arith.constant 0 : i32
    %c0_i32_0 = arith.constant 0 : i32
    %c0_i32_1 = arith.constant 0 : i32
    %c0_i32_2 = arith.constant 0 : i32
    return %c0_i32, %c0_i32_0, %c0_i32_1 : i32, i32, i32
  }
  func.func @transform_8(%arg0: i32) -> (i32, i32) {
    %c0_i32 = arith.constant 0 : i32
    %c0_i32_0 = arith.constant 0 : i32
    %c0_i32_1 = arith.constant 0 : i32
    return %c0_i32, %c0_i32_0 : i32, i32
  }
  func.func @transform_9(%arg0: i32) -> (i32, i32) {
    %c0_i32 = arith.constant 0 : i32
    %c0_i32_0 = arith.constant 0 : i32
    %c0_i32_1 = arith.constant 0 : i32
    return %c0_i32, %c0_i32_0 : i32, i32
  }
  func.func @transform_10(%arg0: i32) -> (i32, i32) {
    %c0_i32 = arith.constant 0 : i32
    %c0_i32_0 = arith.constant 0 : i32
    %c0_i32_1 = arith.constant 0 : i32
    return %c0_i32, %c0_i32_0 : i32, i32
  }
  func.func @transform_11(%arg0: i32) -> i32 {
    %c0_i32 = arith.constant 0 : i32
    %c0_i32_0 = arith.constant 0 : i32
    return %c0_i32 : i32
  }
  func.func @transform_12(%arg0: i32) -> (i32, i32, i32) {
    %c0_i32 = arith.constant 0 : i32
    %c0_i32_0 = arith.constant 0 : i32
    %c0_i32_1 = arith.constant 0 : i32
    return %arg0, %c0_i32, %c0_i32_0 : i32, i32, i32
  }
}

</mosaic_0001>

<bundles_post_ra>
// kernel: mul.51
= control target key start
LH: loop header
LB: loop body
LE: loop exit
PB: predicated region body
PF: predicated region fallthrough
CT: control target
= control target key end

     0   :  { %s34_s0 = inlined_call_operand.vmem [shape: f32[4], index: 0, kind: input, shape index: {}]   ;;  %s35_s1 = inlined_call_operand.vmem [shape: f32[4], index: 1, kind: input, shape index: {}]   ;;  %s36_s2 = inlined_call_operand.vmem [shape: f32[4], index: 2, kind: output, shape index: {}]  }
   0x1   :  { %v3_v0 = vld [vmem:[%s34_s0] sm:$0x1] }
   0x2   :  { %v4_v1 = vld [vmem:[%s35_s1] sm:$0x1] }
   0x3   :  { %v7_v2 = vmul.f32 %v4_v1, %v3_v0 }
   0x5   :  { %9 = vst [vmem:[%s36_s2] sm:$0x1] %v7_v2 }

// kernel: downsampling_lap_forward.1
= control target key start
LH: loop header
LB: loop body
LE: loop exit
PB: predicated region body
PF: predicated region fallthrough
CT: control target
= control target key end

     0   :  { %s4826_s0 = inlined_call_operand.vmem [shape: f32[4,4,8,8,8], index: 0, kind: input, shape index: {}]   ;;  %s4827_s1 = inlined_call_operand.vmem [shape: f32[8,4], index: 1, kind: input, shape index: {}]   ;;  %s4828_s2 = inlined_call_operand.vmem [shape: f32[1,4], index: 2, kind: input, shape index: {}]   ;;  %s4829_s3 = inlined_call_operand.vmem [shape: f32[36,4], index: 3, kind: input, shape index: {}]   ;;  %s4830_s4 = inlined_call_operand.vmem [shape: f32[36,4], index: 4, kind: input, shape index: {}]   ;;  %s4831_s5 = inlined_call_operand.vmem [shape: f32[1,4], index: 5, kind: input, shape index: {}]   ;;  %s4832_s6 = inlined_call_operand.vmem [shape: f32[1,4], index: 6, kind: input, shape index: {}]   ;;  %s4833_s7 = inlined_call_operand.vmem [shape: f32[5,1,4], index: 7, kind: input, shape index: {}]   ;;  %s4834_s8 = inlined_call_operand.vmem [shape: f32[1,4], index: 8, kind: input, shape index: {}]   ;;  %s4835_s9 = inlined_call_operand.vmem [shape: f32[16,16], index: 9, kind: input, shape index: {}]   ;;  %s4836_s10 = inlined_call_operand.vmem [shape: f32[1,16], index: 10, kind: input, shape index: {}]   ;;  %s4837_s11 = inlined_call_operand.<no memory space> [shape: f32[1], index: 11, kind: input, shape index: {}]   ;;  %s4838_s12 = inlined_call_operand.hbm [shape: f32[4,64,16], index: 12, kind: output, shape index: {}]  }
   0x1   :  { %4859 = sst [smem:[#allocation16_spill]] %s4826_s0 }
   0x2   :  { %4860 = sst [smem:[#allocation17_spill]] %s4827_s1 }
   0x3   :  { %17 = sst [smem:[#allocation3]] %s4837_s11 }
   0x4   :  { %18 = vsyncpa [#allocation5], 0 }
   0x5   :  { %20 = vsyncpa [#allocation5 + $0x1], 0  ;;  %s3424_s23 = smov 0   ;;  %s3426_s24 = smov 0  }
   0x6   :  { %s3428_s25 = smov 0   ;;  %s3430_s26 = smov 0  }
   0x7 LB: > { %s3445_s11 = sadd.s32 4294967295, %s3343_s26   ;;  %s2885_s27 = sadd.s32 4294967294, %s3343_s26   ;;  %s3343_s26 = sphi %s3430_s26, %s4894_s26   ;;  %s3339_s25 = sphi %s3428_s25, %s4893_s25   ;;  %s3335_s24 = sphi %s3426_s24, %s4892_s24   ;;  %s3331_s23 = sphi %s3424_s23, %s4891_s23  }
   0x8   : > { %s3449_s28 = sadd.s32 1, %s3343_s26   ;;  %s290_s29 = sadd.s32 1, %s3339_s25 }
   0x9   : > { %s287_s30 = ssub.s32 %s3343_s26, %s3449_s28  ;;  %p300_p0 = scmp.ne.s32.totalorder %s3339_s25, %s3335_s24 }
   0xa   : > { %p288_p1 = scmp.eq.s32.totalorder %s287_s30, 0  ;;  %p301_p2 = scmp.eq.s32.totalorder %s3445_s11, 1 }
   0xb   : > { %p306_p3 = scmp.ne.s32.totalorder %s3335_s24, %s3331_s23  ;;  %p307_p4 = scmp.eq.s32.totalorder %s2885_s27, 1 }
   0xc   : > { %s3460_s13 = scalar_select %p288_p1, %s3339_s25, %s290_s29  }
   0xd   : > { %p3462_p5 = por %p301_p2, %p300_p0  ;;  %p3466_p6 = por %p307_p4, %p306_p3 }
   0xe   : > { %p2888_p7 = scmp.ge.s32.totalorder %s3343_s26, 1  ;;  %p368_p8 = scmp.lt.s32.totalorder %s3343_s26, 3 }
  0x10   : > { %p369_p9 = pnand %p2888_p7, %p368_p8 }
  0x12   : > { %372 = sbr.rel (%p369_p9) target bundleno = 1154 (0x482), region = 68 }
  0x17   : > { %s4863_s1 = sld [smem:[#allocation17_spill]]  ;;  %s2890_s18 = sshll.u32 %s3445_s11, 1  ;;  %vm736_vm0 = vcmask 31744   ;;  %v3345_v1 = vmov 0.0   ;;  %vm542_vm1 = vcmask 64512   ;;  %vm972_vm2 = vcmask 1046528  }
  0x18   : > { %p3478_p10 = scmp.lt.s32.totalorder %s2890_s18, 3  ;;  %738 = vst.msk [vmem:[#allocation2 + $0x8] sm:$0xff] %vm736_vm0, %v3345_v1  ;;  %739 = vst.msk [vmem:[#allocation2 + $0x10] sm:$0xff] %vm736_vm0, %v3345_v1  ;;  %s4865_s0 = sld [smem:[#allocation16_spill]]  ;;  %vm891_vm3 = vcmask 1040384   ;;  %vm1636_vm4 = vcmask 1043456  }
  0x19   : > { %737 = vst.msk [vmem:[#allocation2] sm:$0xff] %vm736_vm0, %v3345_v1  ;;  %740 = vst.msk [vmem:[#allocation2 + $0xf0] sm:$0xff] %vm736_vm0, %v3345_v1  ;;  %s4843_s29 = smov 4   ;;  %s4849_s30 = smov 8   ;;  %vm1473_vm5 = vcmask 97280   ;;  %vm1490_vm6 = vcmask 130048  }
  0x1a   : > { %741 = vst.msk [vmem:[#allocation2 + $0xf8] sm:$0xff] %vm736_vm0, %v3345_v1  ;;  %742 = vst.msk [vmem:[#allocation2 + $0x100] sm:$0xff] %vm736_vm0, %v3345_v1  ;;  %s4896_s18 = smov (!%p3478_p10, %s2890_s18), 3  ;;  %s3348_s16 = smov 32   ;;  %vm1507_vm7 = vcmask 162816   ;;  %vm1524_vm8 = vcmask 195584  }
  0x1b   : > { %744 = vst.msk [vmem:[#allocation2 + $0xd8] sm:$0xff] %vm736_vm0, %v3345_v1  ;;  %745 = vst.msk [vmem:[#allocation2 + $0xe0] sm:$0xff] %vm736_vm0, %v3345_v1  ;;  %s3027_s20 = sshll.u32 %s4896_s18, 8  ;;  %s4841_s17 = smov 28   ;;  %vm1541_vm9 = vcmask 228352   ;;  %vm1558_vm10 = vcmask 261120  }
  0x1c   : > { %746 = vst.msk [vmem:[#allocation2 + $0xe8] sm:$0xff] %vm736_vm0, %v3345_v1  ;;  %747 = vst.msk [vmem:[#allocation2 + $0x1c8] sm:$0xff] %vm736_vm0, %v3345_v1  ;;  %s4851_s18 = smov 24   ;;  %s4845_s21 = smov 16   ;;  %vm1587_vm11 = vcmask 293888  }
  0x1d   : > { %v534_v0 = vld [vmem:[%s4863_s1] sm:$0xff]  ;;  %748 = vst.msk [vmem:[#allocation2 + $0x1d0] sm:$0xff] %vm736_vm0, %v3345_v1  ;;  %749 = vst.msk [vmem:[#allocation2 + $0x1d8] sm:$0xff] %vm736_vm0, %v3345_v1  ;;  %s4839_s22 = smov 12   ;;  %s4873_s19 = smov 28  }
  0x1e   : > { %3107 = vmatprep.subr.mxu0 %v534_v0  ;;  %751 = vst.msk [vmem:[#allocation2 + $0x18] sm:$0xff] %vm736_vm0, %v3345_v1  ;;  %752 = vst.msk [vmem:[#allocation2 + $0x30] sm:$0xff] %vm736_vm0, %v3345_v1  ;;  %s3533_s27 = scalar_lea.vmem %s4865_s0, %s3027_s20  ;;  %s4875_s20 = smov 8  }
  0x1f   : > { %753 = vst.msk [vmem:[#allocation2 + $0x48] sm:$0xff] %vm736_vm0, %v3345_v1  ;;  %754 = vst.msk [vmem:[#allocation2 + $0x60] sm:$0xff] %vm736_vm0, %v3345_v1  ;;  %3108 = vmatpush3.msra.mxu0 %v534_v0  ;;  %v419_v2 = vld [vmem:[%s3533_s27] sm:$0xff]  ;;  %v420_v7 = vld [vmem:[%s3533_s27 + $0x8] sm:$0xff] }
  0x20   : > { %755 = vst.msk [vmem:[#allocation2 + $0x78] sm:$0xff] %vm736_vm0, %v3345_v1  ;;  %756 = vst.msk [vmem:[#allocation2 + $0x90] sm:$0xff] %vm736_vm0, %v3345_v1  ;;  %v2893_v3 = vld [vmem:[%s3533_s27 + $0x40] sm:$0xff]  ;;  %v2894_v8 = vld [vmem:[%s3533_s27 + $0x48] sm:$0xff] }
  0x21   : > { %757 = vst.msk [vmem:[#allocation2 + $0xa8] sm:$0xff] %vm736_vm0, %v3345_v1  ;;  %758 = vst.msk [vmem:[#allocation2 + $0xc0] sm:$0xff] %vm736_vm0, %v3345_v1  ;;  %v2909_v4 = vld [vmem:[%s3533_s27 + $0x80] sm:$0xff]  ;;  %v452_v5 = vmax.f32 %v419_v2, %v2893_v3  ;;  %v453_v10 = vmax.f32 %v420_v7, %v2894_v8  ;;  %v2910_v11 = vld [vmem:[%s3533_s27 + $0x88] sm:$0xff] }
  0x22   : > { %759 = vst.msk [vmem:[#allocation2 + $0x108] sm:$0xff] %vm736_vm0, %v3345_v1  ;;  %760 = vst.msk [vmem:[#allocation2 + $0x120] sm:$0xff] %vm736_vm0, %v3345_v1  ;;  %v2925_v6 = vld [vmem:[%s3533_s27 + $0xc0] sm:$0xff]  ;;  %v2926_v12 = vld [vmem:[%s3533_s27 + $0xc8] sm:$0xff] }
  0x23   : > { %761 = vst.msk [vmem:[#allocation2 + $0x138] sm:$0xff] %vm736_vm0, %v3345_v1  ;;  %762 = vst.msk [vmem:[#allocation2 + $0x150] sm:$0xff] %vm736_vm0, %v3345_v1  ;;  %v502_v9 = vmax.f32 %v2909_v4, %v2925_v6  ;;  %v421_v13 = vld [vmem:[%s3533_s27 + $0x10] sm:$0xff]  ;;  %v503_v14 = vmax.f32 %v2910_v11, %v2926_v12  ;;  %v422_v21 = vld [vmem:[%s3533_s27 + $0x18] sm:$0xff] }
  0x24   : > { %763 = vst.msk [vmem:[#allocation2 + $0x168] sm:$0xff] %vm736_vm0, %v3345_v1  ;;  %764 = vst.msk [vmem:[#allocation2 + $0x180] sm:$0xff] %vm736_vm0, %v3345_v1  ;;  %v2895_v15 = vld [vmem:[%s3533_s27 + $0x50] sm:$0xff]  ;;  %v2896_v22 = vld [vmem:[%s3533_s27 + $0x58] sm:$0xff] }
  0x25   : > { %765 = vst.msk [vmem:[#allocation2 + $0x198] sm:$0xff] %vm736_vm0, %v3345_v1  ;;  %766 = vst.msk [vmem:[#allocation2 + $0x1b0] sm:$0xff] %vm736_vm0, %v3345_v1  ;;  %v2911_v16 = vld [vmem:[%s3533_s27 + $0x90] sm:$0xff]  ;;  %v3547_v18 = vmax.f32 %v452_v5, %v502_v9  ;;  %v454_v19 = vmax.f32 %v421_v13, %v2895_v15  ;;  %v2912_v23 = vld [vmem:[%s3533_s27 + $0x98] sm:$0xff]  ;;  %v3552_v24 = vmax.f32 %v453_v10, %v503_v14 }
  0x26   : > { %767 = vst.msk [vmem:[#allocation2 + $0x28] sm:$0xff] %vm736_vm0, %v3345_v1  ;;  %768 = vst.msk [vmem:[#allocation2 + $0x40] sm:$0xff] %vm736_vm0, %v3345_v1  ;;  %v2927_v17 = vld [vmem:[%s3533_s27 + $0xd0] sm:$0xff]  ;;  %v455_v25 = vmax.f32 %v422_v21, %v2896_v22  ;;  %v2928_v26 = vld [vmem:[%s3533_s27 + $0xd8] sm:$0xff] }
  0x27   : > { %769 = vst.msk [vmem:[#allocation2 + $0x58] sm:$0xff] %vm736_vm0, %v3345_v1  ;;  %770 = vst.msk [vmem:[#allocation2 + $0x70] sm:$0xff] %vm736_vm0, %v3345_v1  ;;  %v504_v20 = vmax.f32 %v2911_v16, %v2927_v17  ;;  %v423_v27 = vld [vmem:[%s3533_s27 + $0x20] sm:$0xff]  ;;  %3109 = vmatprep.mubr.msk.f32.mxu0 %vm542_vm1, %v3547_v18  ;;  %v505_v30 = vmax.f32 %v2912_v23, %v2928_v26  ;;  %v424_v34 = vld [vmem:[%s3533_s27 + $0x28] sm:$0xff] }
  0x28   : > { %771 = vst.msk [vmem:[#allocation2 + $0x88] sm:$0xff] %vm736_vm0, %v3345_v1  ;;  %772 = vst.msk [vmem:[#allocation2 + $0xa0] sm:$0xff] %vm736_vm0, %v3345_v1  ;;  %v2897_v28 = vld [vmem:[%s3533_s27 + $0x60] sm:$0xff]  ;;  %3110 = vmatmul.mubr.msk.f32.vlgmr.msra.gmra.mxu0 %vm542_vm1, %v3552_v24  ;;  %v2898_v36 = vld [vmem:[%s3533_s27 + $0x68] sm:$0xff] }
  0x29   : > { %773 = vst.msk [vmem:[#allocation2 + $0xb8] sm:$0xff] %vm736_vm0, %v3345_v1  ;;  %774 = vst.msk [vmem:[#allocation2 + $0xd0] sm:$0xff] %vm736_vm0, %v3345_v1  ;;  %v3559_v29 = vmax.f32 %v454_v19, %v504_v20  ;;  %v456_v31 = vmax.f32 %v423_v27, %v2897_v28  ;;  %v2913_v32 = vld [vmem:[%s3533_s27 + $0xa0] sm:$0xff]  ;;  %v2914_v37 = vld [vmem:[%s3533_s27 + $0xa8] sm:$0xff]  ;;  %v3571_v39 = vmax.f32 %v455_v25, %v505_v30 }
  0x2a   : > { %775 = vst.msk [vmem:[#allocation2 + $0x118] sm:$0xff] %vm736_vm0, %v3345_v1  ;;  %776 = vst.msk [vmem:[#allocation2 + $0x130] sm:$0xff] %vm736_vm0, %v3345_v1  ;;  %v2929_v33 = vld [vmem:[%s3533_s27 + $0xe0] sm:$0xff]  ;;  %v2930_v38 = vld [vmem:[%s3533_s27 + $0xe8] sm:$0xff]  ;;  %v457_v40 = vmax.f32 %v424_v34, %v2898_v36 }
  0x2b   : > { %777 = vst.msk [vmem:[#allocation2 + $0x148] sm:$0xff] %vm736_vm0, %v3345_v1  ;;  %778 = vst.msk [vmem:[#allocation2 + $0x160] sm:$0xff] %vm736_vm0, %v3345_v1  ;;  %v506_v35 = vmax.f32 %v2913_v32, %v2929_v33  ;;  %3112 = vmatprep.mubr.msk.f32.mxu0 %vm542_vm1, %v3559_v29  ;;  %v507_v41 = vmax.f32 %v2914_v37, %v2930_v38  ;;  %v425_v42 = vld [vmem:[%s3533_s27 + $0x30] sm:$0xff]  ;;  %v426_v48 = vld [vmem:[%s3533_s27 + $0x38] sm:$0xff] }
  0x2c   : > { %779 = vst.msk [vmem:[#allocation2 + $0x178] sm:$0xff] %vm736_vm0, %v3345_v1  ;;  %780 = vst.msk [vmem:[#allocation2 + $0x190] sm:$0xff] %vm736_vm0, %v3345_v1  ;;  %v2899_v43 = vld [vmem:[%s3533_s27 + $0x70] sm:$0xff]  ;;  %v2900_v49 = vld [vmem:[%s3533_s27 + $0x78] sm:$0xff]  ;;  %3113 = vmatmul.mubr.msk.f32.gmra.mxu0 %vm542_vm1, %v3571_v39 }
  0x2d   : > { %781 = vst.msk [vmem:[#allocation2 + $0x1a8] sm:$0xff] %vm736_vm0, %v3345_v1  ;;  %782 = vst.msk [vmem:[#allocation2 + $0x1c0] sm:$0xff] %vm736_vm0, %v3345_v1  ;;  %v2915_v44 = vld [vmem:[%s3533_s27 + $0xb0] sm:$0xff]  ;;  %v3576_v45 = vmax.f32 %v456_v31, %v506_v35  ;;  %v458_v46 = vmax.f32 %v425_v42, %v2899_v43  ;;  %v2916_v51 = vld [vmem:[%s3533_s27 + $0xb8] sm:$0xff]  ;;  %v3586_v54 = vmax.f32 %v457_v40, %v507_v41 }
  0x2e   : > { %4866 = vst [vmem:[#allocation7_spill] sm:$0xff] %v3547_v18  ;;  %4867 = vst [vmem:[#allocation8_spill] sm:$0xff] %v3552_v24  ;;  %v2931_v47 = vld [vmem:[%s3533_s27 + $0xf0] sm:$0xff]  ;;  %v2932_v52 = vld [vmem:[%s3533_s27 + $0xf8] sm:$0xff]  ;;  %v459_v55 = vmax.f32 %v426_v48, %v2900_v49 }
  0x2f   : > { %v508_v50 = vmax.f32 %v2915_v44, %v2931_v47  ;;  %v427_v53 = vld [vmem:[%s3533_s27 + $0x100] sm:$0xff]  ;;  %v509_v56 = vmax.f32 %v2916_v51, %v2932_v52  ;;  %3115 = vmatprep.mubr.msk.f32.mxu0 %vm542_vm1, %v3576_v45  ;;  %v428_v63 = vld [vmem:[%s3533_s27 + $0x108] sm:$0xff]  ;;  %v429_v3 = vld [vmem:[%s3533_s27 + $0x110] sm:$0xff] }
  0x30   : > { %v2901_v57 = vld [vmem:[%s3533_s27 + $0x140] sm:$0xff]  ;;  %v2902_v0 = vld [vmem:[%s3533_s27 + $0x148] sm:$0xff]  ;;  %v2903_v4 = vld [vmem:[%s3533_s27 + $0x150] sm:$0xff]  ;;  %3116 = vmatmul.mubr.msk.f32.gmra.mxu0 %vm542_vm1, %v3586_v54 }
  0x31   : > { %v2917_v58 = vld [vmem:[%s3533_s27 + $0x180] sm:$0xff]  ;;  %v3593_v60 = vmax.f32 %v458_v46, %v508_v50  ;;  %v460_v61 = vmax.f32 %v427_v53, %v2901_v57  ;;  %v2918_v1 = vld [vmem:[%s3533_s27 + $0x188] sm:$0xff]  ;;  %v2919_v5 = vld [vmem:[%s3533_s27 + $0x190] sm:$0xff]  ;;  %v3606_v8 = vmax.f32 %v459_v55, %v509_v56  ;;  %v461_v9 = vmax.f32 %v428_v63, %v2902_v0 }
  0x32   : > { %v2933_v59 = vld [vmem:[%s3533_s27 + $0x1c0] sm:$0xff]  ;;  %v2934_v2 = vld [vmem:[%s3533_s27 + $0x1c8] sm:$0xff]  ;;  %v2935_v6 = vld [vmem:[%s3533_s27 + $0x1d0] sm:$0xff]  ;;  %v462_v15 = vmax.f32 %v429_v3, %v2903_v4 }
  0x33   : > { %v510_v62 = vmax.f32 %v2917_v58, %v2933_v59  ;;  %v430_v7 = vld [vmem:[%s3533_s27 + $0x118] sm:$0xff]  ;;  %v511_v10 = vmax.f32 %v2918_v1, %v2934_v2  ;;  %3118 = vmatprep.mubr.msk.f32.mxu0 %vm542_vm1, %v3593_v60  ;;  %v512_v16 = vmax.f32 %v2919_v5, %v2935_v6  ;;  %v431_v17 = vld [vmem:[%s3533_s27 + $0x120] sm:$0xff]  ;;  %v3619_v25 = vld [vmem:[#allocation2 + $0x8] sm:$0xff] }
  0x34   : > { %v2904_v11 = vld [vmem:[%s3533_s27 + $0x158] sm:$0xff]  ;;  %v2905_v19 = vld [vmem:[%s3533_s27 + $0x160] sm:$0xff]  ;;  %3119 = vmatmul.mubr.msk.f32.gmra.mxu0 %vm542_vm1, %v3606_v8  ;;  %v432_v30 = vld [vmem:[%s3533_s27 + $0x128] sm:$0xff]  ;;  %v973_v33 = vrot.slane %v3619_v25, 1  ;;  %1057 = vrot.lane.b32.xlu0 %v3619_v25, %s4843_s29 }
  0x35   : > { %v2920_v12 = vld [vmem:[%s3533_s27 + $0x198] sm:$0xff]  ;;  %v3613_v14 = vmax.f32 %v460_v61, %v510_v62  ;;  %v2921_v20 = vld [vmem:[%s3533_s27 + $0x1a0] sm:$0xff]  ;;  %v463_v22 = vmax.f32 %v430_v7, %v2904_v11  ;;  %v3623_v26 = vmax.f32 %v461_v9, %v511_v10  ;;  %v464_v27 = vmax.f32 %v431_v17, %v2905_v19  ;;  %v2906_v31 = vld [vmem:[%s3533_s27 + $0x168] sm:$0xff] }
  0x36   : > { %v2936_v13 = vld [vmem:[%s3533_s27 + $0x1d8] sm:$0xff]  ;;  %v2937_v21 = vld [vmem:[%s3533_s27 + $0x1e0] sm:$0xff]  ;;  %v801_v32 = vld [vmem:[#allocation2 + $0x10] sm:$0xff]  ;;  %v3632_v34 = vmax.f32 %v462_v15, %v512_v16  ;;  %v465_v44 = vmax.f32 %v432_v30, %v2906_v31 }
  0x37   : > { %v513_v23 = vmax.f32 %v2920_v12, %v2936_v13  ;;  %v514_v28 = vmax.f32 %v2921_v20, %v2937_v21  ;;  %3121 = vmatprep.mubr.msk.f32.mxu0 %vm542_vm1, %v3613_v14  ;;  %v2922_v35 = vld [vmem:[%s3533_s27 + $0x1a8] sm:$0xff]  ;;  %v974_v37 = vrot.slane %v801_v32, 1  ;;  %v433_v38 = vld [vmem:[%s3533_s27 + $0x130] sm:$0xff]  ;;  %v830_v47 = vld [vmem:[#allocation2 + $0xf8] sm:$0xff] }
  0x38   : > { %v2938_v36 = vld [vmem:[%s3533_s27 + $0x1e8] sm:$0xff]  ;;  %v2907_v40 = vld [vmem:[%s3533_s27 + $0x170] sm:$0xff]  ;;  %v831_v48 = vld [vmem:[#allocation2 + $0x100] sm:$0xff]  ;;  %3122 = vmatmul.mubr.msk.f32.gmra.mxu0 %vm542_vm1, %v3623_v26  ;;  %v997_v53 = vrot.slane %v830_v47, 1  ;;  %1073 = vrot.lane.b32.xlu0 %v830_v47, %s4843_s29 }
  0x39   : > { %v2923_v41 = vld [vmem:[%s3533_s27 + $0x1b0] sm:$0xff]  ;;  %v3640_v43 = vmax.f32 %v463_v22, %v513_v23  ;;  %v975_v46 = vsel %vm972_vm2, %v973_v33, %v974_v37  ;;  %v827_v49 = vld [vmem:[#allocation2 + $0xe0] sm:$0xff]  ;;  %v3645_v50 = vmax.f32 %v464_v27, %v514_v28  ;;  %v515_v51 = vmax.f32 %v2922_v35, %v2938_v36  ;;  %v434_v52 = vld [vmem:[%s3533_s27 + $0x138] sm:$0xff]  ;;  %3124 = vmatprep.mubr.msk.f32.mxu0 %vm542_vm1, %v3632_v34 }
  0x3a   : > { %v2939_v42 = vld [vmem:[%s3533_s27 + $0x1f0] sm:$0xff]  ;;  %1105 = vrot.lane.b32.xlu1 %v975_v46, %s4849_s30  ;;  %v998_v55 = vrot.slane %v831_v48, 1  ;;  %v828_v56 = vld [vmem:[#allocation2 + $0xe8] sm:$0xff]  ;;  %v466_v57 = vmax.f32 %v433_v38, %v2907_v40  ;;  %v2908_v59 = vld [vmem:[%s3533_s27 + $0x178] sm:$0xff]  ;;  %v1051_v63 = vrot.slane %v827_v49, 1  ;;  %v1044_v17 = vrot.slane %v827_v49, 7 }
  0x3b   : > { %v516_v58 = vmax.f32 %v2923_v41, %v2939_v42  ;;  %v2924_v61 = vld [vmem:[%s3533_s27 + $0x1b8] sm:$0xff]  ;;  %v1052_v0 = vrot.slane %v828_v56, 1  ;;  %v3658_v2 = vmax.f32 %v465_v44, %v515_v51  ;;  %v467_v3 = vmax.f32 %v434_v52, %v2908_v59  ;;  %v856_v9 = vld [vmem:[#allocation2 + $0x1c8] sm:$0xff]  ;;  %v3675_v10 = vld [vmem:[#allocation2 + $0x1d0] sm:$0xff] }
  0x3c   : > { %v2940_v62 = vld [vmem:[%s3533_s27 + $0x1f8] sm:$0xff]  ;;  %v999_v1 = vsel %vm972_vm2, %v997_v53, %v998_v55  ;;  %3125 = vmatmul.mubr.msk.f32.gmra.mxu0 %vm542_vm1, %v3640_v43  ;;  %v1046_v11 = vrot.slane %v856_v9, 7  ;;  %v1047_v12 = vrot.slane %v3675_v10, 7  ;;  %1359 = vrot.lane.b32.xlu0 %v827_v49, %s4841_s17  ;;  %v3688_v20 = vld [vmem:[%s4828_s2] ss:$0 sm:$0xff]  ;;  %v805_v38 = vld [vmem:[#allocation2 + $0x30] sm:$0xff] }
  0x3d   : > { %v517_v4 = vmax.f32 %v2924_v61, %v2940_v62  ;;  %3127 = vmatprep.mubr.msk.f32.mxu0 %vm542_vm1, %v3645_v50  ;;  %v3663_v5 = vmax.f32 %v466_v57, %v516_v58  ;;  %v1053_v6 = vsel %vm972_vm2, %v1051_v63, %v1052_v0  ;;  %v826_v15 = vld [vmem:[#allocation2 + $0xd8] sm:$0xff]  ;;  %v898_v44 = vrot.slane %v805_v38, 7  ;;  %v807_v49 = vld [vmem:[#allocation2 + $0x40] sm:$0xff]  ;;  %s4847_s27 = smov 20   ;;  %v840_v24 = vld [vmem:[#allocation2 + $0x148] sm:$0xff] }
  0x3e   : > { %1121 = vrot.lane.b32.xlu1 %v999_v1, %s4849_s30  ;;  %v1048_v13 = vsel %vm891_vm3, %v1046_v11, %v1047_v12  ;;  %v1043_v16 = vrot.slane %v826_v15, 7  ;;  %v980_v56 = vrot.slane %v807_v49, 1  ;;  %v802_v1 = vld [vmem:[#allocation2 + $0x18] sm:$0xff]  ;;  %v1789_v49 = vld [vmem:[%s4830_s4 + $0x20] sm:$0xf] }
  0x3f   : > { %4868 = vst [vmem:[#allocation9_spill] sm:$0xff] %v3663_v5  ;;  %v3668_v7 = vmax.f32 %v467_v3, %v517_v4  ;;  %v895_v9 = vrot.slane %v802_v1, 7  ;;  %3167 = vmatprep.subr.msk.mxu0 %vm1636_vm4, %v1789_v49  ;;  %v1785_v1 = vld [vmem:[%s4830_s4] sm:$0xff] }
  0x40   : > { %3128 = vmatmul.mubr.msk.f32.gmra.mxu0 %vm542_vm1, %v3658_v2  ;;  %v1045_v19 = vsel %vm891_vm3, %v1043_v16, %v1044_v17 }
  0x41   : > { %4869 = vst [vmem:[#allocation10_spill] sm:$0xff] %v3668_v7  ;;  %3130 = vmatprep.mubr.msk.f32.mxu0 %vm542_vm1, %v3663_v5  ;;  %1311 = vrot.lane.b32.xlu0 %v1045_v19, %s4851_s18  ;;  %v804_v19 = vld [vmem:[#allocation2 + $0x28] sm:$0xff] }
  0x42   : > { %1407 = vrot.lane.b32.xlu1 %v1053_v6, %s3348_s16  ;;  %3168 = vmatpush3.msk.msra.mxu0 %vm1636_vm4, %v1789_v49 }
  0x44   : > { %3131 = vmatmul.mubr.msk.f32.gmra.mxu0 %vm542_vm1, %v3668_v7 }
  0x46   : > { %1327 = vrot.lane.b32.xlu1 %v1048_v13, %s4851_s18 }
  0x4a   : > { %1375 = vrot.lane.b32.xlu1 %v3675_v10, %s4841_s17 }
  0xe8   : > { %v3111_v21 = vpop.f32.mrf.mxu0 }
  0xe9   : > { %v663_v22 = vadd.f32 %v3111_v21, %v3688_v20  ;;  %v811_v21 = vld [vmem:[#allocation2 + $0x60] sm:$0xff] }
  0xea   : > { %v657_v23 = vpop.f32.mrf.mxu0 }
  0xeb   : > { %784 = vst.msk [vmem:[#allocation2 + $0x38] sm:$0xff] %vm736_vm0, %v663_v22  ;;  %v658_v27 = vadd.f32 %v3688_v20, %v657_v23  ;;  %v977_v23 = vrot.slane %v804_v19, 1 }
  0xec   : > { %v3114_v28 = vpop.f32.mrf.mxu0 }
  0xed   : > { %783 = vst.msk [vmem:[#allocation2 + $0x20] sm:$0xff] %vm736_vm0, %v658_v27  ;;  %v673_v30 = vadd.f32 %v3114_v28, %v3688_v20  ;;  %v904_v27 = vrot.slane %v811_v21, 7 }
  0xee   : > { %v667_v31 = vpop.f32.mrf.mxu0 }
  0xef   : > { %786 = vst.msk [vmem:[#allocation2 + $0x68] sm:$0xff] %vm736_vm0, %v673_v30  ;;  %v668_v32 = vadd.f32 %v3688_v20, %v667_v31  ;;  %v813_v30 = vld [vmem:[#allocation2 + $0x70] sm:$0xff] }
  0xf0   : > { %v3117_v33 = vpop.f32.mrf.mxu0 }
  0xf1   : > { %785 = vst.msk [vmem:[#allocation2 + $0x50] sm:$0xff] %vm736_vm0, %v668_v32  ;;  %v683_v35 = vadd.f32 %v3117_v33, %v3688_v20 }
  0xf2   : > { %v806_v36 = vld [vmem:[#allocation2 + $0x38] sm:$0xff]  ;;  %v677_v37 = vpop.f32.mrf.mxu0 }
  0xf3   : > { %1203 = vrot.lane.b32.xlu0 %v806_v36, %s4845_s21  ;;  %1061 = vrot.lane.b32.xlu1 %v806_v36, %s4843_s29  ;;  %788 = vst.msk [vmem:[#allocation2 + $0x98] sm:$0xff] %vm736_vm0, %v683_v35  ;;  %v678_v40 = vadd.f32 %v3688_v20, %v677_v37  ;;  %v899_v46 = vrot.slane %v806_v36, 7  ;;  %v979_v55 = vrot.slane %v806_v36, 1  ;;  %v986_v35 = vrot.slane %v813_v30, 1  ;;  %v810_v37 = vld [vmem:[#allocation2 + $0x58] sm:$0xff] }
  0xf4   : > { %v3120_v41 = vpop.f32.mrf.mxu0  ;;  %v803_v42 = vld [vmem:[#allocation2 + $0x20] sm:$0xff] }
  0xf5   : > { %787 = vst.msk [vmem:[#allocation2 + $0x80] sm:$0xff] %vm736_vm0, %v678_v40  ;;  %v693_v47 = vadd.f32 %v3120_v41, %v3688_v20  ;;  %v3710_v53 = vsel %vm891_vm3, %v898_v44, %v899_v46  ;;  %v981_v62 = vsel %vm972_vm2, %v979_v55, %v980_v56  ;;  %v896_v11 = vrot.slane %v803_v42, 7  ;;  %v1788_v55 = vld [vmem:[%s4830_s4 + $0x18] sm:$0xff] }
  0xf6   : > { %v687_v48 = vpop.f32.mrf.mxu0  ;;  %v812_v4 = vld [vmem:[#allocation2 + $0x68] sm:$0xff]  ;;  %v976_v22 = vrot.slane %v803_v42, 1  ;;  %v983_v41 = vrot.slane %v810_v37, 1  ;;  %3169 = vmatprep.subr.mxu0 %v1788_v55  ;;  %v3842_v37 = vpop.permute.xlu1 %1105 }
  0xf7   : > { %1345 = vrot.lane.b32.xlu1 %v806_v36, %s4841_s17  ;;  %1059 = vrot.lane.b32.xlu0 %v803_v42, %s4843_s29  ;;  %790 = vst.msk [vmem:[#allocation2 + $0xc8] sm:$0xff] %vm736_vm0, %v693_v47  ;;  %v688_v51 = vadd.f32 %v3688_v20, %v687_v48  ;;  %v3734_v16 = vsel %vm891_vm3, %v895_v9, %v896_v11  ;;  %v905_v28 = vrot.slane %v812_v4, 7  ;;  %v985_v33 = vrot.slane %v812_v4, 1  ;;  %v1579_v48 = vld [vmem:[%s4829_s3 + $0x20] sm:$0xf] }
  0xf8   : > { %v3123_v52 = vpop.f32.mrf.mxu0  ;;  %v809_v17 = vld [vmem:[#allocation2 + $0x50] sm:$0xff]  ;;  %v978_v31 = vsel %vm972_vm2, %v976_v22, %v977_v23  ;;  %3133 = vmatprep.subr.msk.mxu1 %vm1636_vm4, %v1579_v48  ;;  %3170 = vmatpush3.msra.mxu0 %v1788_v55  ;;  %v819_v11 = vld [vmem:[#allocation2 + $0xa0] sm:$0xff]  ;;  %v814_v23 = vld [vmem:[#allocation2 + $0x78] sm:$0xff] }
  0xf9   : > { %789 = vst.msk [vmem:[#allocation2 + $0xb0] sm:$0xff] %vm736_vm0, %v688_v51  ;;  %v703_v57 = vadd.f32 %v3123_v52, %v3688_v20  ;;  %v3746_v32 = vsel %vm891_vm3, %v904_v27, %v905_v28  ;;  %v987_v36 = vsel %vm972_vm2, %v985_v33, %v986_v35  ;;  %v982_v40 = vrot.slane %v809_v17, 1  ;;  %3134 = vmatpush3.msk.msra.mxu1 %vm1636_vm4, %v1579_v48  ;;  %v1578_v52 = vld [vmem:[%s4829_s3 + $0x18] sm:$0xff] }
  0xfa   : > { %v697_v58 = vpop.f32.mrf.mxu0  ;;  %v3754_v38 = vld [vmem:[#allocation2 + $0x98] sm:$0xff]  ;;  %v902_v47 = vrot.slane %v809_v17, 7  ;;  %3135 = vmatprep.subr.mxu1 %v1578_v52  ;;  %v907_v28 = vrot.slane %v814_v23, 7 }
  0xfb   : > { %1155 = vrot.lane.b32.xlu1 %v3710_v53, %s4839_s22  ;;  %1201 = vrot.lane.b32.xlu0 %v803_v42, %s4845_s21  ;;  %792 = vst.msk [vmem:[#allocation2 + $0x128] sm:$0xff] %vm736_vm0, %v703_v57  ;;  %v698_v59 = vadd.f32 %v3688_v20, %v697_v58  ;;  %v808_v42 = vld [vmem:[#allocation2 + $0x48] sm:$0xff]  ;;  %v3760_v44 = vsel %vm972_vm2, %v982_v40, %v983_v41  ;;  %v911_v9 = vrot.slane %v3754_v38, 7  ;;  %v825_v41 = vld [vmem:[#allocation2 + $0xd0] sm:$0xff]  ;;  %v822_v55 = vld [vmem:[#allocation2 + $0xb8] sm:$0xff] }
  0xfc   : > { %v3126_v61 = vpop.f32.mrf.mxu0  ;;  %v901_v46 = vrot.slane %v808_v42, 7  ;;  %3136 = vmatpush3.msra.mxu1 %v1578_v52  ;;  %v3846_v42 = vpop.permute.xlu0 %1057  ;;  %v1034_v48 = vrot.slane %v825_v41, 1 }
  0xfd   : > { %791 = vst.msk [vmem:[#allocation2 + $0x110] sm:$0xff] %vm736_vm0, %v698_v59  ;;  %v713_v63 = vadd.f32 %v3126_v61, %v3688_v20  ;;  %v1577_v59 = vld [vmem:[%s4829_s3 + $0x10] sm:$0xff] }
  0xfe   : > { %v707_v0 = vpop.f32.mrf.mxu0  ;;  %v3778_v56 = vsel %vm891_vm3, %v901_v46, %v902_v47  ;;  %v1787_v61 = vld [vmem:[%s4830_s4 + $0x10] sm:$0xff]  ;;  %3137 = vmatprep.subr.mxu1 %v1577_v59  ;;  %v824_v35 = vld [vmem:[#allocation2 + $0xc8] sm:$0xff] }
  0xff   : > { %1109 = vrot.lane.b32.xlu1 %v981_v62, %s4849_s30  ;;  %1251 = vrot.lane.b32.xlu0 %v981_v62, %s4847_s27  ;;  %v708_v3 = vadd.f32 %v3688_v20, %v707_v0  ;;  %794 = vst.msk [vmem:[#allocation2 + $0x158] sm:$0xff] %vm736_vm0, %v713_v63  ;;  %v1576_v63 = vld [vmem:[%s4829_s3 + $0x8] sm:$0xff]  ;;  %v1026_v40 = vrot.slane %v824_v35, 7  ;;  %v1033_v47 = vrot.slane %v824_v35, 1 }
 0x100   : > { %v3129_v6 = vpop.f32.mrf.mxu0  ;;  %3171 = vmatprep.subr.mxu0 %v1787_v61  ;;  %3138 = vmatpush3.msra.mxu1 %v1577_v59  ;;  %v1786_v0 = vld [vmem:[%s4830_s4 + $0x8] sm:$0xff]  ;;  %v821_v33 = vld [vmem:[#allocation2 + $0xb0] sm:$0xff]  ;;  %v995_v59 = vrot.slane %v822_v55, 1 }
 0x101   : > { %793 = vst.msk [vmem:[#allocation2 + $0x140] sm:$0xff] %vm736_vm0, %v708_v3  ;;  %v723_v12 = vadd.f32 %v3129_v6, %v3688_v20  ;;  %3172 = vmatpush3.msra.mxu0 %v1787_v61  ;;  %3139 = vmatprep.subr.mxu1 %v1576_v63  ;;  %v815_v3 = vld [vmem:[#allocation2 + $0x80] sm:$0xff]  ;;  %v1035_v49 = vsel %vm972_vm2, %v1033_v47, %v1034_v48  ;;  %v820_v61 = vld [vmem:[#allocation2 + $0xa8] sm:$0xff] }
 0x102   : > { %v717_v13 = vpop.f32.mrf.mxu0  ;;  %3173 = vmatprep.subr.mxu0 %v1786_v0  ;;  %3140 = vmatpush3.msra.mxu1 %v1576_v63  ;;  %v988_v21 = vrot.slane %v815_v3, 1  ;;  %v908_v30 = vrot.slane %v815_v3, 7 }
 0x103   : > { %1297 = vrot.lane.b32.xlu1 %v3710_v53, %s4851_s18  ;;  %1065 = vrot.lane.b32.xlu0 %v812_v4, %s4843_s29  ;;  %796 = vst.msk [vmem:[#allocation2 + $0x188] sm:$0xff] %vm736_vm0, %v723_v12  ;;  %v718_v15 = vadd.f32 %v3688_v20, %v717_v13  ;;  %v991_v13 = vrot.slane %v3754_v38, 1 }
 0x104   : > { %v3132_v51 = vpop.f32.mrf.mxu0  ;;  %3174 = vmatpush3.msra.mxu0 %v1786_v0 }
 0x105   : > { %795 = vst.msk [vmem:[#allocation2 + $0x170] sm:$0xff] %vm736_vm0, %v718_v15  ;;  %v733_v57 = vadd.f32 %v3132_v51, %v3688_v20  ;;  %3175 = vmatprep.subr.mxu0 %v1785_v1  ;;  %v992_v15 = vrot.slane %v819_v11, 1  ;;  %v3857_v51 = vpop.permute.xlu0 %1073 }
 0x106   : > { %v727_v58 = vpop.f32.mrf.mxu0  ;;  %3176 = vmatpush3.msra.mxu0 %v1785_v1  ;;  %v914_v1 = vrot.slane %v821_v33, 7 }
 0x107   : > { %1393 = vrot.lane.b32.xlu1 %v981_v62, %s3348_s16  ;;  %1153 = vrot.lane.b32.xlu0 %v3734_v16, %s4839_s22  ;;  %798 = vst.msk [vmem:[#allocation2 + $0x1b8] sm:$0xff] %vm736_vm0, %v733_v57  ;;  %v728_v62 = vadd.f32 %v3688_v20, %v727_v58  ;;  %v1575_v20 = vld [vmem:[%s4829_s3] sm:$0xff]  ;;  %v993_v19 = vsel %vm972_vm2, %v991_v13, %v992_v15  ;;  %v836_v57 = vld [vmem:[#allocation2 + $0x128] sm:$0xff]  ;;  %v994_v58 = vrot.slane %v821_v33, 1  ;;  %v3886_v15 = vld [vmem:[#allocation2 + $0x110] sm:$0xff] }
 0x108   : > { %3141 = vmatprep.subr.mxu1 %v1575_v20  ;;  %v1000_v47 = vrot.slane %v3886_v15, 1 }
 0x109   : > { %797 = vst.msk [vmem:[#allocation2 + $0x1a0] sm:$0xff] %vm736_vm0, %v728_v62  ;;  %3142 = vmatpush3.msra.mxu1 %v1575_v20  ;;  %v3863_v62 = vpop.permute.xlu0 %1359  ;;  %v996_v0 = vsel %vm972_vm2, %v994_v58, %v995_v59  ;;  %v913_v20 = vrot.slane %v820_v61, 7  ;;  %v799_v58 = vld [vmem:[#allocation2] sm:$0xff] }
 0x10b   : > { %1207 = vrot.lane.b32.xlu1 %v812_v4, %s4845_s21  ;;  %1063 = vrot.lane.b32.xlu0 %v809_v17, %s4843_s29 }
 0x10f   : > { %1349 = vrot.lane.b32.xlu1 %v812_v4, %s4841_s17  ;;  %1347 = vrot.lane.b32.xlu0 %v809_v17, %s4841_s17  ;;  %v817_v4 = vld [vmem:[#allocation2 + $0x90] sm:$0xff]  ;;  %s4876_s17 = smov 24  }
 0x110   : > { %v910_v6 = vrot.slane %v817_v4, 7  ;;  %v3876_v4 = vpop.permute.xlu0 %1311 }
 0x112   : > { %v3817_v12 = vsel %vm891_vm3, %v910_v6, %v911_v9  ;;  %v835_v9 = vld [vmem:[#allocation2 + $0x120] sm:$0xff] }
 0x113   : > { %1107 = vrot.lane.b32.xlu1 %v978_v31, %s4849_s30  ;;  %1159 = vrot.lane.b32.xlu0 %v3746_v32, %s4839_s22  ;;  %s4871_s22 = smov 16  }
 0x117   : > { %1249 = vrot.lane.b32.xlu1 %v978_v31, %s4847_s27  ;;  %1255 = vrot.lane.b32.xlu0 %v987_v36, %s4847_s27  ;;  %s4872_s27 = smov 4   ;;  %v3832_v31 = vsel %vm891_vm3, %v907_v28, %v908_v30  ;;  %v1003_v28 = vrot.slane %v836_v57, 1 }
 0x11b   : > { %1205 = vrot.lane.b32.xlu1 %v809_v17, %s4845_s21  ;;  %1069 = vrot.lane.b32.xlu0 %v3754_v38, %s4843_s29  ;;  %s4870_s29 = smov 20   ;;  %v816_v17 = vld [vmem:[#allocation2 + $0x88] sm:$0xff] }
 0x11c   : > { %v989_v22 = vrot.slane %v816_v17, 1  ;;  %v922_v17 = vrot.slane %v835_v9, 7 }
 0x11e   : > { %v990_v27 = vsel %vm972_vm2, %v988_v21, %v989_v22  ;;  %v837_v21 = vld [vmem:[#allocation2 + $0x130] sm:$0xff] }
 0x11f   : > { %1113 = vrot.lane.b32.xlu1 %v987_v36, %s4849_s30  ;;  %1111 = vrot.lane.b32.xlu0 %v3760_v44, %s4849_s30  ;;  %v1004_v30 = vrot.slane %v837_v21, 1  ;;  %v841_v21 = vld [vmem:[#allocation2 + $0x150] sm:$0xff] }
 0x123   : > { %1301 = vrot.lane.b32.xlu1 %v3746_v32, %s4851_s18  ;;  %1299 = vrot.lane.b32.xlu0 %v3778_v56, %s4851_s18  ;;  %s4874_s18 = smov 12  }
 0x127   : > { %1397 = vrot.lane.b32.xlu1 %v987_v36, %s3348_s16  ;;  %1253 = vrot.lane.b32.xlu0 %v3760_v44, %s4870_s29  ;;  %v823_v36 = vld [vmem:[#allocation2 + $0xc0] sm:$0xff] }
 0x12b   : > { %1211 = vrot.lane.b32.xlu1 %v3754_v38, %s4871_s22  ;;  %1067 = vrot.lane.b32.xlu0 %v815_v3, %s4872_s27 }
 0x12f   : > { %1353 = vrot.lane.b32.xlu1 %v3754_v38, %s4873_s19  ;;  %1351 = vrot.lane.b32.xlu0 %v815_v3, %s4873_s19  ;;  %v1025_v38 = vrot.slane %v823_v36, 7  ;;  %v1005_v36 = vsel %vm972_vm2, %v1003_v28, %v1004_v30 }
 0x131   : > { %v1027_v46 = vsel %vm891_vm3, %v1025_v38, %v1026_v40  ;;  %v834_v38 = vld [vmem:[#allocation2 + $0x118] sm:$0xff] }
 0x132   : > { %v842_v40 = vld [vmem:[#allocation2 + $0x158] sm:$0xff]  ;;  %v1001_v48 = vrot.slane %v834_v38, 1  ;;  %v928_v38 = vrot.slane %v841_v21, 7  ;;  %v832_v21 = vld [vmem:[#allocation2 + $0x108] sm:$0xff] }
 0x133   : > { %1157 = vrot.lane.b32.xlu1 %v3778_v56, %s4874_s18  ;;  %1163 = vrot.lane.b32.xlu0 %v3817_v12, %s4874_s18 }
 0x137   : > { %1395 = vrot.lane.b32.xlu1 %v3760_v44, %s3348_s16  ;;  %1259 = vrot.lane.b32.xlu0 %v993_v19, %s4870_s29  ;;  %v3848_v44 = vpop.permute.xlu1 %1121 }
 0x138   : > { %4877 = vst [vmem:[#allocation11_spill] sm:$0xff] %v3848_v44 }
 0x13b   : > { %1209 = vrot.lane.b32.xlu1 %v815_v3, %s4871_s22  ;;  %1115 = vrot.lane.b32.xlu0 %v990_v27, %s4875_s20  ;;  %v3859_v52 = vpop.permute.xlu1 %1407  ;;  %v3871_v3 = vsel %vm891_vm3, %v913_v20, %v914_v1  ;;  %v892_v20 = vrot.slane %v799_v58, 7  ;;  %v893_v1 = vrot.slane %v3619_v25, 7 }
 0x13f   : > { %1117 = vrot.lane.b32.xlu1 %v993_v19, %s4875_s20  ;;  %1303 = vrot.lane.b32.xlu0 %v3832_v31, %s4876_s17  ;;  %v3865_v63 = vpop.permute.xlu1 %1327 }
 0x140   : > { %4878 = vst [vmem:[#allocation12_spill] sm:$0xff] %v3865_v63 }
 0x143   : > { %1305 = vrot.lane.b32.xlu1 %v3817_v12, %s4876_s17  ;;  %1257 = vrot.lane.b32.xlu0 %v990_v27, %s4870_s29  ;;  %v3878_v6 = vpop.permute.xlu1 %1375 }
 0x144   : > { %4879 = vst [vmem:[#allocation13_spill] sm:$0xff] %v3878_v6 }
 0x147   : > { %1401 = vrot.lane.b32.xlu1 %v993_v19, %s3348_s16  ;;  %1071 = vrot.lane.b32.xlu0 %v821_v33, %s4872_s27  ;;  %v923_v19 = vrot.slane %v836_v57, 7 }
 0x14b   : > { %1215 = vrot.lane.b32.xlu1 %v824_v35, %s4871_s22  ;;  %1355 = vrot.lane.b32.xlu0 %v821_v33, %s4873_s19 }
 0x14f   : > { %1357 = vrot.lane.b32.xlu1 %v824_v35, %s4873_s19  ;;  %1167 = vrot.lane.b32.xlu0 %v1027_v46, %s4874_s18 }
 0x153   : > { %1161 = vrot.lane.b32.xlu1 %v3832_v31, %s4874_s18  ;;  %1263 = vrot.lane.b32.xlu0 %v1035_v49, %s4870_s29 }
 0x157   : > { %1399 = vrot.lane.b32.xlu1 %v990_v27, %s3348_s16  ;;  %1077 = vrot.lane.b32.xlu0 %v836_v57, %s4872_s27  ;;  %v3896_v27 = vsel %vm891_vm3, %v922_v17, %v923_v19  ;;  %v3927_v17 = vld [vmem:[#allocation2 + $0x140] sm:$0xff]  ;;  %v894_v19 = vsel %vm891_vm3, %v892_v20, %v893_v1 }
 0x158   : > { %4880 = vst [vmem:[#allocation14_spill] sm:$0xff] %v3896_v27  ;;  %v1441_v30 = vsel %vm736_vm0, %v894_v19, %v3846_v42  ;;  %v1009_v19 = vrot.slane %v842_v40, 1 }
 0x15b   : > { %1213 = vrot.lane.b32.xlu1 %v821_v33, %s4871_s22  ;;  %1119 = vrot.lane.b32.xlu0 %v996_v0, %s4875_s20 }
 0x15f   : > { %1309 = vrot.lane.b32.xlu1 %v1027_v46, %s4876_s17  ;;  %1307 = vrot.lane.b32.xlu0 %v3871_v3, %s4876_s17 }
 0x163   : > { %1405 = vrot.lane.b32.xlu1 %v1035_v49, %s3348_s16  ;;  %1261 = vrot.lane.b32.xlu0 %v996_v0, %s4870_s29 }
 0x165   : > { %v3882_v11 = vpop.permute.xlu0 %1203  ;;  %v3884_v13 = vpop.permute.xlu1 %1061 }
 0x167   : > { %1219 = vrot.lane.b32.xlu1 %v836_v57, %s4871_s22  ;;  %1075 = vrot.lane.b32.xlu0 %v3886_v15, %s4872_s27 }
 0x169   : > { %v3891_v22 = vpop.permute.xlu1 %1345  ;;  %v3893_v23 = vpop.permute.xlu0 %1059 }
 0x16b   : > { %1361 = vrot.lane.b32.xlu1 %v836_v57, %s4873_s19  ;;  %1171 = vrot.lane.b32.xlu0 %v3896_v27, %s4874_s18  ;;  %v1002_v57 = vsel %vm972_vm2, %v1000_v47, %v1001_v48  ;;  %v929_v47 = vrot.slane %v842_v40, 7  ;;  %v843_v48 = vld [vmem:[#allocation2 + $0x160] sm:$0xff] }
 0x16c   : > { %v1010_v1 = vrot.slane %v843_v48, 1  ;;  %v920_v48 = vrot.slane %v3886_v15, 7 }
 0x16d   : > { %v3901_v33 = vpop.permute.xlu1 %1155  ;;  %v1202_v35 = vpop.permute.xlu0 %1201  ;;  %v3949_v42 = vsel %vm891_vm3, %v928_v38, %v929_v47 }
 0x16e   : > { %4881 = vst [vmem:[#allocation15_spill] sm:$0xff] %v3949_v42  ;;  %v1011_v47 = vsel %vm972_vm2, %v1009_v19, %v1010_v1 }
 0x16f   : > { %1165 = vrot.lane.b32.xlu1 %v3871_v3, %s4874_s18  ;;  %1267 = vrot.lane.b32.xlu0 %v1005_v36, %s4870_s29 }
 0x171   : > { %v3907_v41 = vpop.permute.xlu1 %1109  ;;  %v3909_v46 = vpop.permute.xlu0 %1251 }
 0x173   : > { %1403 = vrot.lane.b32.xlu1 %v996_v0, %s3348_s16  ;;  %1081 = vrot.lane.b32.xlu0 %v842_v40, %s4872_s27 }
 0x175   : > { %v1298_v49 = vpop.permute.xlu1 %1297  ;;  %v3914_v55 = vpop.permute.xlu0 %1065 }
 0x177   : > { %1217 = vrot.lane.b32.xlu1 %v3886_v15, %s4871_s22  ;;  %1123 = vrot.lane.b32.xlu0 %v1002_v57, %s4875_s20 }
 0x179   : > { %v1394_v59 = vpop.permute.xlu1 %1393  ;;  %v1154_v61 = vpop.permute.xlu0 %1153 }
 0x17b   : > { %1125 = vrot.lane.b32.xlu1 %v1005_v36, %s4875_s20  ;;  %1265 = vrot.lane.b32.xlu0 %v1002_v57, %s4870_s29  ;;  %v1457_v57 = vsel %vm542_vm1, %v1441_v30, %v3842_v37 }
 0x17c   : > { %v1474_v7 = vsel %vm1473_vm5, %v1457_v57, %v1154_v61  ;;  %v919_v61 = vrot.slane %v832_v21, 7 }
 0x17d   : > { %v3923_v0 = vpop.permute.xlu1 %1207  ;;  %v3925_v9 = vpop.permute.xlu0 %1063 }
 0x17e   : > { %v3973_v15 = vsel %vm891_vm3, %v919_v61, %v920_v48  ;;  %v926_v61 = vrot.slane %v3927_v17, 7 }
 0x17f   : > { %1313 = vrot.lane.b32.xlu1 %v3896_v27, %s4876_s17  ;;  %1079 = vrot.lane.b32.xlu0 %v3927_v17, %s4872_s27 }
 0x181   : > { %v3934_v25 = vpop.permute.xlu1 %1349  ;;  %v3936_v28 = vpop.permute.xlu0 %1347 }
 0x183   : > { %1409 = vrot.lane.b32.xlu1 %v1005_v36, %s3348_s16  ;;  %1363 = vrot.lane.b32.xlu0 %v3927_v17, %s4873_s19  ;;  %v1491_v36 = vsel %vm1490_vm6, %v1474_v7, %v1202_v35  ;;  %v3965_v35 = vld [vmem:[#allocation2 + $0x188] sm:$0xff] }
 0x184   : > { %v935_v5 = vrot.slane %v3965_v35, 7  ;;  %v1015_v6 = vrot.slane %v3965_v35, 1 }
 0x185   : > { %v1108_v58 = vpop.permute.xlu1 %1107  ;;  %v3945_v20 = vpop.permute.xlu0 %1159 }
 0x187   : > { %1223 = vrot.lane.b32.xlu1 %v842_v40, %s4871_s22  ;;  %1175 = vrot.lane.b32.xlu0 %v3949_v42, %s4874_s18 }
 0x189   : > { %v1250_v37 = vpop.permute.xlu1 %1249  ;;  %v3955_v30 = vpop.permute.xlu0 %1255 }
 0x18a   : > { %v1508_v38 = vsel %vm1507_vm7, %v1491_v36, %v1250_v37 }
 0x18b   : > { %v1525_v57 = vsel %vm1524_vm8, %v1508_v38, %v1298_v49  ;;  %1365 = vrot.lane.b32.xlu1 %v842_v40, %s4873_s19  ;;  %1271 = vrot.lane.b32.xlu0 %v1011_v47, %s4870_s29  ;;  %v1006_v40 = vrot.slane %v3927_v17, 1  ;;  %v1007_v49 = vrot.slane %v840_v24, 1 }
 0x18c   : > { %v1542_v7 = vsel %vm1541_vm9, %v1525_v57, %v3891_v22  ;;  %v838_v22 = vld [vmem:[#allocation2 + $0x138] sm:$0xff] }
 0x18d   : > { %v1206_v21 = vpop.permute.xlu1 %1205  ;;  %v3967_v37 = vpop.permute.xlu0 %1069  ;;  %v1559_v1 = vsel %vm1558_vm10, %v1542_v7, %v1394_v59  ;;  %v1008_v36 = vsel %vm972_vm2, %v1006_v40, %v1007_v49  ;;  %v925_v38 = vrot.slane %v838_v22, 7  ;;  %v1442_v40 = vsel %vm736_vm0, %v3734_v16, %v3893_v23  ;;  %v847_v16 = vld [vmem:[#allocation2 + $0x180] sm:$0xff] }
 0x18e   : > { %3143 = vmatprep.mubr.msk.f32.mxu1 %vm1587_vm11, %v1559_v1  ;;  %3177 = vmatprep.mubr.msk.f32.mxu0 %vm1587_vm11, %v1559_v1 }
 0x18f   : > { %1169 = vrot.lane.b32.xlu1 %v3973_v15, %s4874_s18  ;;  %1085 = vrot.lane.b32.xlu0 %v3965_v35, %s4872_s27  ;;  %v3990_v57 = vsel %vm891_vm3, %v925_v38, %v926_v61  ;;  %v4006_v38 = vld [vmem:[#allocation2 + $0x170] sm:$0xff] }
 0x191   : > { %v3980_v19 = vpop.permute.xlu1 %1113  ;;  %v3982_v59 = vpop.permute.xlu0 %1111 }
 0x193   : > { %1221 = vrot.lane.b32.xlu1 %v3927_v17, %s4871_s22  ;;  %1127 = vrot.lane.b32.xlu0 %v1008_v36, %s4875_s20  ;;  %v1458_v17 = vsel %vm542_vm1, %v1442_v40, %v1108_v58  ;;  %v934_v40 = vrot.slane %v847_v16, 7 }
 0x194   : > { %v1475_v61 = vsel %vm1473_vm5, %v1458_v17, %v3901_v33  ;;  %v849_v33 = vld [vmem:[#allocation2 + $0x190] sm:$0xff] }
 0x195   : > { %v1302_v24 = vpop.permute.xlu1 %1301  ;;  %v1300_v48 = vpop.permute.xlu0 %1299  ;;  %v1492_v58 = vsel %vm1490_vm6, %v1475_v61, %v3882_v11  ;;  %v4037_v27 = vsel %vm891_vm3, %v934_v40, %v935_v5  ;;  %v1016_v44 = vrot.slane %v849_v33, 1  ;;  %v844_v40 = vld [vmem:[#allocation2 + $0x168] sm:$0xff] }
 0x196   : > { %v1509_v11 = vsel %vm1507_vm7, %v1492_v58, %v3909_v46 }
 0x197   : > { %1129 = vrot.lane.b32.xlu1 %v1011_v47, %s4875_s20  ;;  %1315 = vrot.lane.b32.xlu0 %v3990_v57, %s4876_s17  ;;  %v1526_v63 = vsel %vm1524_vm8, %v1509_v11, %v1300_v48  ;;  %v932_v11 = vrot.slane %v4006_v38, 7 }
 0x198   : > { %v1543_v46 = vsel %vm1541_vm9, %v1526_v63, %v3936_v28  ;;  %v4060_v63 = vld [vmem:[#allocation2 + $0x1b8] sm:$0xff] }
 0x199   : > { %v1398_v7 = vpop.permute.xlu1 %1397  ;;  %v1254_v1 = vpop.permute.xlu0 %1253 }
 0x19b   : > { %1317 = vrot.lane.b32.xlu1 %v3949_v42, %s4876_s17  ;;  %1269 = vrot.lane.b32.xlu0 %v1008_v36, %s4870_s29 }
 0x19d   : > { %v4002_v49 = vpop.permute.xlu1 %1211  ;;  %v4004_v22 = vpop.permute.xlu0 %1067 }
 0x19f   : > { %1413 = vrot.lane.b32.xlu1 %v1011_v47, %s3348_s16  ;;  %1083 = vrot.lane.b32.xlu0 %v4006_v38, %s4872_s27  ;;  %v1443_v47 = vsel %vm736_vm0, %v3710_v53, %v3884_v13 }
 0x1a0   : > { %v1459_v17 = vsel %vm542_vm1, %v1443_v47, %v3907_v41 }
 0x1a1   : > { %v4013_v23 = vpop.permute.xlu1 %1353  ;;  %v4015_v18 = vpop.permute.xlu0 %1351 }
 0x1a3   : > { %1227 = vrot.lane.b32.xlu1 %v3965_v35, %s4871_s22  ;;  %1367 = vrot.lane.b32.xlu0 %v4006_v38, %s4873_s19 }
 0x1a5   : > { %v1158_v61 = vpop.permute.xlu1 %1157  ;;  %v4031_v16 = vpop.permute.xlu0 %1163 }
 0x1a6   : > { %v1476_v42 = vsel %vm1473_vm5, %v1459_v17, %v1158_v61  ;;  %v931_v17 = vrot.slane %v844_v40, 7 }
 0x1a7   : > { %v1493_v53 = vsel %vm1490_vm6, %v1476_v42, %v1206_v21  ;;  %1369 = vrot.lane.b32.xlu1 %v3965_v35, %s4873_s19  ;;  %1179 = vrot.lane.b32.xlu0 %v4037_v27, %s4874_s18  ;;  %v1017_v42 = vsel %vm972_vm2, %v1015_v6, %v1016_v44 }
 0x1a8   : > { %v1510_v13 = vsel %vm1507_vm7, %v1493_v53, %v1254_v1 }
 0x1a9   : > { %v1396_v41 = vpop.permute.xlu1 %1395  ;;  %v4047_v48 = vpop.permute.xlu0 %1259  ;;  %v1527_v5 = vsel %vm1524_vm8, %v1510_v13, %v1302_v24  ;;  %v4083_v13 = vsel %vm891_vm3, %v931_v17, %v932_v11  ;;  %v1029_v11 = vrot.slane %v4060_v63, 7 }
 0x1aa   : > { %v1560_v58 = vsel %vm1558_vm10, %v1543_v46, %v1396_v41  ;;  %v1544_v35 = vsel %vm1541_vm9, %v1527_v5, %v3934_v25  ;;  %v846_v25 = vld [vmem:[#allocation2 + $0x178] sm:$0xff]  ;;  %v1444_v41 = vsel %vm736_vm0, %v3778_v56, %v3925_v9 }
 0x1ab   : > { %1173 = vrot.lane.b32.xlu1 %v3990_v57, %s4874_s18  ;;  %1275 = vrot.lane.b32.xlu0 %v1017_v42, %s4870_s29  ;;  %v1561_v21 = vsel %vm1558_vm10, %v1544_v35, %v1398_v7  ;;  %v1012_v7 = vrot.slane %v4006_v38, 1  ;;  %v1013_v1 = vrot.slane %v846_v25, 1 }
 0x1ac   : > { %3144 = vmatmul.mubr.msk.f32.vlgmr.msra.gmra.mxu1 %vm1587_vm11, %v1560_v58  ;;  %3178 = vmatmul.mubr.msk.f32.vlgmr.msra.gmra.mxu0 %vm1587_vm11, %v1560_v58 }
 0x1ad   : > { %3146 = vmatprep.mubr.msk.f32.mxu1 %vm1587_vm11, %v1561_v21  ;;  %3180 = vmatprep.mubr.msk.f32.mxu0 %vm1587_vm11, %v1561_v21  ;;  %v1210_v44 = vpop.permute.xlu1 %1209  ;;  %v4064_v6 = vpop.permute.xlu0 %1115  ;;  %v851_v21 = vld [vmem:[#allocation2 + $0x1a0] sm:$0xff] }
 0x1af   : > { %1411 = vrot.lane.b32.xlu1 %v1008_v36, %s3348_s16  ;;  %1231 = vrot.lane.b32.xlu0 %v4060_v63, %s4871_s22  ;;  %v1014_v36 = vsel %vm972_vm2, %v1012_v7, %v1013_v1 }
 0x1b1   : > { %v4069_v28 = vpop.permute.xlu1 %1117  ;;  %v1304_v24 = vpop.permute.xlu0 %1303 }
 0x1b3   : > { %1225 = vrot.lane.b32.xlu1 %v4006_v38, %s4871_s22  ;;  %1373 = vrot.lane.b32.xlu0 %v4060_v63, %s4873_s19  ;;  %v1460_v38 = vsel %vm542_vm1, %v1444_v41, %v3982_v59  ;;  %v853_v59 = vld [vmem:[#allocation2 + $0x1b0] sm:$0xff] }
 0x1b4   : > { %v1477_v58 = vsel %vm1473_vm5, %v1460_v38, %v3945_v20  ;;  %v1445_v20 = vsel %vm736_vm0, %v3746_v32, %v3914_v55  ;;  %v1028_v17 = vrot.slane %v853_v59, 7  ;;  %v855_v32 = vld [vmem:[#allocation2 + $0x1c0] sm:$0xff] }
 0x1b5   : > { %v1306_v33 = vpop.permute.xlu1 %1305  ;;  %v1258_v47 = vpop.permute.xlu0 %1257  ;;  %v1494_v35 = vsel %vm1490_vm6, %v1477_v58, %v3923_v0  ;;  %v1036_v58 = vrot.slane %v4060_v63, 1  ;;  %v1037_v59 = vrot.slane %v855_v32, 1 }
 0x1b6   : > { %v1511_v25 = vsel %vm1507_vm7, %v1494_v35, %v3955_v30 }
 0x1b7   : > { %1133 = vrot.lane.b32.xlu1 %v1017_v42, %s4875_s20  ;;  %1131 = vrot.lane.b32.xlu0 %v1014_v36, %s4875_s20  ;;  %v1528_v0 = vsel %vm1524_vm8, %v1511_v25, %v1304_v24 }
 0x1b9   : > { %v1402_v61 = vpop.permute.xlu1 %1401  ;;  %v4080_v53 = vpop.permute.xlu0 %1071 }
 0x1bb   : > { %1321 = vrot.lane.b32.xlu1 %v4037_v27, %s4876_s17  ;;  %1319 = vrot.lane.b32.xlu0 %v4083_v13, %s4876_s17 }
 0x1bd   : > { %v4094_v46 = vpop.permute.xlu1 %1215  ;;  %v4096_v5 = vpop.permute.xlu0 %1355 }
 0x1bf   : > { %1417 = vrot.lane.b32.xlu1 %v1017_v42, %s3348_s16  ;;  %1273 = vrot.lane.b32.xlu0 %v1014_v36, %s4870_s29  ;;  %v1461_v42 = vsel %vm542_vm1, %v1445_v20, %v3980_v19  ;;  %v1545_v19 = vsel %vm1541_vm9, %v1528_v0, %v4015_v18  ;;  %v852_v20 = vld [vmem:[#allocation2 + $0x1a8] sm:$0xff] }
 0x1c0   : > { %v1019_v0 = vrot.slane %v852_v20, 1 }
 0x1c1   : > { %v4102_v56 = vpop.permute.xlu1 %1357  ;;  %v4104_v9 = vpop.permute.xlu0 %1167 }
 0x1c3   : > { %1177 = vrot.lane.b32.xlu1 %v4083_v13, %s4874_s18  ;;  %1087 = vrot.lane.b32.xlu0 %v851_v21, %s4872_s27 }
 0x1c5   : > { %v1162_v7 = vpop.permute.xlu1 %1161  ;;  %v4118_v1 = vpop.permute.xlu0 %1263 }
 0x1c6   : > { %v1478_v40 = vsel %vm1473_vm5, %v1461_v42, %v1162_v7  ;;  %v1038_v42 = vsel %vm972_vm2, %v1036_v58, %v1037_v59  ;;  %v1018_v7 = vrot.slane %v851_v21, 1 }
 0x1c7   : > { %v1495_v41 = vsel %vm1490_vm6, %v1478_v40, %v1210_v44  ;;  %1415 = vrot.lane.b32.xlu1 %v1014_v36, %s3348_s16  ;;  %1371 = vrot.lane.b32.xlu0 %v851_v21, %s4873_s19  ;;  %v1030_v44 = vsel %vm891_vm3, %v1028_v17, %v1029_v11  ;;  %v858_v17 = vld [vmem:[#allocation2 + $0x1d8] sm:$0xff] }
 0x1c8   : > { %v1512_v55 = vsel %vm1507_vm7, %v1495_v41, %v1258_v47  ;;  %v850_v47 = vld [vmem:[#allocation2 + $0x198] sm:$0xff]  ;;  %v1020_v41 = vsel %vm972_vm2, %v1018_v7, %v1019_v0  ;;  %v1055_v32 = vrot.slane %v858_v17, 1 }
 0x1c9   : > { %v1400_v30 = vpop.permute.xlu1 %1399  ;;  %v4129_v38 = vpop.permute.xlu0 %1077  ;;  %v1529_v24 = vsel %vm1524_vm8, %v1512_v55, %v1306_v33  ;;  %v937_v25 = vrot.slane %v850_v47, 7 }
 0x1ca   : > { %v1562_v35 = vsel %vm1558_vm10, %v1545_v19, %v1400_v30  ;;  %v1546_v36 = vsel %vm1541_vm9, %v1529_v24, %v4013_v23  ;;  %v938_v23 = vrot.slane %v851_v21, 7  ;;  %v1446_v19 = vsel %vm736_vm0, %v3832_v31, %v4004_v22 }
 0x1cb   : > { %1229 = vrot.lane.b32.xlu1 %v851_v21, %s4871_s22  ;;  %1183 = vrot.lane.b32.xlu0 %v1030_v44, %s4874_s18  ;;  %v1563_v18 = vsel %vm1558_vm10, %v1546_v36, %v1402_v61  ;;  %v1054_v21 = vrot.slane %v3675_v10, 1  ;;  %v1448_v24 = vsel %vm736_vm0, %v3871_v3, %v4080_v53  ;;  %v1462_v58 = vsel %vm542_vm1, %v1446_v19, %v4064_v6  ;;  %v4882_v19 = vld [vmem:[#allocation11_spill] sm:$0xff]  ;;  %s4549_s22 = sld [smem:[#allocation3]] }
 0x1cc   : > { %3147 = vmatmul.mubr.msk.f32.gmra.mxu1 %vm1587_vm11, %v1562_v35  ;;  %3181 = vmatmul.mubr.msk.f32.gmra.mxu0 %vm1587_vm11, %v1562_v35  ;;  %v4148_v11 = vsel %vm891_vm3, %v937_v25, %v938_v23  ;;  %v1479_v31 = vsel %vm1473_vm5, %v1462_v58, %v4031_v16  ;;  %v1447_v16 = vsel %vm736_vm0, %v3817_v12, %v3967_v37 }
 0x1cd   : > { %3149 = vmatprep.mubr.msk.f32.mxu1 %vm1587_vm11, %v1563_v18  ;;  %3183 = vmatprep.mubr.msk.f32.mxu0 %vm1587_vm11, %v1563_v18  ;;  %v1214_v63 = vpop.permute.xlu1 %1213  ;;  %v1120_v33 = vpop.permute.xlu0 %1119  ;;  %v1056_v35 = vsel %vm972_vm2, %v1054_v21, %v1055_v32  ;;  %v1496_v59 = vsel %vm1490_vm6, %v1479_v31, %v4002_v49 }
 0x1ce   : > { %v1464_v10 = vsel %vm542_vm1, %v1448_v24, %v1120_v33 }
 0x1cf   : > { %1279 = vrot.lane.b32.xlu1 %v1038_v42, %s4870_s29  ;;  %1325 = vrot.lane.b32.xlu0 %v1030_v44, %s4876_s17  ;;  %v1481_v3 = vsel %vm1473_vm5, %v1464_v10, %v4104_v9  ;;  %v1463_v9 = vsel %vm542_vm1, %v1447_v16, %v4069_v28 }
 0x1d0   : > { %v1498_v6 = vsel %vm1490_vm6, %v1481_v3, %v4094_v46  ;;  %v1513_v46 = vsel %vm1507_vm7, %v1496_v59, %v4047_v48 }
 0x1d1   : > { %v1310_v61 = vpop.permute.xlu1 %1309  ;;  %v1308_v40 = vpop.permute.xlu0 %1307  ;;  %v1515_v18 = vsel %vm1507_vm7, %v1498_v6, %v4118_v1 }
 0x1d2   : > { %v1530_v20 = vsel %vm1524_vm8, %v1513_v46, %v1308_v40  ;;  %v1532_v37 = vsel %vm1524_vm8, %v1515_v18, %v3876_v4 }
 0x1d3   : > { %1181 = vrot.lane.b32.xlu1 %v4148_v11, %s4874_s18  ;;  %1135 = vrot.lane.b32.xlu0 %v1020_v41, %s4875_s20  ;;  %v1547_v28 = vsel %vm1541_vm9, %v1530_v20, %v4096_v5  ;;  %v1549_v4 = vsel %vm1541_vm9, %v1532_v37, %v3863_v62 }
 0x1d4   : > { %v1566_v62 = vsel %vm1558_vm10, %v1549_v4, %v3859_v52  ;;  %v829_v52 = vld [vmem:[#allocation2 + $0xf0] sm:$0xff] }
 0x1d5   : > { %v1406_v55 = vpop.permute.xlu1 %1405  ;;  %v1262_v30 = vpop.permute.xlu0 %1261 }
 0x1d7   : > { %1277 = vrot.lane.b32.xlu1 %v1020_v41, %s4870_s29  ;;  %1323 = vrot.lane.b32.xlu0 %v4148_v11, %s4876_s17  ;;  %s3029_s29 = sshll.u32 %s3445_s11, 11  ;;  %s3354_s17 = smov [#allocation4]  }
 0x1d9   : > { %v1220_v44 = vpop.permute.xlu1 %1219  ;;  %v1076_v36 = vpop.permute.xlu0 %1075 }
 0x1da   : > { %v1450_v5 = vsel %vm736_vm0, %v3973_v15, %v1076_v36 }
 0x1db   : > { %1423 = vrot.lane.b32.xlu1 %v1056_v35, %s3348_s16  ;;  %1419 = vrot.lane.b32.xlu0 %v1020_v41, %s3348_s16 }
 0x1dd   : > { %v4174_v22 = vpop.permute.xlu1 %1361  ;;  %v1172_v53 = vpop.permute.xlu0 %1171 }
 0x1df   : > { %1421 = vrot.lane.b32.xlu0 %v1038_v42, %s3348_s16  ;;  %2467 = vrot.lane.b32.xlu1 %v3571_v39, %s4875_s20 }
 0x1e1   : > { %v1166_v47 = vpop.permute.xlu1 %1165  ;;  %v4192_v49 = vpop.permute.xlu0 %1267 }
 0x1e2   : > { %v1480_v39 = vsel %vm1473_vm5, %v1463_v9, %v1166_v47 }
 0x1e3   : > { %v1497_v33 = vsel %vm1490_vm6, %v1480_v39, %v1214_v63  ;;  %2465 = vrot.lane.b32.xlu0 %v3559_v29, %s4875_s20  ;;  %2471 = vrot.lane.b32.xlu1 %v3586_v54, %s4875_s20  ;;  %v4883_v39 = vld [vmem:[#allocation14_spill] sm:$0xff] }
 0x1e4   : > { %v1514_v12 = vsel %vm1507_vm7, %v1497_v33, %v1262_v30 }
 0x1e5   : > { %v1404_v48 = vpop.permute.xlu1 %1403  ;;  %v4206_v1 = vpop.permute.xlu0 %1081  ;;  %v1531_v23 = vsel %vm1524_vm8, %v1514_v12, %v1310_v61 }
 0x1e6   : > { %v1564_v63 = vsel %vm1558_vm10, %v1547_v28, %v1404_v48  ;;  %v1548_v29 = vsel %vm1541_vm9, %v1531_v23, %v4102_v56 }
 0x1e7   : > { %3150 = vmatmul.mubr.msk.f32.gmra.mxu1 %vm1587_vm11, %v1564_v63  ;;  %3184 = vmatmul.mubr.msk.f32.gmra.mxu0 %vm1587_vm11, %v1564_v63  ;;  %v1565_v54 = vsel %vm1558_vm10, %v1548_v29, %v1406_v55 }
 0x1e8   : > { %3152 = vmatprep.mubr.msk.f32.mxu1 %vm1587_vm11, %v1565_v54  ;;  %3186 = vmatprep.mubr.msk.f32.mxu0 %vm1587_vm11, %v1565_v54 }
 0x1e9   : > { %v1218_v42 = vpop.permute.xlu1 %1217  ;;  %v1124_v25 = vpop.permute.xlu0 %1123  ;;  %2469 = vrot.lane.b32.xlu0 %v3576_v45, %s4875_s20  ;;  %2475 = vrot.lane.b32.xlu1 %v3606_v8, %s4875_s20 }
 0x1ea   : > { %v1466_v56 = vsel %vm542_vm1, %v1450_v5, %v1124_v25 }
 0x1eb   : > { %v1483_v7 = vsel %vm1473_vm5, %v1466_v56, %v1172_v53  ;;  %3153 = vmatmul.mubr.msk.f32.gmra.mxu1 %vm1587_vm11, %v1566_v62  ;;  %3187 = vmatmul.mubr.msk.f32.gmra.mxu0 %vm1587_vm11, %v1566_v62 }
 0x1ec   : > { %v1500_v15 = vsel %vm1490_vm6, %v1483_v7, %v1220_v44 }
 0x1ed   : > { %v1126_v0 = vpop.permute.xlu1 %1125  ;;  %v1266_v61 = vpop.permute.xlu0 %1265  ;;  %2473 = vrot.lane.b32.xlu0 %v3593_v60, %s4875_s20  ;;  %2479 = vrot.lane.b32.xlu1 %v3623_v26, %s4875_s20  ;;  %v916_v60 = vrot.slane %v829_v52, 7  ;;  %v3282_v26 = vld [vmem:[#allocation2 + $0xf8] sm:$0xff]  ;;  %v1517_v12 = vsel %vm1507_vm7, %v1500_v15, %v4192_v49 }
 0x1ee   : > { %v917_v41 = vrot.slane %v3282_v26, 7 }
 0x1f1   : > { %v1314_v45 = vpop.permute.xlu1 %1313  ;;  %v4236_v8 = vpop.permute.xlu0 %1079  ;;  %2477 = vrot.lane.b32.xlu0 %v3613_v14, %s4875_s20  ;;  %2483 = vrot.lane.b32.xlu1 %v3640_v43, %s4875_s20  ;;  %v918_v14 = vsel %vm891_vm3, %v916_v60, %v917_v41  ;;  %v4884_v41 = vld [vmem:[#allocation15_spill] sm:$0xff] }
 0x1f2   : > { %v1449_v30 = vsel %vm736_vm0, %v918_v14, %v3857_v51  ;;  %v1453_v14 = vsel %vm736_vm0, %v4884_v41, %v4206_v1 }
 0x1f5   : > { %v1410_v40 = vpop.permute.xlu1 %1409  ;;  %v1364_v17 = vpop.permute.xlu0 %1363  ;;  %2481 = vrot.lane.b32.xlu0 %v3632_v34, %s4875_s20  ;;  %2487 = vrot.lane.b32.xlu1 %v3658_v2, %s4875_s20  ;;  %v1465_v34 = vsel %vm542_vm1, %v1449_v30, %v4882_v19 }
 0x1f9   : > { %v1224_v21 = vpop.permute.xlu1 %1223  ;;  %v1176_v32 = vpop.permute.xlu0 %1175  ;;  %2485 = vrot.lane.b32.xlu0 %v3645_v50, %s4875_s20 }
 0x1fd   : > { %v1366_v43 = vpop.permute.xlu1 %1365  ;;  %v1272_v55 = vpop.permute.xlu0 %1271 }
 0x201   : > { %v1170_v24 = vpop.permute.xlu1 %1169  ;;  %v4253_v2 = vpop.permute.xlu0 %1085 }
 0x202   : > { %v1482_v58 = vsel %vm1473_vm5, %v1465_v34, %v1170_v24 }
 0x203   : > { %v1499_v10 = vsel %vm1490_vm6, %v1482_v58, %v1218_v42 }
 0x204   : > { %v1516_v35 = vsel %vm1507_vm7, %v1499_v10, %v1266_v61 }
 0x205   : > { %v1222_v50 = vpop.permute.xlu1 %1221  ;;  %v1128_v44 = vpop.permute.xlu0 %1127  ;;  %v1533_v36 = vsel %vm1524_vm8, %v1516_v35, %v1314_v45 }
 0x206   : > { %v1550_v31 = vsel %vm1541_vm9, %v1533_v36, %v4174_v22  ;;  %v1451_v22 = vsel %vm736_vm0, %v4883_v39, %v4129_v38 }
 0x207   : > { %v1567_v51 = vsel %vm1558_vm10, %v1550_v31, %v1410_v40  ;;  %v1467_v33 = vsel %vm542_vm1, %v1451_v22, %v1126_v0  ;;  %v1452_v0 = vsel %vm736_vm0, %v3990_v57, %v4236_v8 }
 0x208   : > { %3155 = vmatprep.mubr.msk.f32.mxu1 %vm1587_vm11, %v1567_v51  ;;  %3189 = vmatprep.mubr.msk.f32.mxu0 %vm1587_vm11, %v1567_v51  ;;  %v1468_v61 = vsel %vm542_vm1, %v1452_v0, %v1128_v44 }
 0x209   : > { %v1130_v3 = vpop.permute.xlu1 %1129  ;;  %v1316_v53 = vpop.permute.xlu0 %1315  ;;  %v1485_v40 = vsel %vm1473_vm5, %v1468_v61, %v1176_v32 }
 0x20a   : > { %v1534_v28 = vsel %vm1524_vm8, %v1517_v12, %v1316_v53  ;;  %v1502_v26 = vsel %vm1490_vm6, %v1485_v40, %v1224_v21 }
 0x20b   : > { %v1551_v4 = vsel %vm1541_vm9, %v1534_v28, %v1364_v17  ;;  %v1519_v30 = vsel %vm1507_vm7, %v1502_v26, %v1272_v55 }
 0x20d   : > { %v1318_v6 = vpop.permute.xlu1 %1317  ;;  %v1270_v59 = vpop.permute.xlu0 %1269 }
 0x211   : > { %v1414_v16 = vpop.permute.xlu1 %1413  ;;  %v1084_v9 = vpop.permute.xlu0 %1083 }
 0x212   : > { %v1454_v31 = vsel %vm736_vm0, %v4083_v13, %v1084_v9 }
 0x215   : > { %v4264_v18 = vpop.permute.xlu1 %1227  ;;  %v1368_v46 = vpop.permute.xlu0 %1367 }
 0x219   : > { %v1370_v47 = vpop.permute.xlu1 %1369  ;;  %v1180_v20 = vpop.permute.xlu0 %1179 }
 0x21d   : > { %v1174_v37 = vpop.permute.xlu1 %1173  ;;  %v4272_v48 = vpop.permute.xlu0 %1275 }
 0x21e   : > { %v1484_v23 = vsel %vm1473_vm5, %v1467_v33, %v1174_v37 }
 0x21f   : > { %v1501_v63 = vsel %vm1490_vm6, %v1484_v23, %v1222_v50 }
 0x220   : > { %v1518_v29 = vsel %vm1507_vm7, %v1501_v63, %v1270_v59  ;;  %v1455_v59 = vsel %vm736_vm0, %v4037_v27, %v4253_v2 }
 0x221   : > { %v1412_v54 = vpop.permute.xlu1 %1411  ;;  %v1232_v38 = vpop.permute.xlu0 %1231  ;;  %v1535_v5 = vsel %vm1524_vm8, %v1518_v29, %v1318_v6 }
 0x222   : > { %v1568_v42 = vsel %vm1558_vm10, %v1551_v4, %v1412_v54  ;;  %v1552_v49 = vsel %vm1541_vm9, %v1535_v5, %v1366_v43  ;;  %v1469_v43 = vsel %vm542_vm1, %v1453_v14, %v1130_v3  ;;  %v4885_v4 = vld [vmem:[#allocation12_spill] sm:$0xff]  ;;  %v4364_v14 = vld [vmem:[%s4833_s7] ss:$0 sm:$0xff] }
 0x223   : > { %3156 = vmatmul.mubr.msk.f32.gmra.mxu1 %vm1587_vm11, %v1568_v42  ;;  %3190 = vmatmul.mubr.msk.f32.gmra.mxu0 %vm1587_vm11, %v1568_v42  ;;  %v1569_v25 = vsel %vm1558_vm10, %v1552_v49, %v1414_v16  ;;  %v4886_v49 = vld [vmem:[#allocation13_spill] sm:$0xff] }
 0x224   : > { %3158 = vmatprep.mubr.msk.f32.mxu1 %vm1587_vm11, %v1569_v25  ;;  %3192 = vmatprep.mubr.msk.f32.mxu0 %vm1587_vm11, %v1569_v25 }
 0x225   : > { %v1226_v56 = vpop.permute.xlu1 %1225  ;;  %v4287_v62 = vpop.permute.xlu0 %1373 }
 0x229   : > { %v1134_v7 = vpop.permute.xlu1 %1133  ;;  %v1132_v15 = vpop.permute.xlu0 %1131 }
 0x22a   : > { %v1470_v51 = vsel %vm542_vm1, %v1454_v31, %v1132_v15  ;;  %v1471_v39 = vsel %vm542_vm1, %v1455_v59, %v1134_v7 }
 0x22b   : > { %v1487_v6 = vsel %vm1473_vm5, %v1470_v51, %v1180_v20 }
 0x22c   : > { %v1504_v13 = vsel %vm1490_vm6, %v1487_v6, %v4264_v18  ;;  %v4390_v6 = vld [vmem:[%s4833_s7 + $0x2] ss:$0 sm:$0xff] }
 0x22d   : > { %v1322_v45 = vpop.permute.xlu1 %1321  ;;  %v1320_v52 = vpop.permute.xlu0 %1319  ;;  %v1521_v27 = vsel %vm1507_vm7, %v1504_v13, %v4272_v48  ;;  %v4398_v13 = vld [vmem:[%s4833_s7 + $0x3] ss:$0 sm:$0xff] }
 0x22e   : > { %v1536_v8 = vsel %vm1524_vm8, %v1519_v30, %v1320_v52  ;;  %v1973_v52 = vld [vmem:[#allocation2 + $0x30] sm:$0xff] }
 0x22f   : > { %v1553_v21 = vsel %vm1541_vm9, %v1536_v8, %v1368_v46  ;;  %v2056_v26 = vrot.slane %v1973_v52, 7  ;;  %v1979_v52 = vld [vmem:[#allocation2 + $0x60] sm:$0xff] }
 0x231   : > { %v1418_v17 = vpop.permute.xlu1 %1417  ;;  %v1274_v60 = vpop.permute.xlu0 %1273 }
 0x235   : > { %v1178_v19 = vpop.permute.xlu1 %1177  ;;  %v1088_v57 = vpop.permute.xlu0 %1087 }
 0x236   : > { %v1486_v34 = vsel %vm1473_vm5, %v1469_v43, %v1178_v19  ;;  %v1456_v16 = vsel %vm736_vm0, %v4148_v11, %v1088_v57  ;;  %v1969_v43 = vld [vmem:[#allocation2 + $0x8] sm:$0xff] }
 0x237   : > { %v1503_v32 = vsel %vm1490_vm6, %v1486_v34, %v1226_v56  ;;  %v4371_v34 = vld [vmem:[%s4833_s7 + $0x1] ss:$0 sm:$0xff] }
 0x238   : > { %v1520_v24 = vsel %vm1507_vm7, %v1503_v32, %v1274_v60  ;;  %v1970_v60 = vld [vmem:[#allocation2 + $0x18] sm:$0xff]  ;;  %v2204_v32 = vmul.f32 %v4364_v14, %v1969_v43 }
 0x239   : > { %v1416_v58 = vpop.permute.xlu1 %1415  ;;  %v1372_v10 = vpop.permute.xlu0 %1371  ;;  %v1537_v1 = vsel %vm1524_vm8, %v1520_v24, %v1322_v45  ;;  %v2053_v30 = vrot.slane %v1970_v60, 7 }
 0x23a   : > { %v1570_v35 = vsel %vm1558_vm10, %v1553_v21, %v1416_v58  ;;  %v1554_v55 = vsel %vm1541_vm9, %v1537_v1, %v1370_v47  ;;  %v4377_v58 = vld [vmem:[%s4834_s8] ss:$0 sm:$0xff] }
 0x23b   : > { %3159 = vmatmul.mubr.msk.f32.gmra.mxu1 %vm1587_vm11, %v1570_v35  ;;  %3193 = vmatmul.mubr.msk.f32.gmra.mxu0 %vm1587_vm11, %v1570_v35  ;;  %v1571_v50 = vsel %vm1558_vm10, %v1554_v55, %v1418_v17  ;;  %v1975_v1 = vld [vmem:[#allocation2 + $0x40] sm:$0xff]  ;;  %v2220_v31 = vadd.f32 %v4377_v58, %v2204_v32 }
 0x23c   : > { %3161 = vmatprep.mubr.msk.f32.mxu1 %vm1587_vm11, %v1571_v50  ;;  %3195 = vmatprep.mubr.msk.f32.mxu0 %vm1587_vm11, %v1571_v50 }
 0x23d   : > { %v1230_v44 = vpop.permute.xlu1 %1229  ;;  %v1184_v36 = vpop.permute.xlu0 %1183 }
 0x241   : > { %v1280_v3 = vpop.permute.xlu1 %1279  ;;  %v1326_v53 = vpop.permute.xlu0 %1325 }
 0x245   : > { %v1182_v46 = vpop.permute.xlu1 %1181  ;;  %v1136_v47 = vpop.permute.xlu0 %1135 }
 0x246   : > { %v1472_v22 = vsel %vm542_vm1, %v1456_v16, %v1136_v47  ;;  %v1488_v9 = vsel %vm1473_vm5, %v1471_v39, %v1182_v46 }
 0x247   : > { %v1489_v20 = vsel %vm1473_vm5, %v1472_v22, %v1184_v36  ;;  %v1505_v2 = vsel %vm1490_vm6, %v1488_v9, %v1230_v44  ;;  %v1972_v44 = vld [vmem:[#allocation2 + $0x28] sm:$0xff] }
 0x248   : > { %v1506_v33 = vsel %vm1490_vm6, %v1489_v20, %v1232_v38  ;;  %v2134_v46 = vrot.slane %v1972_v44, 1  ;;  %v1976_v9 = vld [vmem:[#allocation2 + $0x48] sm:$0xff] }
 0x249   : > { %v1278_v12 = vpop.permute.xlu1 %1277  ;;  %v1324_v11 = vpop.permute.xlu0 %1323  ;;  %v1523_v23 = vsel %vm1507_vm7, %v1506_v33, %v1280_v3 }
 0x24a   : > { %v1538_v37 = vsel %vm1524_vm8, %v1521_v27, %v1324_v11  ;;  %v1522_v28 = vsel %vm1507_vm7, %v1505_v2, %v1278_v12  ;;  %v1540_v38 = vsel %vm1524_vm8, %v1523_v23, %v4885_v4  ;;  %v1978_v27 = vld [vmem:[#allocation2 + $0x58] sm:$0xff]  ;;  %v4406_v23 = vld [vmem:[%s4833_s7 + $0x4] ss:$0 sm:$0xff] }
 0x24b   : > { %v1555_v18 = vsel %vm1541_vm9, %v1538_v37, %v1372_v10  ;;  %v1539_v29 = vsel %vm1524_vm8, %v1522_v28, %v1326_v53  ;;  %v1557_v25 = vsel %vm1541_vm9, %v1540_v38, %v4886_v49  ;;  %v2137_v53 = vrot.slane %v1975_v1, 1 }
 0x24c   : > { %v1556_v5 = vsel %vm1541_vm9, %v1539_v29, %v4287_v62  ;;  %v4355_v62 = vld [vmem:[%s4832_s6] ss:$0 sm:$0xff]  ;;  %v2059_v37 = vrot.slane %v1976_v9, 7 }
 0x24d   : > { %v1420_v63 = vpop.permute.xlu0 %1419  ;;  %v1424_v48 = vpop.permute.xlu1 %1423 }
 0x24e   : > { %v1572_v54 = vsel %vm1558_vm10, %v1555_v18, %v1420_v63  ;;  %v1574_v7 = vsel %vm1558_vm10, %v1557_v25, %v1424_v48  ;;  %v2140_v63 = vrot.slane %v1978_v27, 1 }
 0x24f   : > { %3162 = vmatmul.mubr.msk.f32.gmra.mxu1 %vm1587_vm11, %v1572_v54  ;;  %3196 = vmatmul.mubr.msk.f32.gmra.mxu0 %vm1587_vm11, %v1572_v54 }
 0x251   : > { %v1422_v42 = vpop.permute.xlu0 %1421 }
 0x252   : > { %v1573_v56 = vsel %vm1558_vm10, %v1556_v5, %v1422_v42 }
 0x253   : > { %3164 = vmatprep.mubr.msk.f32.mxu1 %vm1587_vm11, %v1573_v56  ;;  %3198 = vmatprep.mubr.msk.f32.mxu0 %vm1587_vm11, %v1573_v56 }
 0x254   : > { %3165 = vmatmul.mubr.msk.f32.gmra.mxu1 %vm1587_vm11, %v1574_v7  ;;  %3199 = vmatmul.mubr.msk.f32.gmra.mxu0 %vm1587_vm11, %v1574_v7 }
 0x26c   : > { %v3179_v15 = vpop.f32.mrf.mxu0 }
 0x26d   : > { %v1872_v0 = vadd.f32 %v3179_v15, %v4355_v62 }
 0x26e   : > { %v1866_v61 = vpop.f32.mrf.mxu0 }
 0x26f   : > { %1954 = vst.msk [vmem:[#allocation2 + $0x38] sm:$0xff] %vm736_vm0, %v1872_v0  ;;  %v1867_v45 = vadd.f32 %v4355_v62, %v1866_v61 }
 0x271   : > { %1953 = vst.msk [vmem:[#allocation2 + $0x20] sm:$0xff] %vm736_vm0, %v1867_v45 }
 0x276   : > { %v1974_v40 = vld [vmem:[#allocation2 + $0x38] sm:$0xff] }
 0x277   : > { %v2057_v41 = vrot.slane %v1974_v40, 7  ;;  %v2136_v3 = vrot.slane %v1974_v40, 1  ;;  %v2285_v47 = vmul.f32 %v4390_v6, %v1974_v40  ;;  %v2206_v29 = vmul.f32 %v4364_v14, %v1974_v40 }
 0x278   : > { %v1971_v17 = vld [vmem:[#allocation2 + $0x20] sm:$0xff]  ;;  %v2364_v7 = vmul.f32 %v4406_v23, %v1974_v40 }
 0x279   : > { %v2054_v19 = vrot.slane %v1971_v17, 7  ;;  %v2205_v57 = vmul.f32 %v4364_v14, %v1971_v17  ;;  %v2058_v8 = vsel %vm891_vm3, %v2056_v26, %v2057_v41  ;;  %v2133_v16 = vrot.slane %v1971_v17, 1 }
 0x27a   : > { %v2245_v55 = vmul.f32 %v4371_v34, %v2058_v8  ;;  %v2138_v22 = vsel %vm972_vm2, %v2136_v3, %v2137_v53  ;;  %v2284_v12 = vmul.f32 %v4390_v6, %v1971_v17  ;;  %v2222_v25 = vadd.f32 %v4377_v58, %v2206_v29  ;;  %v1985_v53 = vld [vmem:[#allocation2 + $0x90] sm:$0xff] }
 0x27b   : > { %v2055_v21 = vsel %vm891_vm3, %v2053_v30, %v2054_v19  ;;  %v2221_v35 = vadd.f32 %v4377_v58, %v2205_v57  ;;  %v2135_v33 = vsel %vm972_vm2, %v2133_v16, %v2134_v46  ;;  %v2325_v11 = vmul.f32 %v4398_v13, %v2138_v22  ;;  %v1987_v46 = vld [vmem:[#allocation2 + $0xa0] sm:$0xff] }
 0x27c   : > { %v2244_v51 = vmul.f32 %v4371_v34, %v2055_v21  ;;  %v2324_v18 = vmul.f32 %v4398_v13, %v2135_v33  ;;  %v2062_v41 = vrot.slane %v1979_v52, 7  ;;  %v1981_v21 = vld [vmem:[#allocation2 + $0x70] sm:$0xff]  ;;  %v2591_v33 = vld [vmem:[%s4835_s9 + $0x8] sm:$0xff] }
 0x27d   : > { %v2261_v59 = vadd.f32 %v2245_v55, %v2221_v35  ;;  %3229 = vmatprep.subr.mxu1 %v2591_v33  ;;  %3201 = vmatprep.subr.mxu0 %v2591_v33 }
 0x27e   : > { %v2260_v39 = vadd.f32 %v2244_v51, %v2220_v31  ;;  %3231 = vmatpush3.msra.mxu1 %v2591_v33  ;;  %3202 = vmatpush3.msra.mxu0 %v2591_v33 }
 0x27f   : > { %v2301_v20 = vadd.f32 %v2285_v47, %v2261_v59  ;;  %v1982_v47 = vld [vmem:[#allocation2 + $0x78] sm:$0xff] }
 0x280   : > { %v2300_v2 = vadd.f32 %v2284_v12, %v2260_v39  ;;  %v1984_v39 = vld [vmem:[#allocation2 + $0x88] sm:$0xff]  ;;  %v2590_v12 = vld [vmem:[%s4835_s9] sm:$0xff]  ;;  %v2065_v29 = vrot.slane %v1982_v47, 7 }
 0x281   : > { %v2341_v54 = vadd.f32 %v2325_v11, %v2301_v20  ;;  %v1991_v20 = vld [vmem:[#allocation2 + $0xc0] sm:$0xff]  ;;  %v2068_v11 = vrot.slane %v1985_v53, 7  ;;  %3230 = vmatprep.subr.mxu1 %v2590_v12  ;;  %3203 = vmatprep.subr.mxu0 %v2590_v12 }
 0x282   : > { %v2340_v42 = vadd.f32 %v2324_v18, %v2300_v2  ;;  %v1993_v2 = vld [vmem:[#allocation2 + $0xd0] sm:$0xff]  ;;  %3232 = vmatpush3.msra.mxu1 %v2590_v12  ;;  %3204 = vmatpush3.msra.mxu0 %v2590_v12 }
 0x284   : > { %v2380_v17 = vadd.f32 %v2364_v7, %v2340_v42 }
 0x28c   : > { %v3182_v24 = vpop.f32.mrf.mxu0 }
 0x28d   : > { %v1882_v10 = vadd.f32 %v3182_v24, %v4355_v62 }
 0x28e   : > { %v1876_v50 = vpop.f32.mrf.mxu0 }
 0x28f   : > { %1956 = vst.msk [vmem:[#allocation2 + $0x68] sm:$0xff] %vm736_vm0, %v1882_v10  ;;  %v1877_v36 = vadd.f32 %v4355_v62, %v1876_v50 }
 0x291   : > { %1955 = vst.msk [vmem:[#allocation2 + $0x50] sm:$0xff] %vm736_vm0, %v1877_v36  ;;  %v2143_v36 = vrot.slane %v1981_v21, 1 }
 0x296   : > { %v1980_v0 = vld [vmem:[#allocation2 + $0x68] sm:$0xff] }
 0x297   : > { %v2063_v43 = vrot.slane %v1980_v0, 7  ;;  %v2366_v19 = vmul.f32 %v4406_v23, %v1980_v0  ;;  %v2142_v44 = vrot.slane %v1980_v0, 1  ;;  %v2287_v16 = vmul.f32 %v4390_v6, %v1980_v0 }
 0x298   : > { %v1977_v28 = vld [vmem:[#allocation2 + $0x50] sm:$0xff]  ;;  %v2208_v9 = vmul.f32 %v4364_v14, %v1980_v0 }
 0x299   : > { %v2365_v4 = vmul.f32 %v4406_v23, %v1977_v28  ;;  %v2060_v38 = vrot.slane %v1977_v28, 7  ;;  %v2139_v48 = vrot.slane %v1977_v28, 1  ;;  %v2286_v45 = vmul.f32 %v4390_v6, %v1977_v28 }
 0x29a   : > { %v2207_v40 = vmul.f32 %v4364_v14, %v1977_v28  ;;  %v2064_v8 = vsel %vm891_vm3, %v2062_v41, %v2063_v43  ;;  %v2144_v22 = vsel %vm972_vm2, %v2142_v44, %v2143_v36  ;;  %v4443_v28 = vld [vmem:[#allocation2 + $0xb8] sm:$0xff] }
 0x29b   : > { %v2381_v5 = vadd.f32 %v2365_v4, %v2341_v54  ;;  %v2061_v49 = vsel %vm891_vm3, %v2059_v37, %v2060_v38  ;;  %v2141_v15 = vsel %vm972_vm2, %v2139_v48, %v2140_v63  ;;  %v2247_v1 = vmul.f32 %v4371_v34, %v2064_v8  ;;  %v1988_v37 = vld [vmem:[#allocation2 + $0xa8] sm:$0xff] }
 0x29c   : > { %v2246_v56 = vmul.f32 %v4371_v34, %v2061_v49  ;;  %v2326_v26 = vmul.f32 %v4398_v13, %v2141_v15  ;;  %v2223_v10 = vadd.f32 %v4377_v58, %v2207_v40  ;;  %v2149_v63 = vrot.slane %v1987_v46, 1 }
 0x29d   : > { %2415 = vrot.lane.b32.xlu0 %v2381_v5, %s4872_s27  ;;  %v2146_v54 = vrot.slane %v1984_v39, 1  ;;  %v2327_v4 = vmul.f32 %v4398_v13, %v2144_v22  ;;  %v2074_v5 = vrot.slane %v1991_v20, 7  ;;  %v2224_v49 = vadd.f32 %v4377_v58, %v2208_v9  ;;  %v1994_v20 = vld [vmem:[#allocation2 + $0xe0] sm:$0xff] }
 0x29e   : > { %v2262_v61 = vadd.f32 %v2246_v56, %v2222_v25  ;;  %v2263_v51 = vadd.f32 %v2247_v1, %v2223_v10  ;;  %v2155_v25 = vrot.slane %v1993_v2, 1  ;;  %v2071_v56 = vrot.slane %v1988_v37, 7 }
 0x29f   : > { %v2152_v7 = vrot.slane %v4443_v28, 1 }
 0x2a0   : > { %v2302_v60 = vadd.f32 %v2286_v45, %v2262_v61  ;;  %v2303_v27 = vadd.f32 %v2287_v16, %v2263_v51 }
 0x2a1   : > { %2413 = vrot.lane.b32.xlu0 %v2380_v17, %s4872_s27 }
 0x2a2   : > { %v2342_v30 = vadd.f32 %v2326_v26, %v2302_v60  ;;  %v2343_v15 = vadd.f32 %v2327_v4, %v2303_v27 }
 0x2a4   : > { %v2382_v57 = vadd.f32 %v2366_v19, %v2342_v30 }
 0x2a6   : > { %2417 = vrot.lane.b32.xlu0 %v2382_v57, %s4872_s27 }
 0x2a7   : > { %v3185_v32 = vpop.f32.mrf.mxu0 }
 0x2a8   : > { %v1892_v24 = vadd.f32 %v3185_v32, %v4355_v62 }
 0x2a9   : > { %v1886_v35 = vpop.f32.mrf.mxu0 }
 0x2aa   : > { %1958 = vst.msk [vmem:[#allocation2 + $0x98] sm:$0xff] %vm736_vm0, %v1892_v24  ;;  %v1887_v55 = vadd.f32 %v4355_v62, %v1886_v35 }
 0x2ab   : > { %v3188_v50 = vpop.f32.mrf.mxu0 }
 0x2ac   : > { %1957 = vst.msk [vmem:[#allocation2 + $0x80] sm:$0xff] %vm736_vm0, %v1887_v55  ;;  %v1902_v31 = vadd.f32 %v3188_v50, %v4355_v62 }
 0x2ad   : > { %v1896_v3 = vpop.f32.mrf.mxu0 }
 0x2ae   : > { %1960 = vst.msk [vmem:[#allocation2 + $0xc8] sm:$0xff] %vm736_vm0, %v1902_v31  ;;  %v1897_v59 = vadd.f32 %v4355_v62, %v1896_v3 }
 0x2b0   : > { %1959 = vst.msk [vmem:[#allocation2 + $0xb0] sm:$0xff] %vm736_vm0, %v1897_v59 }
 0x2b1   : > { %v1986_v18 = vld [vmem:[#allocation2 + $0x98] sm:$0xff] }
 0x2b2   : > { %v2069_v38 = vrot.slane %v1986_v18, 7  ;;  %v2148_v48 = vrot.slane %v1986_v18, 1  ;;  %v2289_v19 = vmul.f32 %v4390_v6, %v1986_v18  ;;  %v2210_v21 = vmul.f32 %v4364_v14, %v1986_v18 }
 0x2b3   : > { %v1983_v42 = vld [vmem:[#allocation2 + $0x80] sm:$0xff]  ;;  %v2368_v27 = vmul.f32 %v4406_v23, %v1986_v18 }
 0x2b4   : > { %v2367_v0 = vmul.f32 %v4406_v23, %v1983_v42  ;;  %v2070_v61 = vsel %vm891_vm3, %v2068_v11, %v2069_v38  ;;  %v2209_v45 = vmul.f32 %v4364_v14, %v1983_v42  ;;  %v2150_v52 = vsel %vm972_vm2, %v2148_v48, %v2149_v63 }
 0x2b5   : > { %v2249_v17 = vmul.f32 %v4371_v34, %v2070_v61  ;;  %v2066_v60 = vrot.slane %v1983_v42, 7  ;;  %v2145_v26 = vrot.slane %v1983_v42, 1  ;;  %v1992_v41 = vld [vmem:[#allocation2 + $0xc8] sm:$0xff]  ;;  %v2329_v1 = vmul.f32 %v4398_v13, %v2150_v52 }
 0x2b6   : > { %v2383_v43 = vadd.f32 %v2367_v0, %v2343_v15  ;;  %v2225_v30 = vadd.f32 %v4377_v58, %v2209_v45  ;;  %v2075_v57 = vrot.slane %v1992_v41, 7  ;;  %v2154_v24 = vrot.slane %v1992_v41, 1 }
 0x2b7   : > { %v1989_v40 = vld [vmem:[#allocation2 + $0xb0] sm:$0xff]  ;;  %v2067_v8 = vsel %vm891_vm3, %v2065_v29, %v2066_v60  ;;  %v2147_v32 = vsel %vm972_vm2, %v2145_v26, %v2146_v54  ;;  %v2288_v55 = vmul.f32 %v4390_v6, %v1983_v42  ;;  %v2226_v33 = vadd.f32 %v4377_v58, %v2210_v21  ;;  %v4488_v60 = vpop.permute.xlu0 %2465  ;;  %v1996_v26 = vld [vmem:[#allocation2 + $0x108] sm:$0xff] }
 0x2b8   : > { %2419 = vrot.lane.b32.xlu1 %v2383_v43, %s4872_s27  ;;  %v2265_v10 = vadd.f32 %v2249_v17, %v2225_v30  ;;  %v2248_v35 = vmul.f32 %v4371_v34, %v2067_v8  ;;  %v2369_v50 = vmul.f32 %v4406_v23, %v1989_v40  ;;  %v2076_v44 = vsel %vm891_vm3, %v2074_v5, %v2075_v57  ;;  %v1995_v17 = vld [vmem:[#allocation2 + $0xf8] sm:$0xff] }
 0x2b9   : > { %v2211_v36 = vmul.f32 %v4364_v14, %v1989_v40  ;;  %v2072_v31 = vrot.slane %v1989_v40, 7  ;;  %v2328_v53 = vmul.f32 %v4398_v13, %v2147_v32  ;;  %v2251_v59 = vmul.f32 %v4371_v34, %v2076_v44 }
 0x2ba   : > { %v2305_v51 = vadd.f32 %v2289_v19, %v2265_v10  ;;  %v2264_v3 = vadd.f32 %v2248_v35, %v2224_v49  ;;  %v2156_v16 = vsel %vm972_vm2, %v2154_v24, %v2155_v25  ;;  %v2151_v39 = vrot.slane %v1989_v40, 1 }
 0x2bb   : > { %v2227_v46 = vadd.f32 %v4377_v58, %v2211_v36  ;;  %v2073_v47 = vsel %vm891_vm3, %v2071_v56, %v2072_v31  ;;  %v2291_v2 = vmul.f32 %v4390_v6, %v1992_v41  ;;  %v2290_v54 = vmul.f32 %v4390_v6, %v1989_v40  ;;  %v4491_v32 = vpop.permute.xlu0 %2469 }
 0x2bc   : > { %v2345_v22 = vadd.f32 %v2329_v1, %v2305_v51  ;;  %v2304_v9 = vadd.f32 %v2288_v55, %v2264_v3  ;;  %v2250_v12 = vmul.f32 %v4371_v34, %v2073_v47  ;;  %v2153_v37 = vsel %vm972_vm2, %v2151_v39, %v2152_v7  ;;  %v1999_v1 = vld [vmem:[#allocation2 + $0x120] sm:$0xff] }
 0x2bd   : > { %v2267_v11 = vadd.f32 %v2251_v59, %v2227_v46  ;;  %v2331_v38 = vmul.f32 %v4398_v13, %v2156_v16  ;;  %v2371_v48 = vmul.f32 %v4406_v23, %v1994_v20  ;;  %v2330_v18 = vmul.f32 %v4398_v13, %v2153_v37  ;;  %v2001_v20 = vld [vmem:[#allocation2 + $0x130] sm:$0xff] }
 0x2be   : > { %v2385_v28 = vadd.f32 %v2369_v50, %v2345_v22  ;;  %v2344_v63 = vadd.f32 %v2328_v53, %v2304_v9  ;;  %v2266_v29 = vadd.f32 %v2250_v12, %v2226_v33  ;;  %v2370_v56 = vmul.f32 %v4406_v23, %v1992_v41  ;;  %v1998_v41 = vld [vmem:[#allocation2 + $0x118] sm:$0xff] }
 0x2bf   : > { %v2307_v4 = vadd.f32 %v2291_v2, %v2267_v11  ;;  %v2212_v43 = vmul.f32 %v4364_v14, %v1995_v17  ;;  %v2077_v30 = vrot.slane %v1996_v26, 7  ;;  %v2158_v8 = vrot.slane %v1998_v41, 1  ;;  %v4499_v53 = vpop.permute.xlu0 %2473 }
 0x2c0   : > { %2423 = vrot.lane.b32.xlu1 %v2385_v28, %s4872_s27  ;;  %v2384_v5 = vadd.f32 %v2368_v27, %v2344_v63  ;;  %v2306_v42 = vadd.f32 %v2290_v54, %v2266_v29  ;;  %v2080_v36 = vrot.slane %v1999_v1, 7  ;;  %v2161_v28 = vrot.slane %v2001_v20, 1 }
 0x2c1   : > { %v2347_v49 = vadd.f32 %v2331_v38, %v2307_v4  ;;  %v2228_v24 = vadd.f32 %v4377_v58, %v2212_v43  ;;  %v2002_v38 = vld [vmem:[#allocation2 + $0x138] sm:$0xff] }
 0x2c2   : > { %2421 = vrot.lane.b32.xlu0 %v2384_v5, %s4872_s27  ;;  %v2346_v25 = vadd.f32 %v2330_v18, %v2306_v42  ;;  %v2004_v5 = vld [vmem:[#allocation2 + $0x148] sm:$0xff]  ;;  %v4518_v18 = vpop.permute.xlu1 %2467 }
 0x2c3   : > { %v2387_v7 = vadd.f32 %v2371_v48, %v2347_v49  ;;  %v4508_v11 = vpop.permute.xlu0 %2477 }
 0x2c4   : > { %v2386_v15 = vadd.f32 %v2370_v56, %v2346_v25  ;;  %v2083_v25 = vrot.slane %v2002_v38, 7  ;;  %v2005_v56 = vld [vmem:[#allocation2 + $0x150] sm:$0xff] }
 0x2c5   : > { %2427 = vrot.lane.b32.xlu1 %v2387_v7, %s4872_s27  ;;  %v2086_v41 = vrot.slane %v2005_v56, 7 }
 0x2c6   : > { %2425 = vrot.lane.b32.xlu0 %v2386_v15, %s4872_s27  ;;  %v2164_v15 = vrot.slane %v2004_v5, 1 }
 0x2c7   : > { %v4514_v54 = vpop.permute.xlu0 %2481 }
 0x2cb   : > { %v4524_v26 = vpop.permute.xlu0 %2485 }
 0x2e3   : > { %v3191_v0 = vpop.f32.mrf.mxu0 }
 0x2e4   : > { %v1912_v61 = vadd.f32 %v3191_v0, %v4355_v62 }
 0x2e5   : > { %v1906_v45 = vpop.f32.mrf.mxu0 }
 0x2e6   : > { %1962 = vst.msk [vmem:[#allocation2 + $0x128] sm:$0xff] %vm736_vm0, %v1912_v61  ;;  %v1907_v52 = vadd.f32 %v4355_v62, %v1906_v45 }
 0x2e8   : > { %1961 = vst.msk [vmem:[#allocation2 + $0x110] sm:$0xff] %vm736_vm0, %v1907_v52 }
 0x2ed   : > { %v2000_v21 = vld [vmem:[#allocation2 + $0x128] sm:$0xff] }
 0x2ee   : > { %v2081_v31 = vrot.slane %v2000_v21, 7  ;;  %v2372_v46 = vmul.f32 %v4406_v23, %v2000_v21  ;;  %v2160_v37 = vrot.slane %v2000_v21, 1  ;;  %v2293_v29 = vmul.f32 %v4390_v6, %v2000_v21 }
 0x2ef   : > { %v1997_v19 = vld [vmem:[#allocation2 + $0x110] sm:$0xff]  ;;  %v2214_v0 = vmul.f32 %v4364_v14, %v2000_v21 }
 0x2f0   : > { %v2078_v57 = vrot.slane %v1997_v19, 7  ;;  %v2157_v40 = vrot.slane %v1997_v19, 1  ;;  %v2292_v44 = vmul.f32 %v4390_v6, %v1997_v19  ;;  %v2213_v59 = vmul.f32 %v4364_v14, %v1997_v19 }
 0x2f1   : > { %v2082_v47 = vsel %vm891_vm3, %v2080_v36, %v2081_v31  ;;  %v2162_v4 = vsel %vm972_vm2, %v2160_v37, %v2161_v28 }
 0x2f2   : > { %v2079_v10 = vsel %vm891_vm3, %v2077_v30, %v2078_v57  ;;  %v2159_v55 = vsel %vm972_vm2, %v2157_v40, %v2158_v8  ;;  %v2229_v33 = vadd.f32 %v4377_v58, %v2213_v59  ;;  %v2253_v12 = vmul.f32 %v4371_v34, %v2082_v47  ;;  %v3145_v30 = vpop.f32.mrf.mxu1  ;;  %v4531_v40 = vld [vmem:[%s4831_s5] ss:$0 sm:$0xff] }
 0x2f3   : > { %v2252_v35 = vmul.f32 %v4371_v34, %v2079_v10  ;;  %v2332_v3 = vmul.f32 %v4398_v13, %v2159_v55  ;;  %v2333_v42 = vmul.f32 %v4398_v13, %v2162_v4  ;;  %v2230_v8 = vadd.f32 %v4377_v58, %v2214_v0  ;;  %v4537_v10 = vpop.permute.xlu1 %2471  ;;  %v2007_v47 = vld [vmem:[#allocation2 + $0x160] sm:$0xff] }
 0x2f4   : > { %v2269_v63 = vadd.f32 %v2253_v12, %v2229_v33  ;;  %v1706_v36 = vpop.f32.mrf.mxu1  ;;  %v2167_v4 = vrot.slane %v2007_v47, 1 }
 0x2f5   : > { %v2268_v50 = vadd.f32 %v2252_v35, %v2228_v24  ;;  %v1707_v12 = vadd.f32 %v4531_v40, %v1706_v36 }
 0x2f6   : > { %v2309_v48 = vadd.f32 %v2293_v29, %v2269_v63  ;;  %v4544_v59 = vpop.f32.mrf.mxu1 }
 0x2f7   : > { %v2308_v51 = vadd.f32 %v2292_v44, %v2268_v50  ;;  %v1712_v44 = vadd.f32 %v3145_v30, %v4531_v40 }
 0x2f8   : > { %v2349_v61 = vadd.f32 %v2333_v42, %v2309_v48  ;;  %v1716_v38 = vpop.f32.mrf.mxu1 }
 0x2f9   : > { %v2348_v16 = vadd.f32 %v2332_v3, %v2308_v51  ;;  %v1717_v0 = vadd.f32 %v4531_v40, %v1716_v38 }
 0x2fb   : > { %v3194_v39 = vpop.f32.mrf.mxu0  ;;  %v2388_v22 = vadd.f32 %v2372_v46, %v2348_v16 }
 0x2fc   : > { %v1922_v9 = vadd.f32 %v3194_v39, %v4355_v62 }
 0x2fd   : > { %v1916_v27 = vpop.f32.mrf.mxu0  ;;  %2429 = vrot.lane.b32.xlu0 %v2388_v22, %s4872_s27 }
 0x2fe   : > { %1964 = vst.msk [vmem:[#allocation2 + $0x158] sm:$0xff] %vm736_vm0, %v1922_v9  ;;  %v1917_v2 = vadd.f32 %v4355_v62, %v1916_v27 }
 0x300   : > { %1963 = vst.msk [vmem:[#allocation2 + $0x140] sm:$0xff] %vm736_vm0, %v1917_v2  ;;  %v4557_v2 = vpop.permute.xlu1 %2475 }
 0x304   : > { %v4577_v30 = vpop.permute.xlu1 %2479 }
 0x305   : > { %v4520_v49 = vld [vmem:[#allocation2 + $0x158] sm:$0xff] }
 0x306   : > { %v2087_v43 = vrot.slane %v4520_v49, 7  ;;  %v2374_v33 = vmul.f32 %v4406_v23, %v4520_v49  ;;  %v2166_v29 = vrot.slane %v4520_v49, 1 }
 0x307   : > { %v2003_v7 = vld [vmem:[#allocation2 + $0x140] sm:$0xff] }
 0x308   : > { %v2373_v45 = vmul.f32 %v4406_v23, %v2003_v7  ;;  %v2084_v52 = vrot.slane %v2003_v7, 7  ;;  %v2163_v17 = vrot.slane %v2003_v7, 1  ;;  %v2215_v1 = vmul.f32 %v4364_v14, %v2003_v7 }
 0x309   : > { %v2294_v55 = vmul.f32 %v4390_v6, %v2003_v7  ;;  %v2088_v50 = vsel %vm891_vm3, %v2086_v41, %v2087_v43  ;;  %v2295_v7 = vmul.f32 %v4390_v6, %v4520_v49  ;;  %v4575_v41 = vstv %s4549_s22 }
 0x30a   : > { %v2389_v19 = vadd.f32 %v2373_v45, %v2349_v61  ;;  %v2085_v57 = vsel %vm891_vm3, %v2083_v25, %v2084_v52  ;;  %v2165_v21 = vsel %vm972_vm2, %v2163_v17, %v2164_v15  ;;  %v2231_v39 = vadd.f32 %v4377_v58, %v2215_v1  ;;  %v2011_v15 = vld [vmem:[#allocation2 + $0x180] sm:$0xff]  ;;  %v2013_v52 = vld [vmem:[#allocation2 + $0x190] sm:$0xff]  ;;  %v2008_v17 = vld [vmem:[#allocation2 + $0x168] sm:$0xff] }
 0x30b   : > { %v2254_v24 = vmul.f32 %v4371_v34, %v2085_v57  ;;  %v2334_v3 = vmul.f32 %v4398_v13, %v2165_v21  ;;  %v2255_v22 = vmul.f32 %v4371_v34, %v2088_v50  ;;  %v2168_v45 = vsel %vm972_vm2, %v2166_v29, %v2167_v4  ;;  %v2010_v57 = vld [vmem:[#allocation2 + $0x178] sm:$0xff]  ;;  %v2017_v21 = vld [vmem:[#allocation2 + $0x1b0] sm:$0xff]  ;;  %v4581_v1 = vld [vmem:[#allocation2 + $0x1c0] sm:$0xff] }
 0x30c   : > { %2431 = vrot.lane.b32.xlu1 %v2389_v19, %s4872_s27  ;;  %v2173_v50 = vrot.slane %v2013_v52, 1 }
 0x30d   : > { %v2270_v35 = vadd.f32 %v2254_v24, %v2230_v8  ;;  %v2271_v42 = vadd.f32 %v2255_v22, %v2231_v39  ;;  %v2092_v24 = vrot.slane %v2011_v15, 7  ;;  %v2216_v39 = vmul.f32 %v4364_v14, %v4520_v49 }
 0x30e   : > { %v2098_v22 = vrot.slane %v2017_v21, 7 }
 0x30f   : > { %v2416_v31 = vpop.permute.xlu0 %2415  ;;  %v2310_v51 = vadd.f32 %v2294_v55, %v2270_v35  ;;  %v3197_v46 = vpop.f32.mrf.mxu0  ;;  %v2311_v19 = vadd.f32 %v2295_v7, %v2271_v42  ;;  %v2335_v35 = vmul.f32 %v4398_v13, %v2168_v45 }
 0x310   : > { %v4547_v16 = vsel %vm736_vm0, %v1712_v44, %v2416_v31  ;;  %v1932_v9 = vadd.f32 %v3197_v46, %v4355_v62  ;;  %v2089_v44 = vrot.slane %v2008_v17, 7 }
 0x311   : > { %v2350_v20 = vadd.f32 %v2334_v3, %v2310_v51  ;;  %v1926_v27 = vpop.f32.mrf.mxu0  ;;  %v2170_v51 = vrot.slane %v2010_v57, 1  ;;  %v2014_v3 = vld [vmem:[#allocation2 + $0x198] sm:$0xff]  ;;  %v2351_v47 = vadd.f32 %v2335_v35, %v2311_v19 }
 0x312   : > { %1966 = vst.msk [vmem:[#allocation2 + $0x188] sm:$0xff] %vm736_vm0, %v1932_v9  ;;  %v1927_v37 = vadd.f32 %v4355_v62, %v1926_v27  ;;  %v2179_v9 = vrot.slane %v4581_v1, 1  ;;  %v2095_v4 = vrot.slane %v2014_v3, 7 }
 0x313   : > { %v2414_v28 = vpop.permute.xlu0 %2413  ;;  %v2390_v63 = vadd.f32 %v2374_v33, %v2350_v20 }
 0x314   : > { %v4563_v48 = vsel %vm736_vm0, %v1707_v12, %v2414_v28  ;;  %v3200_v5 = vpop.f32.mrf.mxu0  ;;  %1965 = vst.msk [vmem:[#allocation2 + $0x170] sm:$0xff] %vm736_vm0, %v1927_v37  ;;  %v4595_v37 = vpop.permute.xlu1 %2483 }
 0x315   : > { %v1942_v25 = vadd.f32 %v3200_v5, %v4355_v62  ;;  %2433 = vrot.lane.b32.xlu0 %v2390_v63, %s4872_s27 }
 0x316   : > { %v1936_v56 = vpop.f32.mrf.mxu0 }
 0x317   : > { %1968 = vst.msk [vmem:[#allocation2 + $0x1b8] sm:$0xff] %vm736_vm0, %v1942_v25  ;;  %v1937_v61 = vadd.f32 %v4355_v62, %v1936_v56 }
 0x318   : > { %v2418_v43 = vpop.permute.xlu0 %2417 }
 0x319   : > { %1967 = vst.msk [vmem:[#allocation2 + $0x1a0] sm:$0xff] %vm736_vm0, %v1937_v61  ;;  %v2511_v8 = vsel %vm736_vm0, %v1717_v0, %v2418_v43  ;;  %v2012_v55 = vld [vmem:[#allocation2 + $0x188] sm:$0xff]  ;;  %v2232_v61 = vadd.f32 %v4377_v58, %v2216_v39 }
 0x31a   : > { %v2527_v62 = vsel %vm542_vm1, %v2511_v8, %v4488_v60  ;;  %v2093_v31 = vrot.slane %v2012_v55, 7  ;;  %v4590_v60 = vld [vmem:[#allocation2 + $0x1a8] sm:$0xff]  ;;  %v2172_v27 = vrot.slane %v2012_v55, 1  ;;  %v2297_v15 = vmul.f32 %v4390_v6, %v2012_v55 }
 0x31b   : > { %v2560_v36 = vmul.f32 %v4575_v41, %v2527_v62  ;;  %vm2543_vm12 = vcmp.ge.f32.partialorder %v2527_v62, 0.0  ;;  %v2009_v46 = vld [vmem:[#allocation2 + $0x170] sm:$0xff]  ;;  %v2176_v25 = vrot.slane %v4590_v60, 1  ;;  %v2218_v43 = vmul.f32 %v4364_v14, %v2012_v55 }
 0x31c   : > { %v2375_v33 = vmul.f32 %v4406_v23, %v2009_v46  ;;  %v2094_v12 = vsel %vm891_vm3, %v2092_v24, %v2093_v31  ;;  %v2217_v28 = vmul.f32 %v4364_v14, %v2009_v46  ;;  %v2090_v49 = vrot.slane %v2009_v46, 7 }
 0x31d   : > { %v2576_v20 = vsel %vm2543_vm12, %v2527_v62, %v2560_v36  ;;  %v2257_v63 = vmul.f32 %v4371_v34, %v2094_v12  ;;  %v2169_v5 = vrot.slane %v2009_v46, 1  ;;  %v2174_v45 = vsel %vm972_vm2, %v2172_v27, %v2173_v50  ;;  %v4617_v50 = vpop.permute.xlu1 %2487 }
 0x31e   : > { %3208 = vmatprep.mubr.msk.f32.mxu1 %vm1490_vm6, %v2576_v20  ;;  %v4599_v29 = vld [vmem:[#allocation2 + $0x1b8] sm:$0xff]  ;;  %v2391_v38 = vadd.f32 %v2375_v33, %v2351_v47  ;;  %v2233_v7 = vadd.f32 %v4377_v58, %v2217_v28  ;;  %v2091_v0 = vsel %vm891_vm3, %v2089_v44, %v2090_v49  ;;  %v2296_v8 = vmul.f32 %v4390_v6, %v2009_v46 }
 0x31f   : > { %v2099_v42 = vrot.slane %v4599_v29, 7  ;;  %v2256_v52 = vmul.f32 %v4371_v34, %v2091_v0  ;;  %v2171_v57 = vsel %vm972_vm2, %v2169_v5, %v2170_v51  ;;  %v2178_v1 = vrot.slane %v4599_v29, 1 }
 0x320   : > { %v2015_v56 = vld [vmem:[#allocation2 + $0x1a0] sm:$0xff]  ;;  %2435 = vrot.lane.b32.xlu1 %v2391_v38, %s4872_s27  ;;  %v2273_v19 = vadd.f32 %v2257_v63, %v2233_v7  ;;  %v2337_v36 = vmul.f32 %v4398_v13, %v2174_v45  ;;  %v2299_v51 = vmul.f32 %v4390_v6, %v4599_v29  ;;  %v2234_v60 = vadd.f32 %v4377_v58, %v2218_v43  ;;  %v3151_v63 = vpop.f32.mrf.mxu1  ;;  %v2020_v7 = vld [vmem:[#allocation2 + $0x1d0] sm:$0xff] }
 0x321   : > { %v2100_v17 = vsel %vm891_vm3, %v2098_v22, %v2099_v42  ;;  %v2219_v24 = vmul.f32 %v4364_v14, %v2015_v56  ;;  %v2272_v21 = vadd.f32 %v2256_v52, %v2232_v61  ;;  %v2096_v35 = vrot.slane %v2015_v56, 7  ;;  %v4887_v43 = vld [vmem:[#allocation9_spill] sm:$0xff] }
 0x322   : > { %v2259_v62 = vmul.f32 %v4371_v34, %v2100_v17  ;;  %v2313_v44 = vadd.f32 %v2297_v15, %v2273_v19  ;;  %v2377_v3 = vmul.f32 %v4406_v23, %v2015_v56  ;;  %v2336_v14 = vmul.f32 %v4398_v13, %v2171_v57  ;;  %v1726_v0 = vpop.f32.mrf.mxu1  ;;  %v4888_v19 = vld [vmem:[#allocation7_spill] sm:$0xff] }
 0x323   : > { %v2235_v31 = vadd.f32 %v4377_v58, %v2219_v24  ;;  %v2312_v46 = vadd.f32 %v2296_v8, %v2272_v21  ;;  %v2097_v47 = vsel %vm891_vm3, %v2095_v4, %v2096_v35  ;;  %v2376_v12 = vmul.f32 %v4406_v23, %v2012_v55 }
 0x324   : > { %v2353_v39 = vadd.f32 %v2337_v36, %v2313_v44  ;;  %v2258_v20 = vmul.f32 %v4371_v34, %v2097_v47  ;;  %v2180_v27 = vsel %vm972_vm2, %v2178_v1, %v2179_v9  ;;  %v2175_v28 = vrot.slane %v2015_v56, 1 }
 0x325   : > { %v2275_v22 = vadd.f32 %v2259_v62, %v2235_v31  ;;  %v2352_v33 = vadd.f32 %v2336_v14, %v2312_v46  ;;  %v1722_v42 = vadd.f32 %v4544_v59, %v4531_v40  ;;  %v2339_v34 = vmul.f32 %v4398_v13, %v2180_v27 }
 0x326   : > { %v2393_v49 = vadd.f32 %v2377_v3, %v2353_v39  ;;  %v2274_v5 = vadd.f32 %v2258_v20, %v2234_v60  ;;  %v2298_v15 = vmul.f32 %v4390_v6, %v2015_v56  ;;  %v2177_v9 = vsel %vm972_vm2, %v2175_v28, %v2176_v25  ;;  %v3154_v25 = vpop.f32.mrf.mxu1 }
 0x327   : > { %v2315_v38 = vadd.f32 %v2299_v51, %v2275_v22  ;;  %v2392_v4 = vadd.f32 %v2376_v12, %v2352_v33  ;;  %v2379_v45 = vmul.f32 %v4406_v23, %v2020_v7  ;;  %v2338_v6 = vmul.f32 %v4398_v13, %v2177_v9  ;;  %v4889_v13 = vld [vmem:[#allocation8_spill] sm:$0xff]  ;;  %v4890_v12 = vld [vmem:[#allocation10_spill] sm:$0xff] }
 0x328   : > { %2439 = vrot.lane.b32.xlu1 %v2393_v49, %s4872_s27  ;;  %v2314_v52 = vadd.f32 %v2298_v15, %v2274_v5  ;;  %v1732_v8 = vadd.f32 %v3151_v63, %v4531_v40  ;;  %v2378_v21 = vmul.f32 %v4406_v23, %v4599_v29  ;;  %v1727_v1 = vadd.f32 %v4531_v40, %v1726_v0  ;;  %v1736_v35 = vpop.f32.mrf.mxu1 }
 0x329   : > { %2437 = vrot.lane.b32.xlu0 %v2392_v4, %s4872_s27  ;;  %v2355_v59 = vadd.f32 %v2339_v34, %v2315_v38  ;;  %v1742_v3 = vadd.f32 %v3154_v25, %v4531_v40  ;;  %v1737_v29 = vadd.f32 %v4531_v40, %v1736_v35 }
 0x32a   : > { %v2420_v58 = vpop.permute.xlu1 %2419  ;;  %v3157_v49 = vpop.f32.mrf.mxu1 }
 0x32b   : > { %v2512_v55 = vsel %vm736_vm0, %v1722_v42, %v2420_v58  ;;  %v2395_v57 = vadd.f32 %v2379_v45, %v2355_v59  ;;  %v1752_v34 = vadd.f32 %v3157_v49, %v4531_v40 }
 0x32c   : > { %v2528_v61 = vsel %vm542_vm1, %v2512_v55, %v4518_v18  ;;  %2489 = vrot.lane.b32.xlu1 %v4887_v43, %s4875_s20  ;;  %v2354_v18 = vadd.f32 %v2338_v6, %v2314_v52 }
 0x32d   : > { %vm2544_vm13 = vcmp.ge.f32.partialorder %v2528_v61, 0.0  ;;  %v2561_v17 = vmul.f32 %v4575_v41, %v2528_v61  ;;  %2461 = vrot.lane.b32.xlu0 %v4888_v19, %s4875_s20 }
 0x32e   : > { %v2394_v31 = vadd.f32 %v2378_v21, %v2354_v18 }
 0x32f   : > { %v2577_v56 = vsel %vm2544_vm13, %v2528_v61, %v2561_v17 }
 0x330   : > { %3209 = vmatmul.mubr.msk.f32.vlgmr.msra.gmra.mxu1 %vm1490_vm6, %v2577_v56  ;;  %2443 = vrot.lane.b32.xlu1 %v2395_v57, %s4872_s27 }
 0x331   : > { %2463 = vrot.lane.b32.xlu0 %v4889_v13, %s4875_s20 }
 0x332   : > { %v2424_v24 = vpop.permute.xlu1 %2423 }
 0x333   : > { %v2514_v62 = vsel %vm736_vm0, %v1732_v8, %v2424_v24 }
 0x334   : > { %v2530_v44 = vsel %vm542_vm1, %v2514_v62, %v4537_v10  ;;  %v2422_v36 = vpop.permute.xlu0 %2421  ;;  %2441 = vrot.lane.b32.xlu1 %v2394_v31, %s4872_s27  ;;  %s408_s27 = sand.u32 1, %s3335_s24  }
 0x335   : > { %v2513_v51 = vsel %vm736_vm0, %v1727_v1, %v2422_v36  ;;  %v2563_v46 = vmul.f32 %v4575_v41, %v2530_v44  ;;  %vm2546_vm15 = vcmp.ge.f32.partialorder %v2530_v44, 0.0  ;;  %s2889_s19 = sshll.u32 %s408_s27, 7  ;;  %s4785_s11 = scalar_lea.sflag [#allocation5], %s408_s27 }
 0x336   : > { %v2529_v23 = vsel %vm542_vm1, %v2513_v51, %v4491_v32  ;;  %s4740_s16 = scalar_lea.vmem [#allocation4], %s2889_s19  ;;  %s4775_s19 = scalar_lea.hbm %s4838_s12, %s3029_s29 }
 0x337   : > { %v2562_v14 = vmul.f32 %v4575_v41, %v2529_v23  ;;  %v2428_v47 = vpop.permute.xlu1 %2427  ;;  %vm2545_vm14 = vcmp.ge.f32.partialorder %v2529_v23, 0.0  ;;  %v2579_v27 = vsel %vm2546_vm15, %v2530_v44, %v2563_v46  ;;  %s2823_s30 = sshll.u32 %s4740_s16, 4  ;;  %s3287_s29 = sshll.u32 %s3354_s17, 4  ;;  %s4779_s30 = int_to_ptr.vmem [resolvable:$true] %s2823_s30  ;;  %s3288_s29 = int_to_ptr.vmem [resolvable:$false] %s3287_s29 }
 0x338   : > { %v2516_v10 = vsel %vm736_vm0, %v1742_v3, %v2428_v47  ;;  %v2426_v39 = vpop.permute.xlu0 %2425  ;;  %2491 = vrot.lane.b32.xlu1 %v4890_v12, %s4875_s20  ;;  %s3283_s18 = scalar_lea.vmem %s4779_s30, 2048  ;;  %s3289_s21 = scalar_lea.vmem %s3288_s29, 4096 }
 0x339   : > { %v2532_v22 = vsel %vm542_vm1, %v2516_v10, %v4557_v2  ;;  %v2515_v60 = vsel %vm736_vm0, %v1737_v29, %v2426_v39  ;;  %v2578_v20 = vsel %vm2545_vm14, %v2529_v23, %v2562_v14  ;;  %p3284_p11 = scmp.ne.s32.totalorder %s4779_s30, %s3283_s18  ;;  %p3290_p0 = scmp.lt.s32.totalorder %s4779_s30, %s3288_s29 }
 0x33a   : > { %v2565_v32 = vmul.f32 %v4575_v41, %v2532_v22  ;;  %v2531_v33 = vsel %vm542_vm1, %v2515_v60, %v4499_v53  ;;  %3211 = vmatprep.mubr.msk.f32.mxu1 %vm1490_vm6, %v2578_v20  ;;  %vm2548_vm3 = vcmp.ge.f32.partialorder %v2532_v22, 0.0  ;;  %v1746_v53 = vpop.f32.mrf.mxu1  ;;  %p3291_p1 = scmp.lt.s32.totalorder %s3289_s21, %s3283_s18 }
 0x33b   : > { %v2564_v28 = vmul.f32 %v4575_v41, %v2531_v33  ;;  %3212 = vmatmul.mubr.msk.f32.gmra.mxu1 %vm1490_vm6, %v2579_v27  ;;  %vm2547_vm2 = vcmp.ge.f32.partialorder %v2531_v33, 0.0  ;;  %v1747_v38 = vadd.f32 %v4531_v40, %v1746_v53  ;;  %p3285_p12 = pnand %p3284_p11, %p3462_p5 }
 0x33c   : > { %v2581_v63 = vsel %vm2548_vm3, %v2532_v22, %v2565_v32  ;;  %v3160_v55 = vpop.f32.mrf.mxu1  ;;  %p3292_p2 = por %p3291_p1, %p3290_p0 }
 0x33d   : > { %v2580_v2 = vsel %vm2547_vm2, %v2531_v33, %v2564_v28  ;;  %p3286_p13 = pneg %p3285_p12 }
 0x33e   : > { %3214 = vmatprep.mubr.msk.f32.mxu1 %vm1490_vm6, %v2580_v2  ;;  %v1756_v59 = vpop.f32.mrf.mxu1 }
 0x33f   : > { %3215 = vmatmul.mubr.msk.f32.gmra.mxu1 %vm1490_vm6, %v2581_v63  ;;  %v1757_v45 = vadd.f32 %v4531_v40, %v1756_v59  ;;  %p3293_p3 = pnand %p3292_p2, %p3286_p13 }
 0x340   : > { %v3163_v57 = vpop.f32.mrf.mxu1 }
 0x341   : > { %v1772_v21 = vadd.f32 %v3163_v57, %v4531_v40 }
 0x36f   : > { %v2430_v5 = vpop.permute.xlu0 %2429 }
 0x370   : > { %v2517_v42 = vsel %vm736_vm0, %v1747_v38, %v2430_v5 }
 0x371   : > { %v2533_v4 = vsel %vm542_vm1, %v2517_v42, %v4508_v11 }
 0x372   : > { %v2566_v7 = vmul.f32 %v4575_v41, %v2533_v4  ;;  %vm2549_vm4 = vcmp.ge.f32.partialorder %v2533_v4, 0.0 }
 0x374   : > { %v2582_v58 = vsel %vm2549_vm4, %v2533_v4, %v2566_v7 }
 0x375   : > { %3217 = vmatprep.mubr.msk.f32.mxu1 %vm1490_vm6, %v2582_v58 }
 0x37e   : > { %v2432_v15 = vpop.permute.xlu1 %2431 }
 0x37f   : > { %v2518_v9 = vsel %vm736_vm0, %v1752_v34, %v2432_v15 }
 0x380   : > { %v2534_v0 = vsel %vm542_vm1, %v2518_v9, %v4577_v30  ;;  %v1762_v30 = vadd.f32 %v3160_v55, %v4531_v40 }
 0x381   : > { %v2567_v61 = vmul.f32 %v4575_v41, %v2534_v0  ;;  %vm2550_vm5 = vcmp.ge.f32.partialorder %v2534_v0, 0.0 }
 0x383   : > { %v2583_v11 = vsel %vm2550_vm5, %v2534_v0, %v2567_v61 }
 0x384   : > { %3218 = vmatmul.mubr.msk.f32.gmra.mxu1 %vm1490_vm6, %v2583_v11 }
 0x387   : > { %v2434_v52 = vpop.permute.xlu0 %2433 }
 0x388   : > { %v2519_v17 = vsel %vm736_vm0, %v1757_v45, %v2434_v52 }
 0x389   : > { %v2535_v43 = vsel %vm542_vm1, %v2519_v17, %v4514_v54  ;;  %v1766_v54 = vpop.f32.mrf.mxu1 }
 0x38a   : > { %v2568_v6 = vmul.f32 %v4575_v41, %v2535_v43  ;;  %vm2551_vm7 = vcmp.ge.f32.partialorder %v2535_v43, 0.0  ;;  %v1767_v1 = vadd.f32 %v4531_v40, %v1766_v54 }
 0x38b   : > { %v3166_v51 = vpop.f32.mrf.mxu1 }
 0x38c   : > { %v2584_v56 = vsel %vm2551_vm7, %v2535_v43, %v2568_v6  ;;  %v1782_v27 = vadd.f32 %v3166_v51, %v4531_v40 }
 0x38d   : > { %3220 = vmatprep.mubr.msk.f32.mxu1 %vm1490_vm6, %v2584_v56  ;;  %v1776_v10 = vpop.f32.mrf.mxu1 }
 0x392   : > { %v2436_v19 = vpop.permute.xlu1 %2435 }
 0x393   : > { %v2520_v25 = vsel %vm736_vm0, %v1762_v30, %v2436_v19 }
 0x394   : > { %v2536_v18 = vsel %vm542_vm1, %v2520_v25, %v4595_v37 }
 0x395   : > { %v2569_v8 = vmul.f32 %v4575_v41, %v2536_v18  ;;  %vm2552_vm8 = vcmp.ge.f32.partialorder %v2536_v18, 0.0 }
 0x397   : > { %v2585_v24 = vsel %vm2552_vm8, %v2536_v18, %v2569_v8 }
 0x398   : > { %3221 = vmatmul.mubr.msk.f32.gmra.mxu1 %vm1490_vm6, %v2585_v24 }
 0x39a   : > { %v2440_v13 = vpop.permute.xlu1 %2439 }
 0x39b   : > { %v2522_v62 = vsel %vm736_vm0, %v1772_v21, %v2440_v13  ;;  %v2438_v35 = vpop.permute.xlu0 %2437 }
 0x39c   : > { %v2538_v44 = vsel %vm542_vm1, %v2522_v62, %v4617_v50  ;;  %v2521_v37 = vsel %vm736_vm0, %v1767_v1, %v2438_v35 }
 0x39d   : > { %v2571_v36 = vmul.f32 %v4575_v41, %v2538_v44  ;;  %v2537_v31 = vsel %vm542_vm1, %v2521_v37, %v4524_v26  ;;  %vm2554_vm10 = vcmp.ge.f32.partialorder %v2538_v44, 0.0 }
 0x39e   : > { %v2570_v3 = vmul.f32 %v4575_v41, %v2537_v31  ;;  %v2490_v46 = vpop.permute.xlu1 %2489  ;;  %vm2553_vm9 = vcmp.ge.f32.partialorder %v2537_v31, 0.0 }
 0x39f   : > { %v2462_v23 = vpop.permute.xlu0 %2461  ;;  %v2587_v47 = vsel %vm2554_vm10, %v2538_v44, %v2571_v36 }
 0x3a0   : > { %v2525_v29 = vsel %vm542_vm1, %v4563_v48, %v2462_v23  ;;  %v2586_v14 = vsel %vm2553_vm9, %v2537_v31, %v2570_v3  ;;  %v1777_v48 = vadd.f32 %v4531_v40, %v1776_v10  ;;  %v3004_v40 = vld [vmem:[%s4836_s10] ss:$0 sm:$0xff] }
 0x3a1   : > { %vm2541_vm11 = vcmp.ge.f32.partialorder %v2525_v29, 0.0  ;;  %v2558_v50 = vmul.f32 %v4575_v41, %v2525_v29  ;;  %3223 = vmatprep.mubr.msk.f32.mxu1 %vm1490_vm6, %v2586_v14 }
 0x3a2   : > { %v2444_v39 = vpop.permute.xlu1 %2443  ;;  %3224 = vmatmul.mubr.msk.f32.gmra.mxu1 %vm1490_vm6, %v2587_v47 }
 0x3a3   : > { %v2464_v26 = vpop.permute.xlu0 %2463  ;;  %v2574_v22 = vsel %vm2541_vm11, %v2525_v29, %v2558_v50  ;;  %v2524_v2 = vsel %vm736_vm0, %v1782_v27, %v2444_v39 }
 0x3a4   : > { %v2526_v60 = vsel %vm542_vm1, %v4547_v16, %v2464_v26  ;;  %3205 = vmatprep.mubr.msk.f32.mxu0 %vm1490_vm6, %v2574_v22 }
 0x3a5   : > { %vm2542_vm12 = vcmp.ge.f32.partialorder %v2526_v60, 0.0  ;;  %v2559_v20 = vmul.f32 %v4575_v41, %v2526_v60 }
 0x3a6   : > { %v2442_v32 = vpop.permute.xlu1 %2441 }
 0x3a7   : > { %v2575_v33 = vsel %vm2542_vm12, %v2526_v60, %v2559_v20  ;;  %v2523_v12 = vsel %vm736_vm0, %v1777_v48, %v2442_v32 }
 0x3a8   : > { %v2539_v28 = vsel %vm542_vm1, %v2523_v12, %v2490_v46  ;;  %3206 = vmatmul.mubr.msk.f32.vlgmr.msra.gmra.mxu0 %vm1490_vm6, %v2575_v33 }
 0x3a9   : > { %v2572_v16 = vmul.f32 %v4575_v41, %v2539_v28  ;;  %vm2555_vm13 = vcmp.ge.f32.partialorder %v2539_v28, 0.0 }
 0x3aa   : > { %v2492_v63 = vpop.permute.xlu1 %2491 }
 0x3ab   : > { %v2540_v49 = vsel %vm542_vm1, %v2524_v2, %v2492_v63  ;;  %v2588_v53 = vsel %vm2555_vm13, %v2539_v28, %v2572_v16 }
 0x3ac   : > { %vm2556_vm14 = vcmp.ge.f32.partialorder %v2540_v49, 0.0  ;;  %v2573_v38 = vmul.f32 %v4575_v41, %v2540_v49  ;;  %3226 = vmatprep.mubr.msk.f32.mxu1 %vm1490_vm6, %v2588_v53 }
 0x3ae   : > { %v2589_v5 = vsel %vm2556_vm14, %v2540_v49, %v2573_v38 }
 0x3af   : > { %3227 = vmatmul.mubr.msk.f32.gmra.mxu1 %vm1490_vm6, %v2589_v5 }
 0x3f0   : > { %v3210_v42 = vpop.f32.mrf.mxu1 }
 0x3f1   : > { %v2729_v4 = vadd.f32 %v3210_v42, %v3004_v40 }
 0x3f2   : > { %v2723_v7 = vpop.f32.mrf.mxu1 }
 0x3f3   : > { %2795 = vst.msk [vmem:[%s4740_s16 + $0x18] sm:$0xff] %vm1490_vm6, %v2729_v4  ;;  %v2724_v41 = vadd.f32 %v3004_v40, %v2723_v7 }
 0x3f5   : > { %2794 = vst.msk [vmem:[%s4740_s16 + $0x10] sm:$0xff] %vm1490_vm6, %v2724_v41 }
 0x3fb   : > { %v3213_v58 = vpop.f32.mrf.mxu1 }
 0x3fc   : > { %v2739_v34 = vadd.f32 %v3213_v58, %v3004_v40 }
 0x3fd   : > { %v2733_v15 = vpop.f32.mrf.mxu1 }
 0x3fe   : > { %2797 = vst.msk [vmem:[%s4740_s16 + $0x28] sm:$0xff] %vm1490_vm6, %v2739_v34  ;;  %v2734_v55 = vadd.f32 %v3004_v40, %v2733_v15 }
 0x3ff   : > { %v3216_v9 = vpop.f32.mrf.mxu1 }
 0x400   : > { %2796 = vst.msk [vmem:[%s4740_s16 + $0x20] sm:$0xff] %vm1490_vm6, %v2734_v55  ;;  %v2749_v0 = vadd.f32 %v3216_v9, %v3004_v40 }
 0x401   : > { %v2743_v61 = vpop.f32.mrf.mxu1 }
 0x402   : > { %2799 = vst.msk [vmem:[%s4740_s16 + $0x38] sm:$0xff] %vm1490_vm6, %v2749_v0  ;;  %v2744_v59 = vadd.f32 %v3004_v40, %v2743_v61 }
 0x404   : > { %2798 = vst.msk [vmem:[%s4740_s16 + $0x30] sm:$0xff] %vm1490_vm6, %v2744_v59 }
 0x444   : > { %v3219_v11 = vpop.f32.mrf.mxu1 }
 0x445   : > { %v2759_v45 = vadd.f32 %v3219_v11, %v3004_v40 }
 0x446   : > { %v2753_v52 = vpop.f32.mrf.mxu1 }
 0x447   : > { %2801 = vst.msk [vmem:[%s4740_s16 + $0x48] sm:$0xff] %vm1490_vm6, %v2759_v45  ;;  %v2754_v17 = vadd.f32 %v3004_v40, %v2753_v52 }
 0x449   : > { %2800 = vst.msk [vmem:[%s4740_s16 + $0x40] sm:$0xff] %vm1490_vm6, %v2754_v17 }
 0x458   : > { %v3222_v43 = vpop.f32.mrf.mxu1 }
 0x459   : > { %v2769_v6 = vadd.f32 %v3222_v43, %v3004_v40 }
 0x45a   : > { %v2763_v56 = vpop.f32.mrf.mxu1 }
 0x45b   : > { %2803 = vst.msk [vmem:[%s4740_s16 + $0x58] sm:$0xff] %vm1490_vm6, %v2769_v6  ;;  %v2764_v30 = vadd.f32 %v3004_v40, %v2763_v56 }
 0x45d   : > { %2802 = vst.msk [vmem:[%s4740_s16 + $0x50] sm:$0xff] %vm1490_vm6, %v2764_v30 }
 0x462   : > { %v3225_v19 = vpop.f32.mrf.mxu1 }
 0x463   : > { %v2779_v25 = vadd.f32 %v3225_v19, %v3004_v40 }
 0x464   : > { %v2773_v57 = vpop.f32.mrf.mxu1 }
 0x465   : > { %2805 = vst.msk [vmem:[%s4740_s16 + $0x68] sm:$0xff] %vm1490_vm6, %v2779_v25  ;;  %v2774_v18 = vadd.f32 %v3004_v40, %v2773_v57 }
 0x467   : > { %2804 = vst.msk [vmem:[%s4740_s16 + $0x60] sm:$0xff] %vm1490_vm6, %v2774_v18 }
 0x468   : > { %v3207_v8 = vpop.f32.mrf.mxu0 }
 0x469   : > { %v2719_v24 = vadd.f32 %v3207_v8, %v3004_v40 }
 0x46a   : > { %v2713_v54 = vpop.f32.mrf.mxu0 }
 0x46b   : > { %2793 = vst.msk [vmem:[%s4740_s16 + $0x8] sm:$0xff] %vm1490_vm6, %v2719_v24  ;;  %v2714_v21 = vadd.f32 %v3004_v40, %v2713_v54 }
 0x46d   : > { %2792 = vst.msk [vmem:[%s4740_s16] sm:$0xff] %vm1490_vm6, %v2714_v21 }
 0x46f   : > { %v3228_v1 = vpop.f32.mrf.mxu1 }
 0x470   : > { %v2789_v13 = vadd.f32 %v3228_v1, %v3004_v40 }
 0x471   : > { %v2783_v62 = vpop.f32.mrf.mxu1 }
 0x472   : > { %2807 = vst.msk [vmem:[%s4740_s16 + $0x78] sm:$0xff] %vm1490_vm6, %v2789_v13  ;;  %v2784_v35 = vadd.f32 %v3004_v40, %v2783_v62 }
 0x474   : > { %2806 = vst.msk [vmem:[%s4740_s16 + $0x70] sm:$0xff] %vm1490_vm6, %v2784_v35 }
 0x475   : > { %3296 = shalt.err (!%p3293_p3)
}
 0x476   : > { %s3297_s27 = scalar_lea.hbm %s4775_s19, 2048  ;;  %s3301_s17 = scalar_lea.hbm %s4838_s12, 4096 }
 0x477   : > { %p3298_p4 = scmp.ne.s32.totalorder %s4775_s19, %s3297_s27  ;;  %p3302_p9 = scmp.lt.s32.totalorder %s4775_s19, %s4838_s12 }
 0x478   : > { %p3303_p10 = scmp.lt.s32.totalorder %s3301_s17, %s3297_s27 }
 0x479   : > { %p3299_p7 = pnand %p3298_p4, %p3462_p5 }
 0x47a   : > { %p3304_p11 = por %p3303_p10, %p3302_p9 }
 0x47b   : > { %p3300_p8 = pneg %p3299_p7 }
 0x47d   : > { %p3305_p12 = pnand %p3304_p11, %p3300_p8 }
 0x47f   : > { %3308 = shalt.err (!%p3305_p12)
}
 0x480   : > { %s3355_s18 = smov 128  }
 0x481   : > { %3233 = dma.vmem_to_hbm [thread:$0]  (%p3462_p5), %s4779_s30, 2048, %s4775_s19, %s4785_s11, %s3355_s18, %s3355_s18, %s4875_s20  }
 0x482 PF: > { %p3239_p13 = scmp.ge.s32.totalorder %s3343_s26, 2  ;;  %s2838_s29 = sand.u32 1, %s3331_s23  }
 0x483   : > { %s2839_s0 = scalar_lea.sflag [#allocation5], %s2838_s29 }
 0x484   : > { %p3236_p0 = pnand %p3239_p13, %p3466_p6 }
 0x486   : > { %p3237_p1 = pneg %p3236_p0 }
 0x488   : > { %3326 = dma.done.wait (%p3237_p1), %s2839_s0, 2048  }
 0x489   : > { %3328 = vsyncadd (%p3237_p1), %s2839_s0, 4294965248  ;;  %p23_p2 = scmp.ge.s32.totalorder %s3449_s28, 4   ;;  %s4891_s23 = smov %s3335_s24 }
 0x48a   : > { %s4892_s24 = smov %s3339_s25  ;;  %s4893_s25 = smov %s3460_s13 }
 0x48b   : > { %s4894_s26 = smov %s3449_s28  ;;  %25 = sbr.rel (!%p23_p2) target bundleno = 7 (0x7), region = 112 }
 0x490   :  { %2844 = vsyncpa [#allocation5], 1 }
 0x491   :  { %2846 = vsyncpa [#allocation5 + $0x1], 1 }

</bundles_post_ra>
